<compile_context>
chip_gen: v7x
topology: tpu7x:2x2x1
jax: 0.10.0
libtpu: 0.0.40
codegen_flags: <defaults>
</compile_context>

<pallas_src>
import functools
import math

import jax
import jax.numpy as jnp
from jax.experimental import pallas as pl
from jax.experimental.pallas import tpu as pltpu

# ---------------- config (small, deterministic synthetic encoder) ----------------
VOCAB = 100
HIDDEN = 128
NUM_HEADS = 4
HEAD_DIM = HIDDEN // NUM_HEADS
INTERMEDIATE = 256
NUM_LAYERS = 2
MAX_POS = 16
TYPE_VOCAB = 2
LN_EPS = 1e-12
DROPOUT_P = 0.05


# ---------------- fully fused encoder kernel ----------------
def _encoder_kernel(emb_ref, mask_ref, eg_ref, eb_ref,
                    wqkv_ref, bqkv_ref, wo_ref, bo_ref,
                    ln1g_ref, ln1b_ref, w1_ref, b1_ref, w2_ref, b2_ref,
                    ln2g_ref, ln2b_ref, dscale_ref, out_ref,
                    *, num_layers, batch, seq, hidden, num_heads, head_dim, eps):
    f32 = jnp.float32

    def layernorm(h, g, b):
        mean = jnp.mean(h, axis=-1, keepdims=True)
        var = jnp.mean((h - mean) ** 2, axis=-1, keepdims=True)
        return (h - mean) * jax.lax.rsqrt(var + eps) * g + b

    def gelu(y):
        # TODO(synk): HF BERT default 'gelu' is erf-based; tanh approximation
        # is used here (EUP-friendly), small numerical drift vs. PyTorch.
        c = math.sqrt(2.0 / math.pi)
        return 0.5 * y * (1.0 + jnp.tanh(c * (y + 0.044715 * y * y * y)))

    # Embedding LayerNorm (no residual input — zero-residual stream removed).
    x = layernorm(emb_ref[...], eg_ref[...], eb_ref[...])          # [B*S, H]

    amask = mask_ref[...]                                          # [B, S] additive

    # Per-head lane masks (hoisted): head h owns lanes [h*D, (h+1)*D).
    lane = jax.lax.broadcasted_iota(jnp.int32, (1, hidden), 1)
    head_masks = [
        ((lane >= h * head_dim) & (lane < (h + 1) * head_dim)).astype(f32)
        for h in range(num_heads)
    ]
    scale = 1.0 / math.sqrt(head_dim)

    for l in range(num_layers):
        # Fused QKV projection: one MXU pass, lane-dense [B*S, 3H] output.
        qkv = jnp.dot(x, wqkv_ref[l], preferred_element_type=f32) + bqkv_ref[l]
        q = qkv[:, 0:hidden]
        k = qkv[:, hidden:2 * hidden]
        v = qkv[:, 2 * hidden:3 * hidden]

        # Multi-head attention, heads handled via lane masks so every matmul
        # is a full 128-lane contraction and the context stays lane-dense.
        ctx_rows = []
        for b in range(batch):
            rows = slice(b * seq, (b + 1) * seq)
            qb = q[rows, :]
            kb = k[rows, :]
            vb = v[rows, :]
            maskb = amask[b:b + 1, :]                              # [1, S]
            ctx_b = jnp.zeros((seq, hidden), f32)
            for h in range(num_heads):
                hm = head_masks[h]
                # scores_h = (q masked to head-h lanes) . k  (contract lanes)
                s = jax.lax.dot_general(
                    qb * hm, kb, (((1,), (1,)), ((), ())),
                    preferred_element_type=f32) * scale + maskb    # [S, S]
                m = jnp.max(s, axis=-1, keepdims=True)
                p = jnp.exp(s - m)
                p = p / jnp.sum(p, axis=-1, keepdims=True)
                # p_h @ (v masked to head-h lanes) lands the head's output in
                # its own lane block; summing over heads == head concat.
                ctx_b = ctx_b + jnp.dot(p, vb * hm, preferred_element_type=f32)
            ctx_rows.append(ctx_b)
        ctx = jnp.concatenate(ctx_rows, axis=0)                    # [B*S, H]

        attn_out = jnp.dot(ctx, wo_ref[l], preferred_element_type=f32) + bo_ref[l]
        x = layernorm(attn_out + x, ln1g_ref[l], ln1b_ref[l])

        h1 = gelu(jnp.dot(x, w1_ref[l], preferred_element_type=f32) + b1_ref[l])
        h2 = jnp.dot(h1, w2_ref[l], preferred_element_type=f32) + b2_ref[l]
        x = layernorm(h2 + x, ln2g_ref[l], ln2b_ref[l])

    # CLS slice (row 0 of each sequence) + dropout scale, fused into the output.
    cls = jnp.concatenate([x[b * seq:b * seq + 1, :] for b in range(batch)],
                          axis=0)                                  # [B, H]
    out_ref[...] = (cls * dscale_ref[...]).astype(out_ref.dtype)


# ---------------- wrapper ----------------
def lmodel_forward(params, input_ids, attention_mask, token_type_ids=None,
                   use_dropout=True, training=False, dropout_rng=None):
    B, S = input_ids.shape
    if token_type_ids is None:
        token_type_ids = jnp.zeros_like(input_ids)

    # Embedding gather stays in XLA (data-dependent gather, tiny tables).
    emb = (params["word_emb"][input_ids]
           + params["pos_emb"][:S][None, :, :]
           + params["type_emb"][token_type_ids])
    emb = emb.reshape(B * S, HIDDEN).astype(jnp.float32)

    add_mask = (1.0 - attention_mask.astype(jnp.float32)) * -1e9   # [B, S]

    # nn.Dropout is identity in eval mode; in training mode we precompute the
    # keep/scale mask with jax.random (no in-kernel PRNG) and fuse the multiply.
    if use_dropout and training:
        if dropout_rng is None:
            dropout_rng = jax.random.PRNGKey(0)
        keep = jax.random.bernoulli(dropout_rng, 1.0 - DROPOUT_P, (B, HIDDEN))
        dscale = keep.astype(jnp.float32) / (1.0 - DROPOUT_P)
    else:
        dscale = jnp.ones((B, HIDDEN), jnp.float32)

    st = params["stacked"]
    args = (emb, add_mask,
            params["emb_ln_g"], params["emb_ln_b"],
            st["wqkv"], st["bqkv"], st["wo"], st["bo"],
            st["ln1_g"], st["ln1_b"], st["w1"], st["b1"], st["w2"], st["b2"],
            st["ln2_g"], st["ln2_b"], dscale)

    kernel = functools.partial(
        _encoder_kernel, num_layers=NUM_LAYERS, batch=B, seq=S, hidden=HIDDEN,
        num_heads=NUM_HEADS, head_dim=HEAD_DIM, eps=LN_EPS)

    feat = pl.pallas_call(
        kernel,
        in_specs=[pl.BlockSpec(memory_space=pltpu.MemorySpace.VMEM)] * len(args),
        out_specs=pl.BlockSpec(memory_space=pltpu.MemorySpace.VMEM),
        out_shape=jax.ShapeDtypeStruct((B, HIDDEN), jnp.float32),
    )(*args)
    # pooler_output / hidden_states are fetched but unused in the PyTorch
    # forward, so they are not computed here.
    return feat


# ---------------- deterministic parameter init ----------------
def init_params(key):
    keys = jax.random.split(key, 3 + NUM_LAYERS)

    def norm(k, shape, scale=0.02):
        return scale * jax.random.normal(k, shape, jnp.float32)

    params = {
        "word_emb": norm(keys[0], (VOCAB, HIDDEN)),
        "pos_emb": norm(keys[1], (MAX_POS, HIDDEN)),
        "type_emb": norm(keys[2], (TYPE_VOCAB, HIDDEN)),
        "emb_ln_g": jnp.ones((1, HIDDEN), jnp.float32),
        "emb_ln_b": jnp.zeros((1, HIDDEN), jnp.float32),
    }

    names = ["wqkv", "bqkv", "wo", "bo", "ln1_g", "ln1_b",
             "w1", "b1", "w2", "b2", "ln2_g", "ln2_b"]
    per = {n: [] for n in names}
    for i in range(NUM_LAYERS):
        lk = jax.random.split(keys[3 + i], 6)
        wq = norm(lk[0], (HIDDEN, HIDDEN))
        wk = norm(lk[1], (HIDDEN, HIDDEN))
        wv = norm(lk[2], (HIDDEN, HIDDEN))
        per["wqkv"].append(jnp.concatenate([wq, wk, wv], axis=1))   # [H, 3H]
        per["bqkv"].append(jnp.zeros((1, 3 * HIDDEN), jnp.float32))
        per["wo"].append(norm(lk[3], (HIDDEN, HIDDEN)))
        per["bo"].append(jnp.zeros((1, HIDDEN), jnp.float32))
        per["ln1_g"].append(jnp.ones((1, HIDDEN), jnp.float32))
        per["ln1_b"].append(jnp.zeros((1, HIDDEN), jnp.float32))
        per["w1"].append(norm(lk[4], (HIDDEN, INTERMEDIATE)))
        per["b1"].append(jnp.zeros((1, INTERMEDIATE), jnp.float32))
        per["w2"].append(norm(lk[5], (INTERMEDIATE, HIDDEN)))
        per["b2"].append(jnp.zeros((1, HIDDEN), jnp.float32))
        per["ln2_g"].append(jnp.ones((1, HIDDEN), jnp.float32))
        per["ln2_b"].append(jnp.zeros((1, HIDDEN), jnp.float32))
    params["stacked"] = {k: jnp.stack(v, axis=0) for k, v in per.items()}
    return params


if __name__ == "__main__":
    key = jax.random.PRNGKey(0)
    pkey, ikey = jax.random.split(key)
    params = init_params(pkey)

    B, S = 2, 8
    input_ids = jax.random.randint(ikey, (B, S), 0, VOCAB, dtype=jnp.int32)
    attention_mask = jnp.array([[1, 1, 1, 1, 1, 1, 1, 1],
                                [1, 1, 1, 1, 1, 1, 0, 0]], dtype=jnp.int32)
    token_type_ids = jnp.zeros((B, S), jnp.int32)

    # eval-mode parity with the PyTorch module (nn.Dropout is identity in eval).
    feat = lmodel_forward(params, input_ids, attention_mask, token_type_ids,
                          use_dropout=True, training=False)
    feat = jax.block_until_ready(feat)
    assert feat.shape == (B, HIDDEN)
    assert bool(jnp.all(jnp.isfinite(feat)))
    print("KERNEL_OK")
</pallas_src>

<mosaic_0001>
module attributes {stable_mosaic.version = 11 : i64} {
  func.func @_encoder_kernel(%arg0: memref<16x128xf32, #tpu.memory_space<vmem>>, %arg1: memref<2x8xf32, #tpu.memory_space<vmem>>, %arg2: memref<1x128xf32, #tpu.memory_space<vmem>>, %arg3: memref<1x128xf32, #tpu.memory_space<vmem>>, %arg4: memref<2x128x384xf32, #tpu.memory_space<vmem>>, %arg5: memref<2x1x384xf32, #tpu.memory_space<vmem>>, %arg6: memref<2x128x128xf32, #tpu.memory_space<vmem>>, %arg7: memref<2x1x128xf32, #tpu.memory_space<vmem>>, %arg8: memref<2x1x128xf32, #tpu.memory_space<vmem>>, %arg9: memref<2x1x128xf32, #tpu.memory_space<vmem>>, %arg10: memref<2x128x256xf32, #tpu.memory_space<vmem>>, %arg11: memref<2x1x256xf32, #tpu.memory_space<vmem>>, %arg12: memref<2x256x128xf32, #tpu.memory_space<vmem>>, %arg13: memref<2x1x128xf32, #tpu.memory_space<vmem>>, %arg14: memref<2x1x128xf32, #tpu.memory_space<vmem>>, %arg15: memref<2x1x128xf32, #tpu.memory_space<vmem>>, %arg16: memref<2x128xf32, #tpu.memory_space<vmem>>, %arg17: memref<2x128xf32, #tpu.memory_space<vmem>>) attributes {dimension_semantics = [], scalar_prefetch = 0 : i64, scratch_operands = 0 : i64, tpu.core_type = #tpu.core_type<tc>} {
    %c0 = arith.constant 0 : index
    %c0_0 = arith.constant 0 : index
    %0 = vector.load %arg0[%c0, %c0_0] : memref<16x128xf32, #tpu.memory_space<vmem>>, vector<16x128xf32>
    %c0_1 = arith.constant 0 : index
    %c0_2 = arith.constant 0 : index
    %1 = vector.load %arg2[%c0_1, %c0_2] : memref<1x128xf32, #tpu.memory_space<vmem>>, vector<1x128xf32>
    %c0_3 = arith.constant 0 : index
    %c0_4 = arith.constant 0 : index
    %2 = vector.load %arg3[%c0_3, %c0_4] : memref<1x128xf32, #tpu.memory_space<vmem>>, vector<1x128xf32>
    %cst = arith.constant dense<0.000000e+00> : vector<16xf32>
    %3 = vector.multi_reduction <add>, %0, %cst [1] : vector<16x128xf32> to vector<16xf32>
    %4 = vector.shape_cast %3 : vector<16xf32> to vector<16x1xf32>
    %cst_5 = arith.constant 1.280000e+02 : f32
    %5 = vector.broadcast %cst_5 : f32 to vector<16x1xf32>
    %6 = arith.divf %4, %5 : vector<16x1xf32>
    %7 = vector.broadcast %6 : vector<16x1xf32> to vector<16x128xf32>
    %8 = arith.subf %0, %7 : vector<16x128xf32>
    %9 = arith.mulf %8, %8 : vector<16x128xf32>
    %cst_6 = arith.constant dense<0.000000e+00> : vector<16xf32>
    %10 = vector.multi_reduction <add>, %9, %cst_6 [1] : vector<16x128xf32> to vector<16xf32>
    %11 = vector.shape_cast %10 : vector<16xf32> to vector<16x1xf32>
    %cst_7 = arith.constant 1.280000e+02 : f32
    %12 = vector.broadcast %cst_7 : f32 to vector<16x1xf32>
    %13 = arith.divf %11, %12 : vector<16x1xf32>
    %14 = vector.broadcast %6 : vector<16x1xf32> to vector<16x128xf32>
    %15 = arith.subf %0, %14 : vector<16x128xf32>
    %cst_8 = arith.constant 9.99999996E-13 : f32
    %16 = vector.broadcast %cst_8 : f32 to vector<16x1xf32>
    %17 = arith.addf %13, %16 : vector<16x1xf32>
    %18 = math.rsqrt %17 : vector<16x1xf32>
    %19 = vector.broadcast %18 : vector<16x1xf32> to vector<16x128xf32>
    %20 = arith.mulf %15, %19 : vector<16x128xf32>
    %21 = vector.broadcast %1 : vector<1x128xf32> to vector<16x128xf32>
    %22 = arith.mulf %20, %21 : vector<16x128xf32>
    %23 = vector.broadcast %2 : vector<1x128xf32> to vector<16x128xf32>
    %24 = arith.addf %22, %23 : vector<16x128xf32>
    %c0_9 = arith.constant 0 : index
    %c0_10 = arith.constant 0 : index
    %25 = vector.load %arg1[%c0_9, %c0_10] : memref<2x8xf32, #tpu.memory_space<vmem>>, vector<2x8xf32>
    %26 = tpu.iota {dimensions = array<i32: 1>} : vector<1x128xi32>
    %c0_i32 = arith.constant 0 : i32
    %27 = vector.broadcast %c0_i32 : i32 to vector<1x128xi32>
    %28 = arith.cmpi sge, %26, %27 : vector<1x128xi32>
    %c32_i32 = arith.constant 32 : i32
    %29 = vector.broadcast %c32_i32 : i32 to vector<1x128xi32>
    %30 = arith.cmpi slt, %26, %29 : vector<1x128xi32>
    %31 = arith.andi %28, %30 : vector<1x128xi1>
    %32 = arith.extui %31 : vector<1x128xi1> to vector<1x128xi32>
    %33 = arith.sitofp %32 : vector<1x128xi32> to vector<1x128xf32>
    %c32_i32_11 = arith.constant 32 : i32
    %34 = vector.broadcast %c32_i32_11 : i32 to vector<1x128xi32>
    %35 = arith.cmpi sge, %26, %34 : vector<1x128xi32>
    %c64_i32 = arith.constant 64 : i32
    %36 = vector.broadcast %c64_i32 : i32 to vector<1x128xi32>
    %37 = arith.cmpi slt, %26, %36 : vector<1x128xi32>
    %38 = arith.andi %35, %37 : vector<1x128xi1>
    %39 = arith.extui %38 : vector<1x128xi1> to vector<1x128xi32>
    %40 = arith.sitofp %39 : vector<1x128xi32> to vector<1x128xf32>
    %c64_i32_12 = arith.constant 64 : i32
    %41 = vector.broadcast %c64_i32_12 : i32 to vector<1x128xi32>
    %42 = arith.cmpi sge, %26, %41 : vector<1x128xi32>
    %c96_i32 = arith.constant 96 : i32
    %43 = vector.broadcast %c96_i32 : i32 to vector<1x128xi32>
    %44 = arith.cmpi slt, %26, %43 : vector<1x128xi32>
    %45 = arith.andi %42, %44 : vector<1x128xi1>
    %46 = arith.extui %45 : vector<1x128xi1> to vector<1x128xi32>
    %47 = arith.sitofp %46 : vector<1x128xi32> to vector<1x128xf32>
    %c96_i32_13 = arith.constant 96 : i32
    %48 = vector.broadcast %c96_i32_13 : i32 to vector<1x128xi32>
    %49 = arith.cmpi sge, %26, %48 : vector<1x128xi32>
    %c128_i32 = arith.constant 128 : i32
    %50 = vector.broadcast %c128_i32 : i32 to vector<1x128xi32>
    %51 = arith.cmpi slt, %26, %50 : vector<1x128xi32>
    %52 = arith.andi %49, %51 : vector<1x128xi1>
    %53 = arith.extui %52 : vector<1x128xi1> to vector<1x128xi32>
    %54 = arith.sitofp %53 : vector<1x128xi32> to vector<1x128xf32>
    %c0_14 = arith.constant 0 : index
    %c0_15 = arith.constant 0 : index
    %c0_16 = arith.constant 0 : index
    %55 = vector.load %arg4[%c0_14, %c0_15, %c0_16] : memref<2x128x384xf32, #tpu.memory_space<vmem>>, vector<1x128x384xf32>
    %56 = vector.shape_cast %55 : vector<1x128x384xf32> to vector<128x384xf32>
    %cst_17 = arith.constant dense<0.000000e+00> : vector<16x384xf32>
    %57 = tpu.matmul %24, %56, %cst_17 {dimension_numbers = #tpu.dot_dimension_numbers<[1], [0], [0], [1], [0, 0, 1, 1], [], []>} : vector<16x128xf32>, vector<128x384xf32>, vector<16x384xf32> -> vector<16x384xf32>
    %c0_18 = arith.constant 0 : index
    %c0_19 = arith.constant 0 : index
    %c0_20 = arith.constant 0 : index
    %58 = vector.load %arg5[%c0_18, %c0_19, %c0_20] : memref<2x1x384xf32, #tpu.memory_space<vmem>>, vector<1x1x384xf32>
    %59 = vector.shape_cast %58 : vector<1x1x384xf32> to vector<1x384xf32>
    %60 = vector.broadcast %59 : vector<1x384xf32> to vector<16x384xf32>
    %61 = arith.addf %57, %60 : vector<16x384xf32>
    %62 = vector.extract_strided_slice %61 {offsets = [0, 0], sizes = [16, 128], strides = [1, 1]} : vector<16x384xf32> to vector<16x128xf32>
    %63 = vector.extract_strided_slice %61 {offsets = [0, 128], sizes = [16, 128], strides = [1, 1]} : vector<16x384xf32> to vector<16x128xf32>
    %64 = vector.extract_strided_slice %61 {offsets = [0, 256], sizes = [16, 128], strides = [1, 1]} : vector<16x384xf32> to vector<16x128xf32>
    %65 = vector.extract_strided_slice %62 {offsets = [0, 0], sizes = [8, 128], strides = [1, 1]} : vector<16x128xf32> to vector<8x128xf32>
    %66 = vector.extract_strided_slice %63 {offsets = [0, 0], sizes = [8, 128], strides = [1, 1]} : vector<16x128xf32> to vector<8x128xf32>
    %67 = vector.extract_strided_slice %64 {offsets = [0, 0], sizes = [8, 128], strides = [1, 1]} : vector<16x128xf32> to vector<8x128xf32>
    %68 = vector.extract_strided_slice %25 {offsets = [0, 0], sizes = [1, 8], strides = [1, 1]} : vector<2x8xf32> to vector<1x8xf32>
    %cst_21 = arith.constant 0.000000e+00 : f32
    %69 = vector.broadcast %cst_21 : f32 to vector<8x128xf32>
    %70 = vector.broadcast %33 : vector<1x128xf32> to vector<8x128xf32>
    %71 = arith.mulf %65, %70 : vector<8x128xf32>
    %cst_22 = arith.constant dense<0.000000e+00> : vector<8x8xf32>
    %72 = tpu.matmul %71, %66, %cst_22 {dimension_numbers = #tpu.dot_dimension_numbers<[1], [1], [0], [0], [0, 0, 1, 0], [], []>} : vector<8x128xf32>, vector<8x128xf32>, vector<8x8xf32> -> vector<8x8xf32>
    %cst_23 = arith.constant 0.176776692 : f32
    %73 = vector.broadcast %cst_23 : f32 to vector<8x8xf32>
    %74 = arith.mulf %72, %73 : vector<8x8xf32>
    %75 = vector.broadcast %68 : vector<1x8xf32> to vector<8x8xf32>
    %76 = arith.addf %74, %75 : vector<8x8xf32>
    %cst_24 = arith.constant dense<0xFF800000> : vector<8xf32>
    %77 = vector.multi_reduction <maximumf>, %76, %cst_24 [1] : vector<8x8xf32> to vector<8xf32>
    %78 = vector.shape_cast %77 : vector<8xf32> to vector<8x1xf32>
    %79 = vector.broadcast %78 : vector<8x1xf32> to vector<8x8xf32>
    %80 = arith.subf %76, %79 : vector<8x8xf32>
    %81 = math.exp %80 : vector<8x8xf32>
    %cst_25 = arith.constant dense<0.000000e+00> : vector<8xf32>
    %82 = vector.multi_reduction <add>, %81, %cst_25 [1] : vector<8x8xf32> to vector<8xf32>
    %83 = vector.shape_cast %82 : vector<8xf32> to vector<8x1xf32>
    %84 = vector.broadcast %83 : vector<8x1xf32> to vector<8x8xf32>
    %85 = arith.divf %81, %84 : vector<8x8xf32>
    %86 = vector.broadcast %33 : vector<1x128xf32> to vector<8x128xf32>
    %87 = arith.mulf %67, %86 : vector<8x128xf32>
    %cst_26 = arith.constant dense<0.000000e+00> : vector<8x128xf32>
    %88 = tpu.matmul %85, %87, %cst_26 {dimension_numbers = #tpu.dot_dimension_numbers<[1], [0], [0], [1], [0, 0, 1, 1], [], []>} : vector<8x8xf32>, vector<8x128xf32>, vector<8x128xf32> -> vector<8x128xf32>
    %89 = arith.addf %69, %88 : vector<8x128xf32>
    %90 = vector.broadcast %40 : vector<1x128xf32> to vector<8x128xf32>
    %91 = arith.mulf %65, %90 : vector<8x128xf32>
    %cst_27 = arith.constant dense<0.000000e+00> : vector<8x8xf32>
    %92 = tpu.matmul %91, %66, %cst_27 {dimension_numbers = #tpu.dot_dimension_numbers<[1], [1], [0], [0], [0, 0, 1, 0], [], []>} : vector<8x128xf32>, vector<8x128xf32>, vector<8x8xf32> -> vector<8x8xf32>
    %cst_28 = arith.constant 0.176776692 : f32
    %93 = vector.broadcast %cst_28 : f32 to vector<8x8xf32>
    %94 = arith.mulf %92, %93 : vector<8x8xf32>
    %95 = vector.broadcast %68 : vector<1x8xf32> to vector<8x8xf32>
    %96 = arith.addf %94, %95 : vector<8x8xf32>
    %cst_29 = arith.constant dense<0xFF800000> : vector<8xf32>
    %97 = vector.multi_reduction <maximumf>, %96, %cst_29 [1] : vector<8x8xf32> to vector<8xf32>
    %98 = vector.shape_cast %97 : vector<8xf32> to vector<8x1xf32>
    %99 = vector.broadcast %98 : vector<8x1xf32> to vector<8x8xf32>
    %100 = arith.subf %96, %99 : vector<8x8xf32>
    %101 = math.exp %100 : vector<8x8xf32>
    %cst_30 = arith.constant dense<0.000000e+00> : vector<8xf32>
    %102 = vector.multi_reduction <add>, %101, %cst_30 [1] : vector<8x8xf32> to vector<8xf32>
    %103 = vector.shape_cast %102 : vector<8xf32> to vector<8x1xf32>
    %104 = vector.broadcast %103 : vector<8x1xf32> to vector<8x8xf32>
    %105 = arith.divf %101, %104 : vector<8x8xf32>
    %106 = vector.broadcast %40 : vector<1x128xf32> to vector<8x128xf32>
    %107 = arith.mulf %67, %106 : vector<8x128xf32>
    %cst_31 = arith.constant dense<0.000000e+00> : vector<8x128xf32>
    %108 = tpu.matmul %105, %107, %cst_31 {dimension_numbers = #tpu.dot_dimension_numbers<[1], [0], [0], [1], [0, 0, 1, 1], [], []>} : vector<8x8xf32>, vector<8x128xf32>, vector<8x128xf32> -> vector<8x128xf32>
    %109 = arith.addf %89, %108 : vector<8x128xf32>
    %110 = vector.broadcast %47 : vector<1x128xf32> to vector<8x128xf32>
    %111 = arith.mulf %65, %110 : vector<8x128xf32>
    %cst_32 = arith.constant dense<0.000000e+00> : vector<8x8xf32>
    %112 = tpu.matmul %111, %66, %cst_32 {dimension_numbers = #tpu.dot_dimension_numbers<[1], [1], [0], [0], [0, 0, 1, 0], [], []>} : vector<8x128xf32>, vector<8x128xf32>, vector<8x8xf32> -> vector<8x8xf32>
    %cst_33 = arith.constant 0.176776692 : f32
    %113 = vector.broadcast %cst_33 : f32 to vector<8x8xf32>
    %114 = arith.mulf %112, %113 : vector<8x8xf32>
    %115 = vector.broadcast %68 : vector<1x8xf32> to vector<8x8xf32>
    %116 = arith.addf %114, %115 : vector<8x8xf32>
    %cst_34 = arith.constant dense<0xFF800000> : vector<8xf32>
    %117 = vector.multi_reduction <maximumf>, %116, %cst_34 [1] : vector<8x8xf32> to vector<8xf32>
    %118 = vector.shape_cast %117 : vector<8xf32> to vector<8x1xf32>
    %119 = vector.broadcast %118 : vector<8x1xf32> to vector<8x8xf32>
    %120 = arith.subf %116, %119 : vector<8x8xf32>
    %121 = math.exp %120 : vector<8x8xf32>
    %cst_35 = arith.constant dense<0.000000e+00> : vector<8xf32>
    %122 = vector.multi_reduction <add>, %121, %cst_35 [1] : vector<8x8xf32> to vector<8xf32>
    %123 = vector.shape_cast %122 : vector<8xf32> to vector<8x1xf32>
    %124 = vector.broadcast %123 : vector<8x1xf32> to vector<8x8xf32>
    %125 = arith.divf %121, %124 : vector<8x8xf32>
    %126 = vector.broadcast %47 : vector<1x128xf32> to vector<8x128xf32>
    %127 = arith.mulf %67, %126 : vector<8x128xf32>
    %cst_36 = arith.constant dense<0.000000e+00> : vector<8x128xf32>
    %128 = tpu.matmul %125, %127, %cst_36 {dimension_numbers = #tpu.dot_dimension_numbers<[1], [0], [0], [1], [0, 0, 1, 1], [], []>} : vector<8x8xf32>, vector<8x128xf32>, vector<8x128xf32> -> vector<8x128xf32>
    %129 = arith.addf %109, %128 : vector<8x128xf32>
    %130 = vector.broadcast %54 : vector<1x128xf32> to vector<8x128xf32>
    %131 = arith.mulf %65, %130 : vector<8x128xf32>
    %cst_37 = arith.constant dense<0.000000e+00> : vector<8x8xf32>
    %132 = tpu.matmul %131, %66, %cst_37 {dimension_numbers = #tpu.dot_dimension_numbers<[1], [1], [0], [0], [0, 0, 1, 0], [], []>} : vector<8x128xf32>, vector<8x128xf32>, vector<8x8xf32> -> vector<8x8xf32>
    %cst_38 = arith.constant 0.176776692 : f32
    %133 = vector.broadcast %cst_38 : f32 to vector<8x8xf32>
    %134 = arith.mulf %132, %133 : vector<8x8xf32>
    %135 = vector.broadcast %68 : vector<1x8xf32> to vector<8x8xf32>
    %136 = arith.addf %134, %135 : vector<8x8xf32>
    %cst_39 = arith.constant dense<0xFF800000> : vector<8xf32>
    %137 = vector.multi_reduction <maximumf>, %136, %cst_39 [1] : vector<8x8xf32> to vector<8xf32>
    %138 = vector.shape_cast %137 : vector<8xf32> to vector<8x1xf32>
    %139 = vector.broadcast %138 : vector<8x1xf32> to vector<8x8xf32>
    %140 = arith.subf %136, %139 : vector<8x8xf32>
    %141 = math.exp %140 : vector<8x8xf32>
    %cst_40 = arith.constant dense<0.000000e+00> : vector<8xf32>
    %142 = vector.multi_reduction <add>, %141, %cst_40 [1] : vector<8x8xf32> to vector<8xf32>
    %143 = vector.shape_cast %142 : vector<8xf32> to vector<8x1xf32>
    %144 = vector.broadcast %143 : vector<8x1xf32> to vector<8x8xf32>
    %145 = arith.divf %141, %144 : vector<8x8xf32>
    %146 = vector.broadcast %54 : vector<1x128xf32> to vector<8x128xf32>
    %147 = arith.mulf %67, %146 : vector<8x128xf32>
    %cst_41 = arith.constant dense<0.000000e+00> : vector<8x128xf32>
    %148 = tpu.matmul %145, %147, %cst_41 {dimension_numbers = #tpu.dot_dimension_numbers<[1], [0], [0], [1], [0, 0, 1, 1], [], []>} : vector<8x8xf32>, vector<8x128xf32>, vector<8x128xf32> -> vector<8x128xf32>
    %149 = arith.addf %129, %148 : vector<8x128xf32>
    %150 = vector.extract_strided_slice %62 {offsets = [8, 0], sizes = [8, 128], strides = [1, 1]} : vector<16x128xf32> to vector<8x128xf32>
    %151 = vector.extract_strided_slice %63 {offsets = [8, 0], sizes = [8, 128], strides = [1, 1]} : vector<16x128xf32> to vector<8x128xf32>
    %152 = vector.extract_strided_slice %64 {offsets = [8, 0], sizes = [8, 128], strides = [1, 1]} : vector<16x128xf32> to vector<8x128xf32>
    %153 = vector.extract_strided_slice %25 {offsets = [1, 0], sizes = [1, 8], strides = [1, 1]} : vector<2x8xf32> to vector<1x8xf32>
    %cst_42 = arith.constant 0.000000e+00 : f32
    %154 = vector.broadcast %cst_42 : f32 to vector<8x128xf32>
    %155 = vector.broadcast %33 : vector<1x128xf32> to vector<8x128xf32>
    %156 = arith.mulf %150, %155 : vector<8x128xf32>
    %cst_43 = arith.constant dense<0.000000e+00> : vector<8x8xf32>
    %157 = tpu.matmul %156, %151, %cst_43 {dimension_numbers = #tpu.dot_dimension_numbers<[1], [1], [0], [0], [0, 0, 1, 0], [], []>} : vector<8x128xf32>, vector<8x128xf32>, vector<8x8xf32> -> vector<8x8xf32>
    %cst_44 = arith.constant 0.176776692 : f32
    %158 = vector.broadcast %cst_44 : f32 to vector<8x8xf32>
    %159 = arith.mulf %157, %158 : vector<8x8xf32>
    %160 = vector.broadcast %153 : vector<1x8xf32> to vector<8x8xf32>
    %161 = arith.addf %159, %160 : vector<8x8xf32>
    %cst_45 = arith.constant dense<0xFF800000> : vector<8xf32>
    %162 = vector.multi_reduction <maximumf>, %161, %cst_45 [1] : vector<8x8xf32> to vector<8xf32>
    %163 = vector.shape_cast %162 : vector<8xf32> to vector<8x1xf32>
    %164 = vector.broadcast %163 : vector<8x1xf32> to vector<8x8xf32>
    %165 = arith.subf %161, %164 : vector<8x8xf32>
    %166 = math.exp %165 : vector<8x8xf32>
    %cst_46 = arith.constant dense<0.000000e+00> : vector<8xf32>
    %167 = vector.multi_reduction <add>, %166, %cst_46 [1] : vector<8x8xf32> to vector<8xf32>
    %168 = vector.shape_cast %167 : vector<8xf32> to vector<8x1xf32>
    %169 = vector.broadcast %168 : vector<8x1xf32> to vector<8x8xf32>
    %170 = arith.divf %166, %169 : vector<8x8xf32>
    %171 = vector.broadcast %33 : vector<1x128xf32> to vector<8x128xf32>
    %172 = arith.mulf %152, %171 : vector<8x128xf32>
    %cst_47 = arith.constant dense<0.000000e+00> : vector<8x128xf32>
    %173 = tpu.matmul %170, %172, %cst_47 {dimension_numbers = #tpu.dot_dimension_numbers<[1], [0], [0], [1], [0, 0, 1, 1], [], []>} : vector<8x8xf32>, vector<8x128xf32>, vector<8x128xf32> -> vector<8x128xf32>
    %174 = arith.addf %154, %173 : vector<8x128xf32>
    %175 = vector.broadcast %40 : vector<1x128xf32> to vector<8x128xf32>
    %176 = arith.mulf %150, %175 : vector<8x128xf32>
    %cst_48 = arith.constant dense<0.000000e+00> : vector<8x8xf32>
    %177 = tpu.matmul %176, %151, %cst_48 {dimension_numbers = #tpu.dot_dimension_numbers<[1], [1], [0], [0], [0, 0, 1, 0], [], []>} : vector<8x128xf32>, vector<8x128xf32>, vector<8x8xf32> -> vector<8x8xf32>
    %cst_49 = arith.constant 0.176776692 : f32
    %178 = vector.broadcast %cst_49 : f32 to vector<8x8xf32>
    %179 = arith.mulf %177, %178 : vector<8x8xf32>
    %180 = vector.broadcast %153 : vector<1x8xf32> to vector<8x8xf32>
    %181 = arith.addf %179, %180 : vector<8x8xf32>
    %cst_50 = arith.constant dense<0xFF800000> : vector<8xf32>
    %182 = vector.multi_reduction <maximumf>, %181, %cst_50 [1] : vector<8x8xf32> to vector<8xf32>
    %183 = vector.shape_cast %182 : vector<8xf32> to vector<8x1xf32>
    %184 = vector.broadcast %183 : vector<8x1xf32> to vector<8x8xf32>
    %185 = arith.subf %181, %184 : vector<8x8xf32>
    %186 = math.exp %185 : vector<8x8xf32>
    %cst_51 = arith.constant dense<0.000000e+00> : vector<8xf32>
    %187 = vector.multi_reduction <add>, %186, %cst_51 [1] : vector<8x8xf32> to vector<8xf32>
    %188 = vector.shape_cast %187 : vector<8xf32> to vector<8x1xf32>
    %189 = vector.broadcast %188 : vector<8x1xf32> to vector<8x8xf32>
    %190 = arith.divf %186, %189 : vector<8x8xf32>
    %191 = vector.broadcast %40 : vector<1x128xf32> to vector<8x128xf32>
    %192 = arith.mulf %152, %191 : vector<8x128xf32>
    %cst_52 = arith.constant dense<0.000000e+00> : vector<8x128xf32>
    %193 = tpu.matmul %190, %192, %cst_52 {dimension_numbers = #tpu.dot_dimension_numbers<[1], [0], [0], [1], [0, 0, 1, 1], [], []>} : vector<8x8xf32>, vector<8x128xf32>, vector<8x128xf32> -> vector<8x128xf32>
    %194 = arith.addf %174, %193 : vector<8x128xf32>
    %195 = vector.broadcast %47 : vector<1x128xf32> to vector<8x128xf32>
    %196 = arith.mulf %150, %195 : vector<8x128xf32>
    %cst_53 = arith.constant dense<0.000000e+00> : vector<8x8xf32>
    %197 = tpu.matmul %196, %151, %cst_53 {dimension_numbers = #tpu.dot_dimension_numbers<[1], [1], [0], [0], [0, 0, 1, 0], [], []>} : vector<8x128xf32>, vector<8x128xf32>, vector<8x8xf32> -> vector<8x8xf32>
    %cst_54 = arith.constant 0.176776692 : f32
    %198 = vector.broadcast %cst_54 : f32 to vector<8x8xf32>
    %199 = arith.mulf %197, %198 : vector<8x8xf32>
    %200 = vector.broadcast %153 : vector<1x8xf32> to vector<8x8xf32>
    %201 = arith.addf %199, %200 : vector<8x8xf32>
    %cst_55 = arith.constant dense<0xFF800000> : vector<8xf32>
    %202 = vector.multi_reduction <maximumf>, %201, %cst_55 [1] : vector<8x8xf32> to vector<8xf32>
    %203 = vector.shape_cast %202 : vector<8xf32> to vector<8x1xf32>
    %204 = vector.broadcast %203 : vector<8x1xf32> to vector<8x8xf32>
    %205 = arith.subf %201, %204 : vector<8x8xf32>
    %206 = math.exp %205 : vector<8x8xf32>
    %cst_56 = arith.constant dense<0.000000e+00> : vector<8xf32>
    %207 = vector.multi_reduction <add>, %206, %cst_56 [1] : vector<8x8xf32> to vector<8xf32>
    %208 = vector.shape_cast %207 : vector<8xf32> to vector<8x1xf32>
    %209 = vector.broadcast %208 : vector<8x1xf32> to vector<8x8xf32>
    %210 = arith.divf %206, %209 : vector<8x8xf32>
    %211 = vector.broadcast %47 : vector<1x128xf32> to vector<8x128xf32>
    %212 = arith.mulf %152, %211 : vector<8x128xf32>
    %cst_57 = arith.constant dense<0.000000e+00> : vector<8x128xf32>
    %213 = tpu.matmul %210, %212, %cst_57 {dimension_numbers = #tpu.dot_dimension_numbers<[1], [0], [0], [1], [0, 0, 1, 1], [], []>} : vector<8x8xf32>, vector<8x128xf32>, vector<8x128xf32> -> vector<8x128xf32>
    %214 = arith.addf %194, %213 : vector<8x128xf32>
    %215 = vector.broadcast %54 : vector<1x128xf32> to vector<8x128xf32>
    %216 = arith.mulf %150, %215 : vector<8x128xf32>
    %cst_58 = arith.constant dense<0.000000e+00> : vector<8x8xf32>
    %217 = tpu.matmul %216, %151, %cst_58 {dimension_numbers = #tpu.dot_dimension_numbers<[1], [1], [0], [0], [0, 0, 1, 0], [], []>} : vector<8x128xf32>, vector<8x128xf32>, vector<8x8xf32> -> vector<8x8xf32>
    %cst_59 = arith.constant 0.176776692 : f32
    %218 = vector.broadcast %cst_59 : f32 to vector<8x8xf32>
    %219 = arith.mulf %217, %218 : vector<8x8xf32>
    %220 = vector.broadcast %153 : vector<1x8xf32> to vector<8x8xf32>
    %221 = arith.addf %219, %220 : vector<8x8xf32>
    %cst_60 = arith.constant dense<0xFF800000> : vector<8xf32>
    %222 = vector.multi_reduction <maximumf>, %221, %cst_60 [1] : vector<8x8xf32> to vector<8xf32>
    %223 = vector.shape_cast %222 : vector<8xf32> to vector<8x1xf32>
    %224 = vector.broadcast %223 : vector<8x1xf32> to vector<8x8xf32>
    %225 = arith.subf %221, %224 : vector<8x8xf32>
    %226 = math.exp %225 : vector<8x8xf32>
    %cst_61 = arith.constant dense<0.000000e+00> : vector<8xf32>
    %227 = vector.multi_reduction <add>, %226, %cst_61 [1] : vector<8x8xf32> to vector<8xf32>
    %228 = vector.shape_cast %227 : vector<8xf32> to vector<8x1xf32>
    %229 = vector.broadcast %228 : vector<8x1xf32> to vector<8x8xf32>
    %230 = arith.divf %226, %229 : vector<8x8xf32>
    %231 = vector.broadcast %54 : vector<1x128xf32> to vector<8x128xf32>
    %232 = arith.mulf %152, %231 : vector<8x128xf32>
    %cst_62 = arith.constant dense<0.000000e+00> : vector<8x128xf32>
    %233 = tpu.matmul %230, %232, %cst_62 {dimension_numbers = #tpu.dot_dimension_numbers<[1], [0], [0], [1], [0, 0, 1, 1], [], []>} : vector<8x8xf32>, vector<8x128xf32>, vector<8x128xf32> -> vector<8x128xf32>
    %234 = arith.addf %214, %233 : vector<8x128xf32>
    %235 = tpu.concatenate %149, %234 in 0 : vector<8x128xf32>, vector<8x128xf32> -> vector<16x128xf32>
    %c0_63 = arith.constant 0 : index
    %c0_64 = arith.constant 0 : index
    %c0_65 = arith.constant 0 : index
    %236 = vector.load %arg6[%c0_63, %c0_64, %c0_65] : memref<2x128x128xf32, #tpu.memory_space<vmem>>, vector<1x128x128xf32>
    %237 = vector.shape_cast %236 : vector<1x128x128xf32> to vector<128x128xf32>
    %cst_66 = arith.constant dense<0.000000e+00> : vector<16x128xf32>
    %238 = tpu.matmul %235, %237, %cst_66 {dimension_numbers = #tpu.dot_dimension_numbers<[1], [0], [0], [1], [0, 0, 1, 1], [], []>} : vector<16x128xf32>, vector<128x128xf32>, vector<16x128xf32> -> vector<16x128xf32>
    %c0_67 = arith.constant 0 : index
    %c0_68 = arith.constant 0 : index
    %c0_69 = arith.constant 0 : index
    %239 = vector.load %arg7[%c0_67, %c0_68, %c0_69] : memref<2x1x128xf32, #tpu.memory_space<vmem>>, vector<1x1x128xf32>
    %240 = vector.shape_cast %239 : vector<1x1x128xf32> to vector<1x128xf32>
    %241 = vector.broadcast %240 : vector<1x128xf32> to vector<16x128xf32>
    %242 = arith.addf %238, %241 : vector<16x128xf32>
    %243 = arith.addf %242, %24 : vector<16x128xf32>
    %c0_70 = arith.constant 0 : index
    %c0_71 = arith.constant 0 : index
    %c0_72 = arith.constant 0 : index
    %244 = vector.load %arg8[%c0_70, %c0_71, %c0_72] : memref<2x1x128xf32, #tpu.memory_space<vmem>>, vector<1x1x128xf32>
    %245 = vector.shape_cast %244 : vector<1x1x128xf32> to vector<1x128xf32>
    %c0_73 = arith.constant 0 : index
    %c0_74 = arith.constant 0 : index
    %c0_75 = arith.constant 0 : index
    %246 = vector.load %arg9[%c0_73, %c0_74, %c0_75] : memref<2x1x128xf32, #tpu.memory_space<vmem>>, vector<1x1x128xf32>
    %247 = vector.shape_cast %246 : vector<1x1x128xf32> to vector<1x128xf32>
    %cst_76 = arith.constant dense<0.000000e+00> : vector<16xf32>
    %248 = vector.multi_reduction <add>, %243, %cst_76 [1] : vector<16x128xf32> to vector<16xf32>
    %249 = vector.shape_cast %248 : vector<16xf32> to vector<16x1xf32>
    %cst_77 = arith.constant 1.280000e+02 : f32
    %250 = vector.broadcast %cst_77 : f32 to vector<16x1xf32>
    %251 = arith.divf %249, %250 : vector<16x1xf32>
    %252 = vector.broadcast %251 : vector<16x1xf32> to vector<16x128xf32>
    %253 = arith.subf %243, %252 : vector<16x128xf32>
    %254 = arith.mulf %253, %253 : vector<16x128xf32>
    %cst_78 = arith.constant dense<0.000000e+00> : vector<16xf32>
    %255 = vector.multi_reduction <add>, %254, %cst_78 [1] : vector<16x128xf32> to vector<16xf32>
    %256 = vector.shape_cast %255 : vector<16xf32> to vector<16x1xf32>
    %cst_79 = arith.constant 1.280000e+02 : f32
    %257 = vector.broadcast %cst_79 : f32 to vector<16x1xf32>
    %258 = arith.divf %256, %257 : vector<16x1xf32>
    %259 = vector.broadcast %251 : vector<16x1xf32> to vector<16x128xf32>
    %260 = arith.subf %243, %259 : vector<16x128xf32>
    %cst_80 = arith.constant 9.99999996E-13 : f32
    %261 = vector.broadcast %cst_80 : f32 to vector<16x1xf32>
    %262 = arith.addf %258, %261 : vector<16x1xf32>
    %263 = math.rsqrt %262 : vector<16x1xf32>
    %264 = vector.broadcast %263 : vector<16x1xf32> to vector<16x128xf32>
    %265 = arith.mulf %260, %264 : vector<16x128xf32>
    %266 = vector.broadcast %245 : vector<1x128xf32> to vector<16x128xf32>
    %267 = arith.mulf %265, %266 : vector<16x128xf32>
    %268 = vector.broadcast %247 : vector<1x128xf32> to vector<16x128xf32>
    %269 = arith.addf %267, %268 : vector<16x128xf32>
    %c0_81 = arith.constant 0 : index
    %c0_82 = arith.constant 0 : index
    %c0_83 = arith.constant 0 : index
    %270 = vector.load %arg10[%c0_81, %c0_82, %c0_83] : memref<2x128x256xf32, #tpu.memory_space<vmem>>, vector<1x128x256xf32>
    %271 = vector.shape_cast %270 : vector<1x128x256xf32> to vector<128x256xf32>
    %cst_84 = arith.constant dense<0.000000e+00> : vector<16x256xf32>
    %272 = tpu.matmul %269, %271, %cst_84 {dimension_numbers = #tpu.dot_dimension_numbers<[1], [0], [0], [1], [0, 0, 1, 1], [], []>} : vector<16x128xf32>, vector<128x256xf32>, vector<16x256xf32> -> vector<16x256xf32>
    %c0_85 = arith.constant 0 : index
    %c0_86 = arith.constant 0 : index
    %c0_87 = arith.constant 0 : index
    %273 = vector.load %arg11[%c0_85, %c0_86, %c0_87] : memref<2x1x256xf32, #tpu.memory_space<vmem>>, vector<1x1x256xf32>
    %274 = vector.shape_cast %273 : vector<1x1x256xf32> to vector<1x256xf32>
    %275 = vector.broadcast %274 : vector<1x256xf32> to vector<16x256xf32>
    %276 = arith.addf %272, %275 : vector<16x256xf32>
    %cst_88 = arith.constant 5.000000e-01 : f32
    %277 = vector.broadcast %cst_88 : f32 to vector<16x256xf32>
    %278 = arith.mulf %277, %276 : vector<16x256xf32>
    %cst_89 = arith.constant 4.471500e-02 : f32
    %279 = vector.broadcast %cst_89 : f32 to vector<16x256xf32>
    %280 = arith.mulf %279, %276 : vector<16x256xf32>
    %281 = arith.mulf %280, %276 : vector<16x256xf32>
    %282 = arith.mulf %281, %276 : vector<16x256xf32>
    %283 = arith.addf %276, %282 : vector<16x256xf32>
    %cst_90 = arith.constant 0.797884583 : f32
    %284 = vector.broadcast %cst_90 : f32 to vector<16x256xf32>
    %285 = arith.mulf %284, %283 : vector<16x256xf32>
    %286 = math.tanh %285 : vector<16x256xf32>
    %cst_91 = arith.constant 1.000000e+00 : f32
    %287 = vector.broadcast %cst_91 : f32 to vector<16x256xf32>
    %288 = arith.addf %287, %286 : vector<16x256xf32>
    %289 = arith.mulf %278, %288 : vector<16x256xf32>
    %c0_92 = arith.constant 0 : index
    %c0_93 = arith.constant 0 : index
    %c0_94 = arith.constant 0 : index
    %290 = vector.load %arg12[%c0_92, %c0_93, %c0_94] : memref<2x256x128xf32, #tpu.memory_space<vmem>>, vector<1x256x128xf32>
    %291 = vector.shape_cast %290 : vector<1x256x128xf32> to vector<256x128xf32>
    %cst_95 = arith.constant dense<0.000000e+00> : vector<16x128xf32>
    %292 = tpu.matmul %289, %291, %cst_95 {dimension_numbers = #tpu.dot_dimension_numbers<[1], [0], [0], [1], [0, 0, 1, 1], [], []>} : vector<16x256xf32>, vector<256x128xf32>, vector<16x128xf32> -> vector<16x128xf32>
    %c0_96 = arith.constant 0 : index
    %c0_97 = arith.constant 0 : index
    %c0_98 = arith.constant 0 : index
    %293 = vector.load %arg13[%c0_96, %c0_97, %c0_98] : memref<2x1x128xf32, #tpu.memory_space<vmem>>, vector<1x1x128xf32>
    %294 = vector.shape_cast %293 : vector<1x1x128xf32> to vector<1x128xf32>
    %295 = vector.broadcast %294 : vector<1x128xf32> to vector<16x128xf32>
    %296 = arith.addf %292, %295 : vector<16x128xf32>
    %297 = arith.addf %296, %269 : vector<16x128xf32>
    %c0_99 = arith.constant 0 : index
    %c0_100 = arith.constant 0 : index
    %c0_101 = arith.constant 0 : index
    %298 = vector.load %arg14[%c0_99, %c0_100, %c0_101] : memref<2x1x128xf32, #tpu.memory_space<vmem>>, vector<1x1x128xf32>
    %299 = vector.shape_cast %298 : vector<1x1x128xf32> to vector<1x128xf32>
    %c0_102 = arith.constant 0 : index
    %c0_103 = arith.constant 0 : index
    %c0_104 = arith.constant 0 : index
    %300 = vector.load %arg15[%c0_102, %c0_103, %c0_104] : memref<2x1x128xf32, #tpu.memory_space<vmem>>, vector<1x1x128xf32>
    %301 = vector.shape_cast %300 : vector<1x1x128xf32> to vector<1x128xf32>
    %cst_105 = arith.constant dense<0.000000e+00> : vector<16xf32>
    %302 = vector.multi_reduction <add>, %297, %cst_105 [1] : vector<16x128xf32> to vector<16xf32>
    %303 = vector.shape_cast %302 : vector<16xf32> to vector<16x1xf32>
    %cst_106 = arith.constant 1.280000e+02 : f32
    %304 = vector.broadcast %cst_106 : f32 to vector<16x1xf32>
    %305 = arith.divf %303, %304 : vector<16x1xf32>
    %306 = vector.broadcast %305 : vector<16x1xf32> to vector<16x128xf32>
    %307 = arith.subf %297, %306 : vector<16x128xf32>
    %308 = arith.mulf %307, %307 : vector<16x128xf32>
    %cst_107 = arith.constant dense<0.000000e+00> : vector<16xf32>
    %309 = vector.multi_reduction <add>, %308, %cst_107 [1] : vector<16x128xf32> to vector<16xf32>
    %310 = vector.shape_cast %309 : vector<16xf32> to vector<16x1xf32>
    %cst_108 = arith.constant 1.280000e+02 : f32
    %311 = vector.broadcast %cst_108 : f32 to vector<16x1xf32>
    %312 = arith.divf %310, %311 : vector<16x1xf32>
    %313 = vector.broadcast %305 : vector<16x1xf32> to vector<16x128xf32>
    %314 = arith.subf %297, %313 : vector<16x128xf32>
    %cst_109 = arith.constant 9.99999996E-13 : f32
    %315 = vector.broadcast %cst_109 : f32 to vector<16x1xf32>
    %316 = arith.addf %312, %315 : vector<16x1xf32>
    %317 = math.rsqrt %316 : vector<16x1xf32>
    %318 = vector.broadcast %317 : vector<16x1xf32> to vector<16x128xf32>
    %319 = arith.mulf %314, %318 : vector<16x128xf32>
    %320 = vector.broadcast %299 : vector<1x128xf32> to vector<16x128xf32>
    %321 = arith.mulf %319, %320 : vector<16x128xf32>
    %322 = vector.broadcast %301 : vector<1x128xf32> to vector<16x128xf32>
    %323 = arith.addf %321, %322 : vector<16x128xf32>
    %c1 = arith.constant 1 : index
    %c0_110 = arith.constant 0 : index
    %c0_111 = arith.constant 0 : index
    %324 = vector.load %arg4[%c1, %c0_110, %c0_111] : memref<2x128x384xf32, #tpu.memory_space<vmem>>, vector<1x128x384xf32>
    %325 = vector.shape_cast %324 : vector<1x128x384xf32> to vector<128x384xf32>
    %cst_112 = arith.constant dense<0.000000e+00> : vector<16x384xf32>
    %326 = tpu.matmul %323, %325, %cst_112 {dimension_numbers = #tpu.dot_dimension_numbers<[1], [0], [0], [1], [0, 0, 1, 1], [], []>} : vector<16x128xf32>, vector<128x384xf32>, vector<16x384xf32> -> vector<16x384xf32>
    %c1_113 = arith.constant 1 : index
    %c0_114 = arith.constant 0 : index
    %c0_115 = arith.constant 0 : index
    %327 = vector.load %arg5[%c1_113, %c0_114, %c0_115] : memref<2x1x384xf32, #tpu.memory_space<vmem>>, vector<1x1x384xf32>
    %328 = vector.shape_cast %327 : vector<1x1x384xf32> to vector<1x384xf32>
    %329 = vector.broadcast %328 : vector<1x384xf32> to vector<16x384xf32>
    %330 = arith.addf %326, %329 : vector<16x384xf32>
    %331 = vector.extract_strided_slice %330 {offsets = [0, 0], sizes = [16, 128], strides = [1, 1]} : vector<16x384xf32> to vector<16x128xf32>
    %332 = vector.extract_strided_slice %330 {offsets = [0, 128], sizes = [16, 128], strides = [1, 1]} : vector<16x384xf32> to vector<16x128xf32>
    %333 = vector.extract_strided_slice %330 {offsets = [0, 256], sizes = [16, 128], strides = [1, 1]} : vector<16x384xf32> to vector<16x128xf32>
    %334 = vector.extract_strided_slice %331 {offsets = [0, 0], sizes = [8, 128], strides = [1, 1]} : vector<16x128xf32> to vector<8x128xf32>
    %335 = vector.extract_strided_slice %332 {offsets = [0, 0], sizes = [8, 128], strides = [1, 1]} : vector<16x128xf32> to vector<8x128xf32>
    %336 = vector.extract_strided_slice %333 {offsets = [0, 0], sizes = [8, 128], strides = [1, 1]} : vector<16x128xf32> to vector<8x128xf32>
    %337 = vector.extract_strided_slice %25 {offsets = [0, 0], sizes = [1, 8], strides = [1, 1]} : vector<2x8xf32> to vector<1x8xf32>
    %cst_116 = arith.constant 0.000000e+00 : f32
    %338 = vector.broadcast %cst_116 : f32 to vector<8x128xf32>
    %339 = vector.broadcast %33 : vector<1x128xf32> to vector<8x128xf32>
    %340 = arith.mulf %334, %339 : vector<8x128xf32>
    %cst_117 = arith.constant dense<0.000000e+00> : vector<8x8xf32>
    %341 = tpu.matmul %340, %335, %cst_117 {dimension_numbers = #tpu.dot_dimension_numbers<[1], [1], [0], [0], [0, 0, 1, 0], [], []>} : vector<8x128xf32>, vector<8x128xf32>, vector<8x8xf32> -> vector<8x8xf32>
    %cst_118 = arith.constant 0.176776692 : f32
    %342 = vector.broadcast %cst_118 : f32 to vector<8x8xf32>
    %343 = arith.mulf %341, %342 : vector<8x8xf32>
    %344 = vector.broadcast %337 : vector<1x8xf32> to vector<8x8xf32>
    %345 = arith.addf %343, %344 : vector<8x8xf32>
    %cst_119 = arith.constant dense<0xFF800000> : vector<8xf32>
    %346 = vector.multi_reduction <maximumf>, %345, %cst_119 [1] : vector<8x8xf32> to vector<8xf32>
    %347 = vector.shape_cast %346 : vector<8xf32> to vector<8x1xf32>
    %348 = vector.broadcast %347 : vector<8x1xf32> to vector<8x8xf32>
    %349 = arith.subf %345, %348 : vector<8x8xf32>
    %350 = math.exp %349 : vector<8x8xf32>
    %cst_120 = arith.constant dense<0.000000e+00> : vector<8xf32>
    %351 = vector.multi_reduction <add>, %350, %cst_120 [1] : vector<8x8xf32> to vector<8xf32>
    %352 = vector.shape_cast %351 : vector<8xf32> to vector<8x1xf32>
    %353 = vector.broadcast %352 : vector<8x1xf32> to vector<8x8xf32>
    %354 = arith.divf %350, %353 : vector<8x8xf32>
    %355 = vector.broadcast %33 : vector<1x128xf32> to vector<8x128xf32>
    %356 = arith.mulf %336, %355 : vector<8x128xf32>
    %cst_121 = arith.constant dense<0.000000e+00> : vector<8x128xf32>
    %357 = tpu.matmul %354, %356, %cst_121 {dimension_numbers = #tpu.dot_dimension_numbers<[1], [0], [0], [1], [0, 0, 1, 1], [], []>} : vector<8x8xf32>, vector<8x128xf32>, vector<8x128xf32> -> vector<8x128xf32>
    %358 = arith.addf %338, %357 : vector<8x128xf32>
    %359 = vector.broadcast %40 : vector<1x128xf32> to vector<8x128xf32>
    %360 = arith.mulf %334, %359 : vector<8x128xf32>
    %cst_122 = arith.constant dense<0.000000e+00> : vector<8x8xf32>
    %361 = tpu.matmul %360, %335, %cst_122 {dimension_numbers = #tpu.dot_dimension_numbers<[1], [1], [0], [0], [0, 0, 1, 0], [], []>} : vector<8x128xf32>, vector<8x128xf32>, vector<8x8xf32> -> vector<8x8xf32>
    %cst_123 = arith.constant 0.176776692 : f32
    %362 = vector.broadcast %cst_123 : f32 to vector<8x8xf32>
    %363 = arith.mulf %361, %362 : vector<8x8xf32>
    %364 = vector.broadcast %337 : vector<1x8xf32> to vector<8x8xf32>
    %365 = arith.addf %363, %364 : vector<8x8xf32>
    %cst_124 = arith.constant dense<0xFF800000> : vector<8xf32>
    %366 = vector.multi_reduction <maximumf>, %365, %cst_124 [1] : vector<8x8xf32> to vector<8xf32>
    %367 = vector.shape_cast %366 : vector<8xf32> to vector<8x1xf32>
    %368 = vector.broadcast %367 : vector<8x1xf32> to vector<8x8xf32>
    %369 = arith.subf %365, %368 : vector<8x8xf32>
    %370 = math.exp %369 : vector<8x8xf32>
    %cst_125 = arith.constant dense<0.000000e+00> : vector<8xf32>
    %371 = vector.multi_reduction <add>, %370, %cst_125 [1] : vector<8x8xf32> to vector<8xf32>
    %372 = vector.shape_cast %371 : vector<8xf32> to vector<8x1xf32>
    %373 = vector.broadcast %372 : vector<8x1xf32> to vector<8x8xf32>
    %374 = arith.divf %370, %373 : vector<8x8xf32>
    %375 = vector.broadcast %40 : vector<1x128xf32> to vector<8x128xf32>
    %376 = arith.mulf %336, %375 : vector<8x128xf32>
    %cst_126 = arith.constant dense<0.000000e+00> : vector<8x128xf32>
    %377 = tpu.matmul %374, %376, %cst_126 {dimension_numbers = #tpu.dot_dimension_numbers<[1], [0], [0], [1], [0, 0, 1, 1], [], []>} : vector<8x8xf32>, vector<8x128xf32>, vector<8x128xf32> -> vector<8x128xf32>
    %378 = arith.addf %358, %377 : vector<8x128xf32>
    %379 = vector.broadcast %47 : vector<1x128xf32> to vector<8x128xf32>
    %380 = arith.mulf %334, %379 : vector<8x128xf32>
    %cst_127 = arith.constant dense<0.000000e+00> : vector<8x8xf32>
    %381 = tpu.matmul %380, %335, %cst_127 {dimension_numbers = #tpu.dot_dimension_numbers<[1], [1], [0], [0], [0, 0, 1, 0], [], []>} : vector<8x128xf32>, vector<8x128xf32>, vector<8x8xf32> -> vector<8x8xf32>
    %cst_128 = arith.constant 0.176776692 : f32
    %382 = vector.broadcast %cst_128 : f32 to vector<8x8xf32>
    %383 = arith.mulf %381, %382 : vector<8x8xf32>
    %384 = vector.broadcast %337 : vector<1x8xf32> to vector<8x8xf32>
    %385 = arith.addf %383, %384 : vector<8x8xf32>
    %cst_129 = arith.constant dense<0xFF800000> : vector<8xf32>
    %386 = vector.multi_reduction <maximumf>, %385, %cst_129 [1] : vector<8x8xf32> to vector<8xf32>
    %387 = vector.shape_cast %386 : vector<8xf32> to vector<8x1xf32>
    %388 = vector.broadcast %387 : vector<8x1xf32> to vector<8x8xf32>
    %389 = arith.subf %385, %388 : vector<8x8xf32>
    %390 = math.exp %389 : vector<8x8xf32>
    %cst_130 = arith.constant dense<0.000000e+00> : vector<8xf32>
    %391 = vector.multi_reduction <add>, %390, %cst_130 [1] : vector<8x8xf32> to vector<8xf32>
    %392 = vector.shape_cast %391 : vector<8xf32> to vector<8x1xf32>
    %393 = vector.broadcast %392 : vector<8x1xf32> to vector<8x8xf32>
    %394 = arith.divf %390, %393 : vector<8x8xf32>
    %395 = vector.broadcast %47 : vector<1x128xf32> to vector<8x128xf32>
    %396 = arith.mulf %336, %395 : vector<8x128xf32>
    %cst_131 = arith.constant dense<0.000000e+00> : vector<8x128xf32>
    %397 = tpu.matmul %394, %396, %cst_131 {dimension_numbers = #tpu.dot_dimension_numbers<[1], [0], [0], [1], [0, 0, 1, 1], [], []>} : vector<8x8xf32>, vector<8x128xf32>, vector<8x128xf32> -> vector<8x128xf32>
    %398 = arith.addf %378, %397 : vector<8x128xf32>
    %399 = vector.broadcast %54 : vector<1x128xf32> to vector<8x128xf32>
    %400 = arith.mulf %334, %399 : vector<8x128xf32>
    %cst_132 = arith.constant dense<0.000000e+00> : vector<8x8xf32>
    %401 = tpu.matmul %400, %335, %cst_132 {dimension_numbers = #tpu.dot_dimension_numbers<[1], [1], [0], [0], [0, 0, 1, 0], [], []>} : vector<8x128xf32>, vector<8x128xf32>, vector<8x8xf32> -> vector<8x8xf32>
    %cst_133 = arith.constant 0.176776692 : f32
    %402 = vector.broadcast %cst_133 : f32 to vector<8x8xf32>
    %403 = arith.mulf %401, %402 : vector<8x8xf32>
    %404 = vector.broadcast %337 : vector<1x8xf32> to vector<8x8xf32>
    %405 = arith.addf %403, %404 : vector<8x8xf32>
    %cst_134 = arith.constant dense<0xFF800000> : vector<8xf32>
    %406 = vector.multi_reduction <maximumf>, %405, %cst_134 [1] : vector<8x8xf32> to vector<8xf32>
    %407 = vector.shape_cast %406 : vector<8xf32> to vector<8x1xf32>
    %408 = vector.broadcast %407 : vector<8x1xf32> to vector<8x8xf32>
    %409 = arith.subf %405, %408 : vector<8x8xf32>
    %410 = math.exp %409 : vector<8x8xf32>
    %cst_135 = arith.constant dense<0.000000e+00> : vector<8xf32>
    %411 = vector.multi_reduction <add>, %410, %cst_135 [1] : vector<8x8xf32> to vector<8xf32>
    %412 = vector.shape_cast %411 : vector<8xf32> to vector<8x1xf32>
    %413 = vector.broadcast %412 : vector<8x1xf32> to vector<8x8xf32>
    %414 = arith.divf %410, %413 : vector<8x8xf32>
    %415 = vector.broadcast %54 : vector<1x128xf32> to vector<8x128xf32>
    %416 = arith.mulf %336, %415 : vector<8x128xf32>
    %cst_136 = arith.constant dense<0.000000e+00> : vector<8x128xf32>
    %417 = tpu.matmul %414, %416, %cst_136 {dimension_numbers = #tpu.dot_dimension_numbers<[1], [0], [0], [1], [0, 0, 1, 1], [], []>} : vector<8x8xf32>, vector<8x128xf32>, vector<8x128xf32> -> vector<8x128xf32>
    %418 = arith.addf %398, %417 : vector<8x128xf32>
    %419 = vector.extract_strided_slice %331 {offsets = [8, 0], sizes = [8, 128], strides = [1, 1]} : vector<16x128xf32> to vector<8x128xf32>
    %420 = vector.extract_strided_slice %332 {offsets = [8, 0], sizes = [8, 128], strides = [1, 1]} : vector<16x128xf32> to vector<8x128xf32>
    %421 = vector.extract_strided_slice %333 {offsets = [8, 0], sizes = [8, 128], strides = [1, 1]} : vector<16x128xf32> to vector<8x128xf32>
    %422 = vector.extract_strided_slice %25 {offsets = [1, 0], sizes = [1, 8], strides = [1, 1]} : vector<2x8xf32> to vector<1x8xf32>
    %cst_137 = arith.constant 0.000000e+00 : f32
    %423 = vector.broadcast %cst_137 : f32 to vector<8x128xf32>
    %424 = vector.broadcast %33 : vector<1x128xf32> to vector<8x128xf32>
    %425 = arith.mulf %419, %424 : vector<8x128xf32>
    %cst_138 = arith.constant dense<0.000000e+00> : vector<8x8xf32>
    %426 = tpu.matmul %425, %420, %cst_138 {dimension_numbers = #tpu.dot_dimension_numbers<[1], [1], [0], [0], [0, 0, 1, 0], [], []>} : vector<8x128xf32>, vector<8x128xf32>, vector<8x8xf32> -> vector<8x8xf32>
    %cst_139 = arith.constant 0.176776692 : f32
    %427 = vector.broadcast %cst_139 : f32 to vector<8x8xf32>
    %428 = arith.mulf %426, %427 : vector<8x8xf32>
    %429 = vector.broadcast %422 : vector<1x8xf32> to vector<8x8xf32>
    %430 = arith.addf %428, %429 : vector<8x8xf32>
    %cst_140 = arith.constant dense<0xFF800000> : vector<8xf32>
    %431 = vector.multi_reduction <maximumf>, %430, %cst_140 [1] : vector<8x8xf32> to vector<8xf32>
    %432 = vector.shape_cast %431 : vector<8xf32> to vector<8x1xf32>
    %433 = vector.broadcast %432 : vector<8x1xf32> to vector<8x8xf32>
    %434 = arith.subf %430, %433 : vector<8x8xf32>
    %435 = math.exp %434 : vector<8x8xf32>
    %cst_141 = arith.constant dense<0.000000e+00> : vector<8xf32>
    %436 = vector.multi_reduction <add>, %435, %cst_141 [1] : vector<8x8xf32> to vector<8xf32>
    %437 = vector.shape_cast %436 : vector<8xf32> to vector<8x1xf32>
    %438 = vector.broadcast %437 : vector<8x1xf32> to vector<8x8xf32>
    %439 = arith.divf %435, %438 : vector<8x8xf32>
    %440 = vector.broadcast %33 : vector<1x128xf32> to vector<8x128xf32>
    %441 = arith.mulf %421, %440 : vector<8x128xf32>
    %cst_142 = arith.constant dense<0.000000e+00> : vector<8x128xf32>
    %442 = tpu.matmul %439, %441, %cst_142 {dimension_numbers = #tpu.dot_dimension_numbers<[1], [0], [0], [1], [0, 0, 1, 1], [], []>} : vector<8x8xf32>, vector<8x128xf32>, vector<8x128xf32> -> vector<8x128xf32>
    %443 = arith.addf %423, %442 : vector<8x128xf32>
    %444 = vector.broadcast %40 : vector<1x128xf32> to vector<8x128xf32>
    %445 = arith.mulf %419, %444 : vector<8x128xf32>
    %cst_143 = arith.constant dense<0.000000e+00> : vector<8x8xf32>
    %446 = tpu.matmul %445, %420, %cst_143 {dimension_numbers = #tpu.dot_dimension_numbers<[1], [1], [0], [0], [0, 0, 1, 0], [], []>} : vector<8x128xf32>, vector<8x128xf32>, vector<8x8xf32> -> vector<8x8xf32>
    %cst_144 = arith.constant 0.176776692 : f32
    %447 = vector.broadcast %cst_144 : f32 to vector<8x8xf32>
    %448 = arith.mulf %446, %447 : vector<8x8xf32>
    %449 = vector.broadcast %422 : vector<1x8xf32> to vector<8x8xf32>
    %450 = arith.addf %448, %449 : vector<8x8xf32>
    %cst_145 = arith.constant dense<0xFF800000> : vector<8xf32>
    %451 = vector.multi_reduction <maximumf>, %450, %cst_145 [1] : vector<8x8xf32> to vector<8xf32>
    %452 = vector.shape_cast %451 : vector<8xf32> to vector<8x1xf32>
    %453 = vector.broadcast %452 : vector<8x1xf32> to vector<8x8xf32>
    %454 = arith.subf %450, %453 : vector<8x8xf32>
    %455 = math.exp %454 : vector<8x8xf32>
    %cst_146 = arith.constant dense<0.000000e+00> : vector<8xf32>
    %456 = vector.multi_reduction <add>, %455, %cst_146 [1] : vector<8x8xf32> to vector<8xf32>
    %457 = vector.shape_cast %456 : vector<8xf32> to vector<8x1xf32>
    %458 = vector.broadcast %457 : vector<8x1xf32> to vector<8x8xf32>
    %459 = arith.divf %455, %458 : vector<8x8xf32>
    %460 = vector.broadcast %40 : vector<1x128xf32> to vector<8x128xf32>
    %461 = arith.mulf %421, %460 : vector<8x128xf32>
    %cst_147 = arith.constant dense<0.000000e+00> : vector<8x128xf32>
    %462 = tpu.matmul %459, %461, %cst_147 {dimension_numbers = #tpu.dot_dimension_numbers<[1], [0], [0], [1], [0, 0, 1, 1], [], []>} : vector<8x8xf32>, vector<8x128xf32>, vector<8x128xf32> -> vector<8x128xf32>
    %463 = arith.addf %443, %462 : vector<8x128xf32>
    %464 = vector.broadcast %47 : vector<1x128xf32> to vector<8x128xf32>
    %465 = arith.mulf %419, %464 : vector<8x128xf32>
    %cst_148 = arith.constant dense<0.000000e+00> : vector<8x8xf32>
    %466 = tpu.matmul %465, %420, %cst_148 {dimension_numbers = #tpu.dot_dimension_numbers<[1], [1], [0], [0], [0, 0, 1, 0], [], []>} : vector<8x128xf32>, vector<8x128xf32>, vector<8x8xf32> -> vector<8x8xf32>
    %cst_149 = arith.constant 0.176776692 : f32
    %467 = vector.broadcast %cst_149 : f32 to vector<8x8xf32>
    %468 = arith.mulf %466, %467 : vector<8x8xf32>
    %469 = vector.broadcast %422 : vector<1x8xf32> to vector<8x8xf32>
    %470 = arith.addf %468, %469 : vector<8x8xf32>
    %cst_150 = arith.constant dense<0xFF800000> : vector<8xf32>
    %471 = vector.multi_reduction <maximumf>, %470, %cst_150 [1] : vector<8x8xf32> to vector<8xf32>
    %472 = vector.shape_cast %471 : vector<8xf32> to vector<8x1xf32>
    %473 = vector.broadcast %472 : vector<8x1xf32> to vector<8x8xf32>
    %474 = arith.subf %470, %473 : vector<8x8xf32>
    %475 = math.exp %474 : vector<8x8xf32>
    %cst_151 = arith.constant dense<0.000000e+00> : vector<8xf32>
    %476 = vector.multi_reduction <add>, %475, %cst_151 [1] : vector<8x8xf32> to vector<8xf32>
    %477 = vector.shape_cast %476 : vector<8xf32> to vector<8x1xf32>
    %478 = vector.broadcast %477 : vector<8x1xf32> to vector<8x8xf32>
    %479 = arith.divf %475, %478 : vector<8x8xf32>
    %480 = vector.broadcast %47 : vector<1x128xf32> to vector<8x128xf32>
    %481 = arith.mulf %421, %480 : vector<8x128xf32>
    %cst_152 = arith.constant dense<0.000000e+00> : vector<8x128xf32>
    %482 = tpu.matmul %479, %481, %cst_152 {dimension_numbers = #tpu.dot_dimension_numbers<[1], [0], [0], [1], [0, 0, 1, 1], [], []>} : vector<8x8xf32>, vector<8x128xf32>, vector<8x128xf32> -> vector<8x128xf32>
    %483 = arith.addf %463, %482 : vector<8x128xf32>
    %484 = vector.broadcast %54 : vector<1x128xf32> to vector<8x128xf32>
    %485 = arith.mulf %419, %484 : vector<8x128xf32>
    %cst_153 = arith.constant dense<0.000000e+00> : vector<8x8xf32>
    %486 = tpu.matmul %485, %420, %cst_153 {dimension_numbers = #tpu.dot_dimension_numbers<[1], [1], [0], [0], [0, 0, 1, 0], [], []>} : vector<8x128xf32>, vector<8x128xf32>, vector<8x8xf32> -> vector<8x8xf32>
    %cst_154 = arith.constant 0.176776692 : f32
    %487 = vector.broadcast %cst_154 : f32 to vector<8x8xf32>
    %488 = arith.mulf %486, %487 : vector<8x8xf32>
    %489 = vector.broadcast %422 : vector<1x8xf32> to vector<8x8xf32>
    %490 = arith.addf %488, %489 : vector<8x8xf32>
    %cst_155 = arith.constant dense<0xFF800000> : vector<8xf32>
    %491 = vector.multi_reduction <maximumf>, %490, %cst_155 [1] : vector<8x8xf32> to vector<8xf32>
    %492 = vector.shape_cast %491 : vector<8xf32> to vector<8x1xf32>
    %493 = vector.broadcast %492 : vector<8x1xf32> to vector<8x8xf32>
    %494 = arith.subf %490, %493 : vector<8x8xf32>
    %495 = math.exp %494 : vector<8x8xf32>
    %cst_156 = arith.constant dense<0.000000e+00> : vector<8xf32>
    %496 = vector.multi_reduction <add>, %495, %cst_156 [1] : vector<8x8xf32> to vector<8xf32>
    %497 = vector.shape_cast %496 : vector<8xf32> to vector<8x1xf32>
    %498 = vector.broadcast %497 : vector<8x1xf32> to vector<8x8xf32>
    %499 = arith.divf %495, %498 : vector<8x8xf32>
    %500 = vector.broadcast %54 : vector<1x128xf32> to vector<8x128xf32>
    %501 = arith.mulf %421, %500 : vector<8x128xf32>
    %cst_157 = arith.constant dense<0.000000e+00> : vector<8x128xf32>
    %502 = tpu.matmul %499, %501, %cst_157 {dimension_numbers = #tpu.dot_dimension_numbers<[1], [0], [0], [1], [0, 0, 1, 1], [], []>} : vector<8x8xf32>, vector<8x128xf32>, vector<8x128xf32> -> vector<8x128xf32>
    %503 = arith.addf %483, %502 : vector<8x128xf32>
    %504 = tpu.concatenate %418, %503 in 0 : vector<8x128xf32>, vector<8x128xf32> -> vector<16x128xf32>
    %c1_158 = arith.constant 1 : index
    %c0_159 = arith.constant 0 : index
    %c0_160 = arith.constant 0 : index
    %505 = vector.load %arg6[%c1_158, %c0_159, %c0_160] : memref<2x128x128xf32, #tpu.memory_space<vmem>>, vector<1x128x128xf32>
    %506 = vector.shape_cast %505 : vector<1x128x128xf32> to vector<128x128xf32>
    %cst_161 = arith.constant dense<0.000000e+00> : vector<16x128xf32>
    %507 = tpu.matmul %504, %506, %cst_161 {dimension_numbers = #tpu.dot_dimension_numbers<[1], [0], [0], [1], [0, 0, 1, 1], [], []>} : vector<16x128xf32>, vector<128x128xf32>, vector<16x128xf32> -> vector<16x128xf32>
    %c1_162 = arith.constant 1 : index
    %c0_163 = arith.constant 0 : index
    %c0_164 = arith.constant 0 : index
    %508 = vector.load %arg7[%c1_162, %c0_163, %c0_164] : memref<2x1x128xf32, #tpu.memory_space<vmem>>, vector<1x1x128xf32>
    %509 = vector.shape_cast %508 : vector<1x1x128xf32> to vector<1x128xf32>
    %510 = vector.broadcast %509 : vector<1x128xf32> to vector<16x128xf32>
    %511 = arith.addf %507, %510 : vector<16x128xf32>
    %512 = arith.addf %511, %323 : vector<16x128xf32>
    %c1_165 = arith.constant 1 : index
    %c0_166 = arith.constant 0 : index
    %c0_167 = arith.constant 0 : index
    %513 = vector.load %arg8[%c1_165, %c0_166, %c0_167] : memref<2x1x128xf32, #tpu.memory_space<vmem>>, vector<1x1x128xf32>
    %514 = vector.shape_cast %513 : vector<1x1x128xf32> to vector<1x128xf32>
    %c1_168 = arith.constant 1 : index
    %c0_169 = arith.constant 0 : index
    %c0_170 = arith.constant 0 : index
    %515 = vector.load %arg9[%c1_168, %c0_169, %c0_170] : memref<2x1x128xf32, #tpu.memory_space<vmem>>, vector<1x1x128xf32>
    %516 = vector.shape_cast %515 : vector<1x1x128xf32> to vector<1x128xf32>
    %cst_171 = arith.constant dense<0.000000e+00> : vector<16xf32>
    %517 = vector.multi_reduction <add>, %512, %cst_171 [1] : vector<16x128xf32> to vector<16xf32>
    %518 = vector.shape_cast %517 : vector<16xf32> to vector<16x1xf32>
    %cst_172 = arith.constant 1.280000e+02 : f32
    %519 = vector.broadcast %cst_172 : f32 to vector<16x1xf32>
    %520 = arith.divf %518, %519 : vector<16x1xf32>
    %521 = vector.broadcast %520 : vector<16x1xf32> to vector<16x128xf32>
    %522 = arith.subf %512, %521 : vector<16x128xf32>
    %523 = arith.mulf %522, %522 : vector<16x128xf32>
    %cst_173 = arith.constant dense<0.000000e+00> : vector<16xf32>
    %524 = vector.multi_reduction <add>, %523, %cst_173 [1] : vector<16x128xf32> to vector<16xf32>
    %525 = vector.shape_cast %524 : vector<16xf32> to vector<16x1xf32>
    %cst_174 = arith.constant 1.280000e+02 : f32
    %526 = vector.broadcast %cst_174 : f32 to vector<16x1xf32>
    %527 = arith.divf %525, %526 : vector<16x1xf32>
    %528 = vector.broadcast %520 : vector<16x1xf32> to vector<16x128xf32>
    %529 = arith.subf %512, %528 : vector<16x128xf32>
    %cst_175 = arith.constant 9.99999996E-13 : f32
    %530 = vector.broadcast %cst_175 : f32 to vector<16x1xf32>
    %531 = arith.addf %527, %530 : vector<16x1xf32>
    %532 = math.rsqrt %531 : vector<16x1xf32>
    %533 = vector.broadcast %532 : vector<16x1xf32> to vector<16x128xf32>
    %534 = arith.mulf %529, %533 : vector<16x128xf32>
    %535 = vector.broadcast %514 : vector<1x128xf32> to vector<16x128xf32>
    %536 = arith.mulf %534, %535 : vector<16x128xf32>
    %537 = vector.broadcast %516 : vector<1x128xf32> to vector<16x128xf32>
    %538 = arith.addf %536, %537 : vector<16x128xf32>
    %c1_176 = arith.constant 1 : index
    %c0_177 = arith.constant 0 : index
    %c0_178 = arith.constant 0 : index
    %539 = vector.load %arg10[%c1_176, %c0_177, %c0_178] : memref<2x128x256xf32, #tpu.memory_space<vmem>>, vector<1x128x256xf32>
    %540 = vector.shape_cast %539 : vector<1x128x256xf32> to vector<128x256xf32>
    %cst_179 = arith.constant dense<0.000000e+00> : vector<16x256xf32>
    %541 = tpu.matmul %538, %540, %cst_179 {dimension_numbers = #tpu.dot_dimension_numbers<[1], [0], [0], [1], [0, 0, 1, 1], [], []>} : vector<16x128xf32>, vector<128x256xf32>, vector<16x256xf32> -> vector<16x256xf32>
    %c1_180 = arith.constant 1 : index
    %c0_181 = arith.constant 0 : index
    %c0_182 = arith.constant 0 : index
    %542 = vector.load %arg11[%c1_180, %c0_181, %c0_182] : memref<2x1x256xf32, #tpu.memory_space<vmem>>, vector<1x1x256xf32>
    %543 = vector.shape_cast %542 : vector<1x1x256xf32> to vector<1x256xf32>
    %544 = vector.broadcast %543 : vector<1x256xf32> to vector<16x256xf32>
    %545 = arith.addf %541, %544 : vector<16x256xf32>
    %cst_183 = arith.constant 5.000000e-01 : f32
    %546 = vector.broadcast %cst_183 : f32 to vector<16x256xf32>
    %547 = arith.mulf %546, %545 : vector<16x256xf32>
    %cst_184 = arith.constant 4.471500e-02 : f32
    %548 = vector.broadcast %cst_184 : f32 to vector<16x256xf32>
    %549 = arith.mulf %548, %545 : vector<16x256xf32>
    %550 = arith.mulf %549, %545 : vector<16x256xf32>
    %551 = arith.mulf %550, %545 : vector<16x256xf32>
    %552 = arith.addf %545, %551 : vector<16x256xf32>
    %cst_185 = arith.constant 0.797884583 : f32
    %553 = vector.broadcast %cst_185 : f32 to vector<16x256xf32>
    %554 = arith.mulf %553, %552 : vector<16x256xf32>
    %555 = math.tanh %554 : vector<16x256xf32>
    %cst_186 = arith.constant 1.000000e+00 : f32
    %556 = vector.broadcast %cst_186 : f32 to vector<16x256xf32>
    %557 = arith.addf %556, %555 : vector<16x256xf32>
    %558 = arith.mulf %547, %557 : vector<16x256xf32>
    %c1_187 = arith.constant 1 : index
    %c0_188 = arith.constant 0 : index
    %c0_189 = arith.constant 0 : index
    %559 = vector.load %arg12[%c1_187, %c0_188, %c0_189] : memref<2x256x128xf32, #tpu.memory_space<vmem>>, vector<1x256x128xf32>
    %560 = vector.shape_cast %559 : vector<1x256x128xf32> to vector<256x128xf32>
    %cst_190 = arith.constant dense<0.000000e+00> : vector<16x128xf32>
    %561 = tpu.matmul %558, %560, %cst_190 {dimension_numbers = #tpu.dot_dimension_numbers<[1], [0], [0], [1], [0, 0, 1, 1], [], []>} : vector<16x256xf32>, vector<256x128xf32>, vector<16x128xf32> -> vector<16x128xf32>
    %c1_191 = arith.constant 1 : index
    %c0_192 = arith.constant 0 : index
    %c0_193 = arith.constant 0 : index
    %562 = vector.load %arg13[%c1_191, %c0_192, %c0_193] : memref<2x1x128xf32, #tpu.memory_space<vmem>>, vector<1x1x128xf32>
    %563 = vector.shape_cast %562 : vector<1x1x128xf32> to vector<1x128xf32>
    %564 = vector.broadcast %563 : vector<1x128xf32> to vector<16x128xf32>
    %565 = arith.addf %561, %564 : vector<16x128xf32>
    %566 = arith.addf %565, %538 : vector<16x128xf32>
    %c1_194 = arith.constant 1 : index
    %c0_195 = arith.constant 0 : index
    %c0_196 = arith.constant 0 : index
    %567 = vector.load %arg14[%c1_194, %c0_195, %c0_196] : memref<2x1x128xf32, #tpu.memory_space<vmem>>, vector<1x1x128xf32>
    %568 = vector.shape_cast %567 : vector<1x1x128xf32> to vector<1x128xf32>
    %c1_197 = arith.constant 1 : index
    %c0_198 = arith.constant 0 : index
    %c0_199 = arith.constant 0 : index
    %569 = vector.load %arg15[%c1_197, %c0_198, %c0_199] : memref<2x1x128xf32, #tpu.memory_space<vmem>>, vector<1x1x128xf32>
    %570 = vector.shape_cast %569 : vector<1x1x128xf32> to vector<1x128xf32>
    %cst_200 = arith.constant dense<0.000000e+00> : vector<16xf32>
    %571 = vector.multi_reduction <add>, %566, %cst_200 [1] : vector<16x128xf32> to vector<16xf32>
    %572 = vector.shape_cast %571 : vector<16xf32> to vector<16x1xf32>
    %cst_201 = arith.constant 1.280000e+02 : f32
    %573 = vector.broadcast %cst_201 : f32 to vector<16x1xf32>
    %574 = arith.divf %572, %573 : vector<16x1xf32>
    %575 = vector.broadcast %574 : vector<16x1xf32> to vector<16x128xf32>
    %576 = arith.subf %566, %575 : vector<16x128xf32>
    %577 = arith.mulf %576, %576 : vector<16x128xf32>
    %cst_202 = arith.constant dense<0.000000e+00> : vector<16xf32>
    %578 = vector.multi_reduction <add>, %577, %cst_202 [1] : vector<16x128xf32> to vector<16xf32>
    %579 = vector.shape_cast %578 : vector<16xf32> to vector<16x1xf32>
    %cst_203 = arith.constant 1.280000e+02 : f32
    %580 = vector.broadcast %cst_203 : f32 to vector<16x1xf32>
    %581 = arith.divf %579, %580 : vector<16x1xf32>
    %582 = vector.broadcast %574 : vector<16x1xf32> to vector<16x128xf32>
    %583 = arith.subf %566, %582 : vector<16x128xf32>
    %cst_204 = arith.constant 9.99999996E-13 : f32
    %584 = vector.broadcast %cst_204 : f32 to vector<16x1xf32>
    %585 = arith.addf %581, %584 : vector<16x1xf32>
    %586 = math.rsqrt %585 : vector<16x1xf32>
    %587 = vector.broadcast %586 : vector<16x1xf32> to vector<16x128xf32>
    %588 = arith.mulf %583, %587 : vector<16x128xf32>
    %589 = vector.broadcast %568 : vector<1x128xf32> to vector<16x128xf32>
    %590 = arith.mulf %588, %589 : vector<16x128xf32>
    %591 = vector.broadcast %570 : vector<1x128xf32> to vector<16x128xf32>
    %592 = arith.addf %590, %591 : vector<16x128xf32>
    %593 = vector.extract_strided_slice %592 {offsets = [0, 0], sizes = [1, 128], strides = [1, 1]} : vector<16x128xf32> to vector<1x128xf32>
    %594 = vector.extract_strided_slice %592 {offsets = [8, 0], sizes = [1, 128], strides = [1, 1]} : vector<16x128xf32> to vector<1x128xf32>
    %595 = tpu.concatenate %593, %594 in 0 : vector<1x128xf32>, vector<1x128xf32> -> vector<2x128xf32>
    %c0_205 = arith.constant 0 : index
    %c0_206 = arith.constant 0 : index
    %596 = vector.load %arg16[%c0_205, %c0_206] : memref<2x128xf32, #tpu.memory_space<vmem>>, vector<2x128xf32>
    %597 = arith.mulf %595, %596 : vector<2x128xf32>
    %c0_207 = arith.constant 0 : index
    %c0_208 = arith.constant 0 : index
    %598 = vector.load %arg17[%c0_207, %c0_208] : memref<2x128xf32, #tpu.memory_space<vmem>>, vector<2x128xf32>
    tpu.vector_store %arg17[%c0_207, %c0_208], %597 {strides = array<i32>} : memref<2x128xf32, #tpu.memory_space<vmem>>, vector<2x128xf32>,
    return
  }
}

</mosaic_0001>

<bundles_post_ra>
// kernel: tpu_custom_call.1
= control target key start
LH: loop header
LB: loop body
LE: loop exit
PB: predicated region body
PF: predicated region fallthrough
CT: control target
= control target key end

     0   :  { %s6077_s0 = inlined_call_operand.hbm [shape: f32[16,128], index: 0, kind: input, shape index: {}]   ;;  %s6078_s1 = inlined_call_operand.hbm [shape: f32[2,8], index: 1, kind: input, shape index: {}]   ;;  %s6079_s2 = inlined_call_operand.hbm [shape: f32[1,128], index: 2, kind: input, shape index: {}]   ;;  %s6080_s3 = inlined_call_operand.hbm [shape: f32[1,128], index: 3, kind: input, shape index: {}]   ;;  %s6081_s4 = inlined_call_operand.hbm [shape: f32[2,128,384], index: 4, kind: input, shape index: {}]   ;;  %s6082_s5 = inlined_call_operand.vmem [shape: f32[2,1,384], index: 5, kind: input, shape index: {}]   ;;  %s6083_s6 = inlined_call_operand.hbm [shape: f32[2,128,128], index: 6, kind: input, shape index: {}]   ;;  %s6084_s7 = inlined_call_operand.vmem [shape: f32[2,1,128], index: 7, kind: input, shape index: {}]   ;;  %s6085_s8 = inlined_call_operand.vmem [shape: f32[2,1,128], index: 8, kind: input, shape index: {}]   ;;  %s6086_s9 = inlined_call_operand.vmem [shape: f32[2,1,128], index: 9, kind: input, shape index: {}]   ;;  %s6087_s10 = inlined_call_operand.hbm [shape: f32[2,128,256], index: 10, kind: input, shape index: {}]   ;;  %s6088_s11 = inlined_call_operand.vmem [shape: f32[2,1,256], index: 11, kind: input, shape index: {}]   ;;  %s6089_s12 = inlined_call_operand.hbm [shape: f32[2,256,128], index: 12, kind: input, shape index: {}]   ;;  %s6090_s13 = inlined_call_operand.vmem [shape: f32[2,1,128], index: 13, kind: input, shape index: {}]   ;;  %s6091_s14 = inlined_call_operand.vmem [shape: f32[2,1,128], index: 14, kind: input, shape index: {}]   ;;  %s6092_s15 = inlined_call_operand.vmem [shape: f32[2,1,128], index: 15, kind: input, shape index: {}]   ;;  %s6093_s16 = inlined_call_operand.vmem [shape: f32[2,128], index: 16, kind: input, shape index: {}]   ;;  %s6094_s17 = inlined_call_operand.hbm [shape: f32[2,128], index: 17, kind: output, shape index: {}]  }
   0x1   :  { %6097 = sst [smem:[#allocation23_spill]] %s6077_s0 }
   0x2   :  { %6098 = sst [smem:[#allocation24_spill]] %s6078_s1 }
   0x3   :  { %22 = vsyncpa [#allocation3], 0 }
   0x4   :  { %23 = vsyncpa [#allocation6], 0 }
   0x5   :  { %24 = vsyncpa [#allocation9], 0 }
   0x6   :  { %25 = vsyncpa [#allocation12], 0 }
   0x7   :  { %26 = vsyncpa [#allocation15], 0 }
   0x8   :  { %27 = vsyncpa [#allocation4], 0  ;;  %s5374_s24 = smov [#allocation5]   ;;  %s5375_s26 = smov [#allocation8]  }
   0x9   :  { %s46_s25 = sshll.u32 %s5374_s24, 4  ;;  %s66_s27 = sshll.u32 %s5375_s26, 4  ;;  %s47_s25 = int_to_ptr.vmem [resolvable:$true] %s46_s25  ;;  %s67_s27 = int_to_ptr.vmem [resolvable:$true] %s66_s27 }
   0xa   :  { %s6099_s0 = sld [smem:[#allocation24_spill]] }
  0x10   :  { %s5164_s30 = scalar_lea.hbm %s6099_s0, 32 }
  0x11   :  { %p5165_p0 = scmp.ne.s32.totalorder %s6099_s0, %s5164_s30  ;;  %p5168_p1 = scmp.lt.u32.totalorder %s5164_s30, %s6099_s0 }
  0x13   :  { %p5170_p2 = pnand %p5168_p1, %p5165_p0 }
  0x15   :  { %5173 = shalt.err (!%p5170_p2)
}
  0x16   :  { %s5174_s21 = scalar_lea.vmem %s47_s25, 32  ;;  %p5179_p4 = scmp.lt.s32.totalorder %s47_s25, %s47_s25 }
  0x17   :  { %p5175_p3 = scmp.ne.s32.totalorder %s47_s25, %s5174_s21  ;;  %p5180_p5 = scmp.lt.s32.totalorder %s5174_s21, %s5174_s21 }
  0x19   :  { %p5181_p6 = por %p5180_p5, %p5179_p4 }
  0x1b   :  { %p5182_p7 = pnand %p5181_p6, %p5175_p3 }
  0x1d   :  { %5185 = shalt.err (!%p5182_p7)
}
  0x1e   :  { %49 = dma.hbm_to_vmem [thread:$0]  %s6099_s0, 32, %s47_s25, [#allocation6]  }
  0x1f   :  { %s5186_s28 = scalar_lea.hbm %s6080_s3, 16 }
  0x20   :  { %p5187_p8 = scmp.ne.s32.totalorder %s6080_s3, %s5186_s28  ;;  %p5190_p9 = scmp.lt.u32.totalorder %s5186_s28, %s6080_s3 }
  0x22   :  { %p5192_p10 = pnand %p5190_p9, %p5187_p8 }
  0x24   :  { %5195 = shalt.err (!%p5192_p10)
}
  0x25   :  { %s5196_s1 = scalar_lea.vmem %s67_s27, 16  ;;  %s5200_s20 = scalar_lea.vmem %s67_s27, 32 }
  0x26   :  { %p5197_p11 = scmp.ne.s32.totalorder %s67_s27, %s5196_s1  ;;  %p5201_p12 = scmp.lt.s32.totalorder %s67_s27, %s67_s27 }
  0x27   :  { %p5202_p13 = scmp.lt.s32.totalorder %s5200_s20, %s5196_s1 }
  0x29   :  { %p5203_p0 = por %p5202_p13, %p5201_p12 }
  0x2b   :  { %p5204_p1 = pnand %p5203_p0, %p5197_p11 }
  0x2d   :  { %5207 = shalt.err (!%p5204_p1)
}
  0x2e   :  { %69 = dma.hbm_to_vmem [thread:$0]  %s6080_s3, 16, %s67_s27, [#allocation9]  }
  0x2f   :  { %s5376_s21 = smov [#allocation11]   ;;  %s5377_s23 = smov [#allocation2]  }
  0x30   :  { %s89_s22 = sshll.u32 %s5376_s21, 4  ;;  %s33_s24 = sshll.u32 %s5377_s23, 4  ;;  %s90_s22 = int_to_ptr.vmem [resolvable:$true] %s89_s22  ;;  %s5505_s24 = int_to_ptr.vmem [resolvable:$true] %s33_s24 }
  0x31   :  { %s5208_s29 = scalar_lea.hbm %s6083_s6, 4096 }
  0x32   :  { %p5209_p2 = scmp.ne.s32.totalorder %s6083_s6, %s5208_s29  ;;  %p5212_p3 = scmp.lt.u32.totalorder %s5208_s29, %s6083_s6 }
  0x34   :  { %p5214_p4 = pnand %p5212_p3, %p5209_p2 }
  0x36   :  { %5217 = shalt.err (!%p5214_p4)
}
  0x37   :  { %s5218_s3 = scalar_lea.vmem %s90_s22, 4096  ;;  %p5223_p6 = scmp.lt.s32.totalorder %s90_s22, %s90_s22 }
  0x38   :  { %p5219_p5 = scmp.ne.s32.totalorder %s90_s22, %s5218_s3  ;;  %p5224_p7 = scmp.lt.s32.totalorder %s5218_s3, %s5218_s3 }
  0x3a   :  { %p5225_p8 = por %p5224_p7, %p5223_p6 }
  0x3c   :  { %p5226_p9 = pnand %p5225_p8, %p5219_p5 }
  0x3e   :  { %5229 = shalt.err (!%p5226_p9)
}
  0x3f   :  { %s5378_s27 = smov 128   ;;  %s5379_s20 = smov 8  }
  0x40   :  { %95 = dma.hbm_to_vmem [thread:$0]  %s6083_s6, 4096, %s90_s22, [#allocation12], %s5378_s27, %s5378_s27, %s5379_s20  }
  0x41   :  { %s6100_s26 = sld [smem:[#allocation23_spill]] }
  0x47   :  { %s5230_s28 = scalar_lea.hbm %s6100_s26, 256 }
  0x48   :  { %p5231_p10 = scmp.ne.s32.totalorder %s6100_s26, %s5230_s28  ;;  %p5234_p11 = scmp.lt.u32.totalorder %s5230_s28, %s6100_s26 }
  0x4a   :  { %p5236_p12 = pnand %p5234_p11, %p5231_p10 }
  0x4c   :  { %5239 = shalt.err (!%p5236_p12)
}
  0x4d   :  { %s5240_s1 = scalar_lea.vmem %s5505_s24, 256  ;;  %p5245_p0 = scmp.lt.s32.totalorder %s5505_s24, %s5505_s24 }
  0x4e   :  { %p5241_p13 = scmp.ne.s32.totalorder %s5505_s24, %s5240_s1  ;;  %p5246_p1 = scmp.lt.s32.totalorder %s5240_s1, %s5240_s1 }
  0x50   :  { %p5247_p2 = por %p5246_p1, %p5245_p0 }
  0x52   :  { %p5248_p3 = pnand %p5247_p2, %p5241_p13 }
  0x54   :  { %5251 = shalt.err (!%p5248_p3)
}
  0x55   :  { %39 = dma.hbm_to_vmem [thread:$0]  %s6100_s26, 256, %s5505_s24, [#allocation3], %s5378_s27, %s5378_s27, %s5379_s20  }
  0x56   :  { %s5380_s3 = smov [#allocation7]   ;;  %s5381_s0 = smov [#allocation10]  }
  0x57   :  { %s56_s25 = sshll.u32 %s5380_s3, 4  ;;  %s75_s21 = sshll.u32 %s5381_s0, 4  ;;  %s57_s25 = int_to_ptr.vmem [resolvable:$true] %s56_s25  ;;  %s5542_s21 = int_to_ptr.vmem [resolvable:$true] %s75_s21 }
  0x58   :  { %s5252_s29 = scalar_lea.hbm %s6079_s2, 16 }
  0x59   :  { %p5253_p4 = scmp.ne.s32.totalorder %s6079_s2, %s5252_s29  ;;  %p5256_p5 = scmp.lt.u32.totalorder %s5252_s29, %s6079_s2 }
  0x5b   :  { %p5258_p6 = pnand %p5256_p5, %p5253_p4 }
  0x5d   :  { %5261 = shalt.err (!%p5258_p6)
}
  0x5e   :  { %s5262_s24 = scalar_lea.vmem %s57_s25, 16  ;;  %s5266_s26 = scalar_lea.vmem %s57_s25, 32 }
  0x5f   :  { %p5263_p7 = scmp.ne.s32.totalorder %s57_s25, %s5262_s24  ;;  %p5267_p8 = scmp.lt.s32.totalorder %s57_s25, %s57_s25 }
  0x60   :  { %p5268_p9 = scmp.lt.s32.totalorder %s5266_s26, %s5262_s24 }
  0x62   :  { %p5269_p10 = por %p5268_p9, %p5267_p8 }
  0x64   :  { %p5270_p11 = pnand %p5269_p10, %p5263_p7 }
  0x66   :  { %5273 = shalt.err (!%p5270_p11)
}
  0x67   :  { %59 = dma.hbm_to_vmem [thread:$0]  %s6079_s2, 16, %s57_s25, [#allocation6]  }
  0x68   :  { %s5274_s23 = scalar_lea.hbm %s6081_s4, 12288 }
  0x69   :  { %p5275_p12 = scmp.ne.s32.totalorder %s6081_s4, %s5274_s23  ;;  %p5278_p13 = scmp.lt.u32.totalorder %s5274_s23, %s6081_s4 }
  0x6b   :  { %p5280_p0 = pnand %p5278_p13, %p5275_p12 }
  0x6d   :  { %5283 = shalt.err (!%p5280_p0)
}
  0x6e   :  { %s5284_s19 = scalar_lea.vmem %s5542_s21, 12288  ;;  %p5289_p2 = scmp.lt.s32.totalorder %s5542_s21, %s5542_s21 }
  0x6f   :  { %p5285_p1 = scmp.ne.s32.totalorder %s5542_s21, %s5284_s19  ;;  %p5290_p3 = scmp.lt.s32.totalorder %s5284_s19, %s5284_s19 }
  0x71   :  { %p5291_p4 = por %p5290_p3, %p5289_p2 }
  0x73   :  { %p5292_p5 = pnand %p5291_p4, %p5285_p1 }
  0x75   :  { %5295 = shalt.err (!%p5292_p5)
}
  0x76   :  { %s5382_s2 = smov 384   ;;  %s5383_s25 = smov 24  }
  0x77   :  { %81 = dma.hbm_to_vmem [thread:$0]  %s6081_s4, 12288, %s5542_s21, [#allocation9], %s5382_s2, %s5382_s2, %s5383_s25  }
  0x78   :  { %s5384_s26 = smov [#allocation13]   ;;  %s5296_s0 = scalar_lea.hbm %s6087_s10, 8192 }
  0x79   :  { %s107_s6 = sshll.u32 %s5384_s26, 4  ;;  %p5297_p6 = scmp.ne.s32.totalorder %s6087_s10, %s5296_s0  ;;  %s108_s6 = int_to_ptr.vmem [resolvable:$true] %s107_s6 }
  0x7a   :  { %p5300_p7 = scmp.lt.u32.totalorder %s5296_s0, %s6087_s10 }
  0x7c   :  { %p5302_p8 = pnand %p5300_p7, %p5297_p6 }
  0x7e   :  { %5305 = shalt.err (!%p5302_p8)
}
  0x7f   :  { %s5306_s30 = scalar_lea.vmem %s108_s6, 8192  ;;  %p5311_p10 = scmp.lt.s32.totalorder %s108_s6, %s108_s6 }
  0x80   :  { %p5307_p9 = scmp.ne.s32.totalorder %s108_s6, %s5306_s30  ;;  %p5312_p11 = scmp.lt.s32.totalorder %s5306_s30, %s5306_s30 }
  0x82   :  { %p5313_p12 = por %p5312_p11, %p5311_p10 }
  0x84   :  { %p5314_p13 = pnand %p5313_p12, %p5307_p9 }
  0x86   :  { %5317 = shalt.err (!%p5314_p13)
}
  0x87   :  { %s5385_s4 = smov 256   ;;  %s5386_s21 = smov 16  }
  0x88   :  { %113 = dma.hbm_to_vmem [thread:$0]  %s6087_s10, 8192, %s108_s6, [#allocation12], %s5385_s4, %s5385_s4, %s5386_s21  }
  0x89   :  { %s5387_s25 = smov [#allocation14]   ;;  %s5318_s22 = scalar_lea.hbm %s6089_s12, 8192 }
  0x8a   :  { %s121_s1 = sshll.u32 %s5387_s25, 4  ;;  %p5319_p0 = scmp.ne.s32.totalorder %s6089_s12, %s5318_s22  ;;  %s122_s1 = int_to_ptr.vmem [resolvable:$true] %s121_s1 }
  0x8b   :  { %p5322_p1 = scmp.lt.u32.totalorder %s5318_s22, %s6089_s12 }
  0x8d   :  { %p5324_p2 = pnand %p5322_p1, %p5319_p0 }
  0x8f   :  { %5327 = shalt.err (!%p5324_p2)
}
  0x90   :  { %s5328_s29 = scalar_lea.vmem %s122_s1, 8192  ;;  %p5333_p4 = scmp.lt.s32.totalorder %s122_s1, %s122_s1 }
  0x91   :  { %p5329_p3 = scmp.ne.s32.totalorder %s122_s1, %s5328_s29  ;;  %p5334_p5 = scmp.lt.s32.totalorder %s5328_s29, %s5328_s29 }
  0x93   :  { %p5335_p6 = por %p5334_p5, %p5333_p4 }
  0x95   :  { %p5336_p7 = pnand %p5335_p6, %p5329_p3 }
  0x97   :  { %5339 = shalt.err (!%p5336_p7)
}
  0x98   :  { %127 = dma.hbm_to_vmem [thread:$0]  %s6089_s12, 8192, %s122_s1, [#allocation15], %s5378_s27, %s5378_s27, %s5379_s20  }
  0x99   :  { %5362 = dma.done.wait [#allocation3], 256  }
  0x9a   :  { %5363 = vsyncadd [#allocation3], 4294967040 }
  0x9b   :  { %5364 = dma.done.wait [#allocation6], 48  }
  0x9c   :  { %5365 = vsyncadd [#allocation6], 4294967248 }
  0x9d   :  { %5366 = dma.done.wait [#allocation9], 12304  }
  0x9e   :  { %5367 = vsyncadd [#allocation9], 4294954992 }
  0x9f   :  { %5368 = dma.done.wait [#allocation12], 12288  }
  0xa0   :  { %5369 = vsyncadd [#allocation12], 4294955008 }
  0xa1   :  { %5370 = dma.done.wait [#allocation15], 8192  }
  0xa2   :  { %5371 = vsyncadd [#allocation15], 4294959104  ;;  %v160_v0 = vld [vmem:[#allocation2] sm:$0xff]  ;;  %v161_v1 = vld [vmem:[#allocation2 + $0x8] sm:$0xff]  ;;  %v5388_v47 = vmov 0.0   ;;  %vm5389_vm0 = vmmov 0  }
  0xa3   :  { %164 = vadd.xlane.f32.xlu0 %v160_v0  ;;  %166 = vadd.xlane.f32.xlu1 %v161_v1  ;;  %v227_v2 = vld [vmem:[#allocation10 + $0x8] sm:$0xff]  ;;  %v230_v3 = vld [vmem:[#allocation10 + $0x20] sm:$0xff]  ;;  %v229_v6 = vld [vmem:[#allocation10 + $0x18] sm:$0xff]  ;;  %vm520_vm8 = vcmask 64512   ;;  %vm4126_vm10 = vcmask 1040384   ;;  %s5390_s19 = smov [#allocation16]  }
  0xa4   :  { %v226_v4 = vld [vmem:[#allocation10] sm:$0xff]  ;;  %v4704_v5 = vpack.c.bf16 %v230_v3, %v227_v2  ;;  %v233_v7 = vld [vmem:[#allocation10 + $0x38] sm:$0xff]  ;;  %v236_v8 = vld [vmem:[#allocation10 + $0x50] sm:$0xff]  ;;  %355 = vmatprep.mubr.f32.mxu0 %v5388_v47  ;;  %s4137_s2 = sshll.u32 %s5390_s19, 4  ;;  %s4138_s2 = int_to_ptr.vmem [resolvable:$true] %s4137_s2 }
  0xa5   :  { %v4706_v9 = vpack.c.bf16 %v229_v6, %v226_v4  ;;  %v4708_v10 = vpack.c.bf16 %v236_v8, %v233_v7  ;;  %v232_v11 = vld [vmem:[#allocation10 + $0x30] sm:$0xff]  ;;  %v235_v12 = vld [vmem:[#allocation10 + $0x48] sm:$0xff]  ;;  %v242_v14 = vld [vmem:[#allocation10 + $0x80] sm:$0xff]  ;;  %p5345_p9 = scmp.lt.s32.totalorder %s4138_s2, %s4138_s2 }
  0xa6   :  { %v239_v13 = vld [vmem:[#allocation10 + $0x68] sm:$0xff]  ;;  %4705 = vmatprep.subr.bf16.mxu0 %v4704_v5  ;;  %v4710_v15 = vpack.c.bf16 %v235_v12, %v232_v11  ;;  %v238_v17 = vld [vmem:[#allocation10 + $0x60] sm:$0xff]  ;;  %v241_v18 = vld [vmem:[#allocation10 + $0x78] sm:$0xff] }
  0xa7   :  { %4707 = vmatpush1.bf16.msra.mxu0 %v4706_v9  ;;  %v4712_v16 = vpack.c.bf16 %v242_v14, %v239_v13  ;;  %v4714_v19 = vpack.c.bf16 %v241_v18, %v238_v17  ;;  %v245_v28 = vld [vmem:[#allocation10 + $0x98] sm:$0xff]  ;;  %v248_v29 = vld [vmem:[#allocation10 + $0xb0] sm:$0xff]  ;;  %v247_v32 = vld [vmem:[#allocation10 + $0xa8] sm:$0xff] }
  0xa8   :  { %4709 = vmatprep.subr.bf16.mxu0 %v4708_v10  ;;  %v4716_v30 = vpack.c.bf16 %v248_v29, %v245_v28  ;;  %v244_v31 = vld [vmem:[#allocation10 + $0x90] sm:$0xff]  ;;  %v251_v34 = vld [vmem:[#allocation10 + $0xc8] sm:$0xff]  ;;  %v254_v35 = vld [vmem:[#allocation10 + $0xe0] sm:$0xff] }
  0xa9   :  { %v4718_v33 = vpack.c.bf16 %v247_v32, %v244_v31  ;;  %v4720_v36 = vpack.c.bf16 %v254_v35, %v251_v34  ;;  %v250_v37 = vld [vmem:[#allocation10 + $0xc0] sm:$0xff]  ;;  %v253_v38 = vld [vmem:[#allocation10 + $0xd8] sm:$0xff]  ;;  %v260_v41 = vld [vmem:[#allocation10 + $0x110] sm:$0xff] }
  0xaa   :  { %v4722_v39 = vpack.c.bf16 %v253_v38, %v250_v37  ;;  %v257_v40 = vld [vmem:[#allocation10 + $0xf8] sm:$0xff]  ;;  %v256_v42 = vld [vmem:[#allocation10 + $0xf0] sm:$0xff]  ;;  %v259_v44 = vld [vmem:[#allocation10 + $0x108] sm:$0xff] }
  0xab   :  { %4711 = vmatpush1.bf16.msra.mxu0 %v4710_v15  ;;  %v4724_v43 = vpack.c.bf16 %v260_v41, %v257_v40  ;;  %v263_v45 = vld [vmem:[#allocation10 + $0x128] sm:$0xff]  ;;  %v266_v46 = vld [vmem:[#allocation10 + $0x140] sm:$0xff]  ;;  %v4726_v48 = vpack.c.bf16 %v259_v44, %v256_v42  ;;  %v265_v51 = vld [vmem:[#allocation10 + $0x138] sm:$0xff] }
  0xac   :  { %4713 = vmatprep.subr.bf16.mxu0 %v4712_v16  ;;  %v4728_v49 = vpack.c.bf16 %v266_v46, %v263_v45  ;;  %v262_v50 = vld [vmem:[#allocation10 + $0x120] sm:$0xff]  ;;  %v269_v52 = vld [vmem:[#allocation10 + $0x158] sm:$0xff]  ;;  %v272_v53 = vld [vmem:[#allocation10 + $0x170] sm:$0xff] }
  0xad   :  { %v4730_v54 = vpack.c.bf16 %v265_v51, %v262_v50  ;;  %v4732_v55 = vpack.c.bf16 %v272_v53, %v269_v52  ;;  %v268_v56 = vld [vmem:[#allocation10 + $0x150] sm:$0xff]  ;;  %v271_v57 = vld [vmem:[#allocation10 + $0x168] sm:$0xff]  ;;  %v234_v61 = vld [vmem:[#allocation10 + $0x40] sm:$0xff] }
  0xae   :  { %v4734_v58 = vpack.c.bf16 %v271_v57, %v268_v56  ;;  %v228_v59 = vld [vmem:[#allocation10 + $0x10] sm:$0xff]  ;;  %v231_v60 = vld [vmem:[#allocation10 + $0x28] sm:$0xff]  ;;  %v237_v63 = vld [vmem:[#allocation10 + $0x58] sm:$0xff] }
  0xaf   :  { %4715 = vmatpush1.bf16.msra.mxu0 %v4714_v19  ;;  %v4736_v62 = vpack.c.bf16 %v231_v60, %v228_v59  ;;  %v243_v2 = vld [vmem:[#allocation10 + $0x88] sm:$0xff]  ;;  %v246_v4 = vld [vmem:[#allocation10 + $0xa0] sm:$0xff]  ;;  %v249_v5 = vld [vmem:[#allocation10 + $0xb8] sm:$0xff] }
  0xb0   :  { %4717 = vmatprep.subr.bf16.mxu0 %v4716_v30  ;;  %v4748_v6 = vpack.c.bf16 %v249_v5, %v246_v4  ;;  %v252_v7 = vld [vmem:[#allocation10 + $0xd0] sm:$0xff]  ;;  %v255_v8 = vld [vmem:[#allocation10 + $0xe8] sm:$0xff]  ;;  %v258_v10 = vld [vmem:[#allocation10 + $0x100] sm:$0xff] }
  0xb1   :  { %4737 = vmatprep.subr.bf16.mxu1 %v4736_v62  ;;  %v4752_v9 = vpack.c.bf16 %v255_v8, %v252_v7  ;;  %v261_v11 = vld [vmem:[#allocation10 + $0x118] sm:$0xff]  ;;  %v264_v13 = vld [vmem:[#allocation10 + $0x130] sm:$0xff]  ;;  %v267_v14 = vld [vmem:[#allocation10 + $0x148] sm:$0xff] }
  0xb2   :  { %4739 = vmatpush3.bf16.msra.mxu1 %v4736_v62  ;;  %v4756_v12 = vpack.c.bf16 %v261_v11, %v258_v10  ;;  %v4760_v15 = vpack.c.bf16 %v267_v14, %v264_v13  ;;  %v270_v16 = vld [vmem:[#allocation10 + $0x160] sm:$0xff]  ;;  %v273_v17 = vld [vmem:[#allocation10 + $0x178] sm:$0xff] }
  0xb3   :  { %4719 = vmatpush1.bf16.msra.mxu0 %v4718_v33  ;;  %v4764_v18 = vpack.c.bf16 %v273_v17, %v270_v16  ;;  %v4150_v28 = vld [vmem:[#allocation7] ss:$0 sm:$0xff]  ;;  %v4151_v31 = vld [vmem:[#allocation8] ss:$0 sm:$0xff] }
  0xb4   :  { %4721 = vmatprep.subr.bf16.mxu0 %v4720_v36 }
  0xb7   :  { %4723 = vmatpush1.bf16.msra.mxu0 %v4722_v39  ;;  %v274_v39 = vld [vmem:[%s6082_s5] sm:$0x7] }
  0xb8   :  { %4725 = vmatprep.subr.bf16.mxu0 %v4724_v43 }
  0xbb   :  { %4727 = vmatpush1.bf16.msra.mxu0 %v4726_v48 }
  0xbc   :  { %4729 = vmatprep.subr.bf16.mxu0 %v4728_v49 }
  0xbf   :  { %4731 = vmatpush1.bf16.msra.mxu0 %v4730_v54 }
  0xc0   :  { %4733 = vmatprep.subr.bf16.mxu0 %v4732_v55 }
  0xc3   :  { %4735 = vmatpush1.bf16.msra.mxu0 %v4734_v58 }
  0xc4   :  { %4439 = vmatprep.subr.mxu0 %v5388_v47 }
 0x130   :  { %v165_v20 = vpop.xlane.xlu0 %164  ;;  %v167_v21 = vpop.xlane.xlu1 %166 }
 0x131   :  { %v169_v22 = vmul.f32 0.0078125, %v165_v20  ;;  %v170_v23 = vmul.f32 0.0078125, %v167_v21 }
 0x133   :  { %v5600_v24 = vsub.f32 %v160_v0, %v169_v22  ;;  %v5602_v25 = vsub.f32 %v161_v1, %v170_v23  ;;  %v4740_v0 = vpack.c.bf16 %v237_v63, %v234_v61  ;;  %v240_v1 = vld [vmem:[#allocation10 + $0x70] sm:$0xff] }
 0x134   :  { %v4744_v3 = vpack.c.bf16 %v243_v2, %v240_v1  ;;  %v5688_v1 = vld [vmem:[#allocation5] sm:$0x3] }
 0x135   :  { %v173_v26 = vmul.f32 %v5600_v24, %v5600_v24  ;;  %v174_v27 = vmul.f32 %v5602_v25, %v5602_v25  ;;  %4741 = vmatprep.subr.bf16.mxu1 %v4740_v0 }
 0x136   :  { %4743 = vmatpush3.bf16.msra.mxu1 %v4740_v0 }
 0x137   :  { %175 = vadd.xlane.f32.xlu0 %v173_v26  ;;  %177 = vadd.xlane.f32.xlu1 %v174_v27 }
 0x138   :  { %4745 = vmatprep.subr.bf16.mxu1 %v4744_v3 }
 0x13a   :  { %4747 = vmatpush3.bf16.msra.mxu1 %v4744_v3 }
 0x13b   :  { %4749 = vmatprep.subr.bf16.mxu1 %v4748_v6 }
 0x13e   :  { %4751 = vmatpush3.bf16.msra.mxu1 %v4748_v6 }
 0x13f   :  { %4753 = vmatprep.subr.bf16.mxu1 %v4752_v9 }
 0x142   :  { %4755 = vmatpush3.bf16.msra.mxu1 %v4752_v9 }
 0x143   :  { %4757 = vmatprep.subr.bf16.mxu1 %v4756_v12 }
 0x146   :  { %4759 = vmatpush3.bf16.msra.mxu1 %v4756_v12 }
 0x147   :  { %4761 = vmatprep.subr.bf16.mxu1 %v4760_v15 }
 0x14a   :  { %4763 = vmatpush3.bf16.msra.mxu1 %v4760_v15 }
 0x14b   :  { %4765 = vmatprep.subr.bf16.mxu1 %v4764_v18 }
 0x14e   :  { %4767 = vmatpush3.bf16.msra.mxu1 %v4764_v18 }
 0x14f   :  { %4464 = vmatprep.subr.mxu1 %v5388_v47 }
 0x1c4   :  { %v176_v19 = vpop.xlane.xlu0 %175  ;;  %v178_v20 = vpop.xlane.xlu1 %177 }
 0x1c5   :  { %v179_v21 = vmul.f32 0.0078125, %v176_v19  ;;  %v180_v22 = vmul.f32 0.0078125, %v178_v20 }
 0x1c7   :  { %v181_v23 = vadd.f32 1e-12, %v179_v21  ;;  %v182_v26 = vadd.f32 1e-12, %v180_v22 }
 0x1c9   :  { %5064 = vrsqrt.f32 %v181_v23 }
 0x1ca   :  { %5066 = vrsqrt.f32 %v182_v26 }
 0x1d3   :  { %v5065_v27 = vpop.eup %5064 }
 0x1d4   :  { %v5067_v29 = vpop.eup %5066  ;;  %v185_v30 = vmul.f32 %v5065_v27, %v5600_v24  ;;  %v204_v24 = vlaneseq }
 0x1d5   :  { %v186_v32 = vmul.f32 %v5067_v29, %v5602_v25 }
 0x1d6   :  { %v193_v33 = vmul.f32 %v4150_v28, %v185_v30  ;;  %v5626_v25 = vshrl.u32 %v204_v24, 7  ;;  %v5631_v38 = vand.u32 127, %v204_v24 }
 0x1d7   :  { %v194_v34 = vmul.f32 %v4150_v28, %v186_v32 }
 0x1d8   :  { %v5613_v35 = vadd.f32 %v4151_v31, %v193_v33  ;;  %v5629_v37 = vsub.s32 0, %v5626_v25  ;;  %v5637_v40 = vsub.s32 1, %v5626_v25  ;;  %v286_v41 = vsub.s32 2, %v5626_v25 }
 0x1d9   :  { %v5615_v36 = vadd.f32 %v4151_v31, %v194_v34  ;;  %vm216_vm1 = vcmp.ge.s32.totalorder %v5631_v38, 64  ;;  %vm217_vm2 = vcmp.lt.s32.totalorder %v5631_v38, 96  ;;  %vm207_vm3 = vcmp.lt.s32.totalorder %v5631_v38, 32 }
 0x1da   :  { %356 = vmatmul.mubr.f32.vlgmr.msra.gmra.mrb[0].mxu0 %v5613_v35  ;;  %4436 = vmatprep.mubr.f32.mxu1 %v5613_v35  ;;  %v279_v42 = vrot.slane %v274_v39, %v5629_v37  ;;  %v283_v43 = vrot.slane %v274_v39, %v5637_v40  ;;  %v287_v44 = vrot.slane %v274_v39, %v286_v41  ;;  %vm211_vm4 = vcmp.ge.s32.totalorder %v5631_v38, 32  ;;  %vm218_vm6 = vmand %vm216_vm1, %vm217_vm2 }
 0x1db   :  { %361 = vmatprep.mubr.f32.mxu0 %v5388_v47  ;;  %4437 = vmatmul.mubr.f32.vlgmr.msra.gmra.mrb[0].mxu1 %v5615_v36  ;;  %vm212_vm5 = vcmp.lt.s32.totalorder %v5631_v38, 64  ;;  %v5652_v50 = vsel %vm207_vm3, 1.0, %v5388_v47  ;;  %v5662_v56 = vsel %vm218_vm6, 1.0, %v5388_v47  ;;  %v5692_v2 = vrot.slane %v5688_v1, %v5629_v37 }
 0x1dc   :  { %4466 = vmatprep.mubr.msk.f32.mxu1 %vm5389_vm0, %v5388_v47  ;;  %vm213_vm7 = vmand %vm211_vm4, %vm212_vm5  ;;  %vm221_vm9 = vcmp.ge.s32.totalorder %v5631_v38, 96 }
 0x1dd   :  { %v5672_v61 = vsel %vm213_vm7, 1.0, %v5388_v47  ;;  %v5715_v33 = vsel %vm221_vm9, 1.0, %v5388_v47 }
 0x1de   :  { %362 = vmatmul.mubr.f32.gmra.mrb[2].mxu0 %v5615_v36 }
 0x1df   :  { %4441 = vmatprep.mubr.msk.f32.mxu0 %vm5389_vm0, %v5388_v47 }
 0x2ad   :  { %v357_v45 = vpop.f32.mrb[0].mxu0 }
 0x2ae   :  { %v5649_v46 = vadd.f32 %v357_v45, %v279_v42  ;;  %v359_v48 = vpop.f32.mrb[1].mxu0  ;;  %v4438_v49 = vpop.f32.mrb[0].mxu1 }
 0x2af   :  { %v5654_v51 = vadd.f32 %v359_v48, %v283_v43  ;;  %v5656_v52 = vadd.f32 %v4438_v49, %v287_v44  ;;  %v434_v53 = vpop.f32.mrb[1].mxu1 }
 0x2b0   :  { %v5658_v54 = vadd.f32 %v434_v53, %v287_v44  ;;  %v443_v57 = vmul.f32 %v5652_v50, %v5649_v46  ;;  %v533_v0 = vmul.f32 %v5672_v61, %v5649_v46  ;;  %v764_v32 = vmul.f32 %v5662_v56, %v5649_v46 }
 0x2b1   :  { %4440 = vmatpush3.xpose.msra.mxu0 %v5654_v51  ;;  %v363_v55 = vpop.f32.mrb[2].mxu0  ;;  %v923_v34 = vmul.f32 %v5715_v33, %v5649_v46 }
 0x2b2   :  { %4444 = vmatprep.subr.mxu0 %v5388_v47  ;;  %v5667_v58 = vadd.f32 %v363_v55, %v279_v42  ;;  %v365_v59 = vpop.f32.mrb[3].mxu0  ;;  %v848_v60 = vmul.f32 %v5662_v56, %v5658_v54  ;;  %v617_v63 = vmul.f32 %v5672_v61, %v5658_v54  ;;  %v532_v29 = vmul.f32 %v5652_v50, %v5658_v54 }
 0x2b3   :  { %v5674_v62 = vadd.f32 %v365_v59, %v283_v43  ;;  %v5752_v59 = vrot.slane %v5688_v1, %v5637_v40 }
 0x2b4   :  { %4442 = vmatmul.mubr.f32.vlgmr.msra.gmra.mrb[4].mxu0 %v443_v57  ;;  %4465 = vmatpush3.msra.mxu1 %v848_v60  ;;  %v1082_v24 = vmul.f32 %v5652_v50, %v5667_v58  ;;  %v1171_v38 = vmul.f32 %v5672_v61, %v5667_v58  ;;  %v1402_v39 = vmul.f32 %v5662_v56, %v5667_v58 }
 0x2b5   :  { %4445 = vmatpush3.xpose.msra.mxu0 %v5654_v51  ;;  %4446 = vmatprep.mubr.msk.f32.mxu0 %vm5389_vm0, %v5388_v47  ;;  %v1561_v42 = vmul.f32 %v5715_v33, %v5667_v58 }
 0x2b6   :  { %4449 = vmatprep.subr.mxu0 %v5388_v47  ;;  %4474 = vmatprep.subr.mxu1 %v5388_v47 }
 0x2b8   :  { %4447 = vmatmul.mubr.f32.vlgmr.msra.gmra.mrb[6].mxu0 %v533_v0 }
 0x2b9   :  { %4450 = vmatpush3.msra.mxu0 %v617_v63  ;;  %4451 = vmatprep.mubr.msk.f32.mxu0 %vm5389_vm0, %v5388_v47 }
 0x2ba   :  { %4454 = vmatprep.subr.mxu0 %v5388_v47 }
 0x387   :  { %v510_v3 = vpop.f32.mrb[4].mxu0 }
 0x388   :  { %v514_v4 = vmul.f32 0.17677669, %v510_v3  ;;  %v4443_v5 = vpop.f32.mrb[5].mxu0 }
 0x38a   :  { %v519_v6 = vadd.f32 %v5692_v2, %v514_v4 }
 0x38b   :  { %v600_v7 = vpop.f32.mrb[6].mxu0 }
 0x38c   :  { %v604_v8 = vmul.f32 0.17677669, %v600_v7  ;;  %v4448_v9 = vpop.f32.mrb[7].mxu0  ;;  %v521_v10 = vsel %vm520_vm8, %v519_v6, -inf }
 0x38d   :  { %522 = vmax.xlane.f32.xlu1 %v521_v10 }
 0x38e   :  { %v605_v11 = vadd.f32 %v604_v8, %v5692_v2 }
 0x390   :  { %v606_v12 = vsel %vm520_vm8, %v605_v11, -inf }
 0x391   :  { %607 = vmax.xlane.f32.xlu0 %v606_v12 }
 0x41a   :  { %v523_v13 = vpop.xlane.xlu1 %522 }
 0x41b   :  { %v524_v14 = vsub.f32 %v519_v6, %v523_v13 }
 0x41d   :  { %v525_v15 = vmul.f32 1.442695, %v524_v14 }
 0x41e   :  { %v608_v16 = vpop.xlane.xlu0 %607 }
 0x41f   :  { %5068 = vpow2.f32 %v525_v15  ;;  %v609_v17 = vsub.f32 %v605_v11, %v608_v16 }
 0x421   :  { %v610_v18 = vmul.f32 1.442695, %v609_v17 }
 0x423   :  { %5070 = vpow2.f32 %v610_v18 }
 0x429   :  { %v5069_v19 = vpop.eup %5068 }
 0x42a   :  { %v527_v20 = vsel %vm520_vm8, %v5069_v19, 0.0 }
 0x42b   :  { %528 = vadd.xlane.f32.xlu1 %v527_v20 }
 0x42d   :  { %v5071_v21 = vpop.eup %5070 }
 0x42e   :  { %v612_v22 = vsel %vm520_vm8, %v5071_v21, 0.0 }
 0x42f   :  { %613 = vadd.xlane.f32.xlu0 %v612_v22 }
 0x4b8   :  { %v529_v26 = vpop.xlane.xlu1 %528 }
 0x4bc   :  { %v614_v23 = vpop.xlane.xlu0 %613 }
 0x4bd   :  { %5072 = vrcp.f32 %v614_v23 }
 0x4be   :  { %5074 = vrcp.f32 %v529_v26 }
 0x4c7   :  { %v5073_v27 = vpop.eup %5072 }
 0x4c8   :  { %v616_v28 = vmul.f32 %v5073_v27, %v5071_v21  ;;  %v5075_v30 = vpop.eup %5074 }
 0x4c9   :  { %v531_v31 = vmul.f32 %v5075_v30, %v5069_v19 }
 0x4ca   :  { %4452 = vmatmul.mubr.msk.f32.vlgmr.msra.gmra.mrb[8].mxu0 %vm520_vm8, %v616_v28 }
 0x4cb   :  { %4455 = vmatpush3.msra.mxu0 %v532_v29  ;;  %4456 = vmatprep.mubr.msk.f32.mxu0 %vm5389_vm0, %v5388_v47 }
 0x4cc   :  { %4459 = vmatprep.subr.mxu0 %v5388_v47 }
 0x4d2   :  { %4457 = vmatmul.mubr.msk.f32.vlgmr.msra.gmra.mrb[8].mxu0 %vm520_vm8, %v531_v31 }
 0x4d3   :  { %4460 = vmatpush3.xpose.msra.mxu0 %v5654_v51  ;;  %4461 = vmatprep.mubr.msk.f32.mxu0 %vm5389_vm0, %v5388_v47 }
 0x4d4   :  { %4469 = vmatprep.subr.mxu0 %v5388_v47 }
 0x4d6   :  { %4462 = vmatmul.mubr.f32.vlgmr.msra.gmra.mrb[10].mxu0 %v764_v32 }
 0x4d7   :  { %4470 = vmatpush3.xpose.msra.mxu0 %v5654_v51  ;;  %4471 = vmatprep.mubr.msk.f32.mxu0 %vm5389_vm0, %v5388_v47 }
 0x4d8   :  { %4479 = vmatprep.subr.mxu0 %v5388_v47 }
 0x4da   :  { %4472 = vmatmul.mubr.f32.vlgmr.msra.gmra.mrb[12].mxu0 %v923_v34 }
 0x4db   :  { %4480 = vmatpush3.xpose.msra.mxu0 %v5674_v62  ;;  %4481 = vmatprep.mubr.msk.f32.mxu0 %vm5389_vm0, %v5388_v47 }
 0x4dc   :  { %4484 = vmatprep.subr.mxu0 %v5388_v47 }
 0x4de   :  { %4482 = vmatmul.mubr.f32.vlgmr.msra.gmra.mrb[14].mxu0 %v1082_v24 }
 0x4df   :  { %4485 = vmatpush3.xpose.msra.mxu0 %v5674_v62  ;;  %4486 = vmatprep.mubr.msk.f32.mxu0 %vm5389_vm0, %v5388_v47 }
 0x4e0   :  { %4499 = vmatprep.subr.mxu0 %v5388_v47 }
 0x4e2   :  { %4487 = vmatmul.mubr.f32.vlgmr.msra.gmra.mrb[16].mxu0 %v1171_v38 }
 0x4e3   :  { %4500 = vmatpush3.xpose.msra.mxu0 %v5674_v62  ;;  %4501 = vmatprep.mubr.msk.f32.mxu0 %vm5389_vm0, %v5388_v47 }
 0x4e4   :  { %4509 = vmatprep.subr.mxu0 %v5388_v47 }
 0x4e6   :  { %4502 = vmatmul.mubr.f32.vlgmr.msra.gmra.mrb[18].mxu0 %v1402_v39 }
 0x4e7   :  { %4510 = vmatpush3.xpose.msra.mxu0 %v5674_v62  ;;  %4511 = vmatprep.mubr.msk.f32.mxu0 %vm5389_vm0, %v5388_v47 }
 0x4ea   :  { %4512 = vmatmul.mubr.f32.vlgmr.msra.gmra.mrb[20].mxu0 %v1561_v42 }
 0x5a5   :  { %v5746_v43 = vpop.f32.mrb[8].mxu0 }
 0x5a6   :  { %v4458_v44 = vpop.f32.mrb[9].mxu0 }
 0x5a9   :  { %v831_v45 = vpop.f32.mrb[10].mxu0 }
 0x5aa   :  { %v835_v46 = vmul.f32 0.17677669, %v831_v45  ;;  %v4463_v48 = vpop.f32.mrb[11].mxu0 }
 0x5ac   :  { %v836_v49 = vadd.f32 %v835_v46, %v5692_v2 }
 0x5ad   :  { %v990_v51 = vpop.f32.mrb[12].mxu0 }
 0x5ae   :  { %v994_v53 = vmul.f32 0.17677669, %v990_v51  ;;  %v4473_v55 = vpop.f32.mrb[13].mxu0  ;;  %v837_v57 = vsel %vm520_vm8, %v836_v49, -inf }
 0x5af   :  { %838 = vmax.xlane.f32.xlu0 %v837_v57 }
 0x5b0   :  { %v995_v58 = vadd.f32 %v994_v53, %v5692_v2 }
 0x5b1   :  { %v1149_v60 = vpop.f32.mrb[14].mxu0 }
 0x5b2   :  { %v1153_v62 = vmul.f32 0.17677669, %v1149_v60  ;;  %v4483_v63 = vpop.f32.mrb[15].mxu0  ;;  %v996_v0 = vsel %vm520_vm8, %v995_v58, -inf }
 0x5b3   :  { %997 = vmax.xlane.f32.xlu1 %v996_v0  ;;  %v1720_v0 = vld [vmem:[#allocation11] sm:$0xff] }
 0x5b4   :  { %v1158_v3 = vadd.f32 %v5752_v59, %v1153_v62 }
 0x5b5   :  { %v1238_v4 = vpop.f32.mrb[16].mxu0 }
 0x5b6   :  { %v1242_v5 = vmul.f32 0.17677669, %v1238_v4  ;;  %v4488_v6 = vpop.f32.mrb[17].mxu0  ;;  %v1159_v7 = vsel %vm520_vm8, %v1158_v3, -inf }
 0x5b7   :  { %1160 = vmax.xlane.f32.xlu1 %v1159_v7 }
 0x5b8   :  { %v1243_v8 = vadd.f32 %v1242_v5, %v5752_v59 }
 0x5b9   :  { %v1469_v1 = vpop.f32.mrb[18].mxu0 }
 0x5ba   :  { %v1473_v9 = vmul.f32 0.17677669, %v1469_v1  ;;  %v4503_v10 = vpop.f32.mrb[19].mxu0  ;;  %v1244_v11 = vsel %vm520_vm8, %v1243_v8, -inf }
 0x5bb   :  { %1245 = vmax.xlane.f32.xlu0 %v1244_v11 }
 0x5bc   :  { %v1474_v12 = vadd.f32 %v1473_v9, %v5752_v59  ;;  %v1007_v9 = vmul.f32 %v5715_v33, %v5658_v54 }
 0x5bd   :  { %v1628_v13 = vpop.f32.mrb[20].mxu0 }
 0x5be   :  { %v1632_v14 = vmul.f32 0.17677669, %v1628_v13  ;;  %v4513_v15 = vpop.f32.mrb[21].mxu0  ;;  %v1475_v16 = vsel %vm520_vm8, %v1474_v12, -inf  ;;  %v1255_v13 = vmul.f32 %v5672_v61, %v5656_v52 }
 0x5bf   :  { %1476 = vmax.xlane.f32.xlu0 %v1475_v16  ;;  %v1170_v16 = vmul.f32 %v5652_v50, %v5656_v52 }
 0x5c0   :  { %v1633_v17 = vadd.f32 %v1632_v14, %v5752_v59 }
 0x5c2   :  { %v1634_v18 = vsel %vm520_vm8, %v1633_v17, -inf }
 0x5c3   :  { %1635 = vmax.xlane.f32.xlu1 %v1634_v18 }
 0x63c   :  { %v839_v19 = vpop.xlane.xlu0 %838 }
 0x63d   :  { %v840_v20 = vsub.f32 %v836_v49, %v839_v19 }
 0x63f   :  { %v841_v21 = vmul.f32 1.442695, %v840_v20  ;;  %v1486_v20 = vmul.f32 %v5662_v56, %v5656_v52 }
 0x640   :  { %v998_v22 = vpop.xlane.xlu1 %997 }
 0x641   :  { %5076 = vpow2.f32 %v841_v21  ;;  %v999_v23 = vsub.f32 %v995_v58, %v998_v22 }
 0x643   :  { %v1000_v26 = vmul.f32 1.442695, %v999_v23  ;;  %v1645_v23 = vmul.f32 %v5715_v33, %v5656_v52  ;;  %v1726_v52 = vld [vmem:[#allocation11 + $0x30] sm:$0xff] }
 0x644   :  { %v1161_v27 = vpop.xlane.xlu1 %1160 }
 0x645   :  { %5078 = vpow2.f32 %v1000_v26  ;;  %v1162_v28 = vsub.f32 %v1158_v3, %v1161_v27  ;;  %v1721_v3 = vld [vmem:[#allocation11 + $0x8] sm:$0xff] }
 0x646   :  { %v4768_v4 = vpack.c.bf16 %v1721_v3, %v1720_v0 }
 0x647   :  { %v1163_v29 = vmul.f32 1.442695, %v1162_v28  ;;  %v1722_v28 = vld [vmem:[#allocation11 + $0x10] sm:$0xff] }
 0x648   :  { %v1246_v30 = vpop.xlane.xlu0 %1245  ;;  %4769 = vmatprep.subr.bf16.mxu0 %v4768_v4 }
 0x649   :  { %5080 = vpow2.f32 %v1163_v29  ;;  %v1247_v31 = vsub.f32 %v1243_v8, %v1246_v30  ;;  %4771 = vmatpush3.bf16.msra.mxu0 %v4768_v4  ;;  %v1723_v29 = vld [vmem:[#allocation11 + $0x18] sm:$0xff]  ;;  %v4164_v4 = vld [vmem:[%s6084_s7] ss:$0 sm:$0xff] }
 0x64a   :  { %v4772_v30 = vpack.c.bf16 %v1723_v29, %v1722_v28 }
 0x64b   :  { %v5077_v32 = vpop.eup %5076  ;;  %v1248_v34 = vmul.f32 1.442695, %v1247_v31  ;;  %v1724_v31 = vld [vmem:[#allocation11 + $0x20] sm:$0xff] }
 0x64c   :  { %v1477_v24 = vpop.xlane.xlu0 %1476  ;;  %v843_v38 = vsel %vm520_vm8, %v5077_v32, 0.0  ;;  %4773 = vmatprep.subr.bf16.mxu0 %v4772_v30 }
 0x64d   :  { %5082 = vpow2.f32 %v1248_v34  ;;  %v1478_v39 = vsub.f32 %v1474_v12, %v1477_v24  ;;  %844 = vadd.xlane.f32.xlu0 %v843_v38  ;;  %4775 = vmatpush3.bf16.msra.mxu0 %v4772_v30  ;;  %v1727_v24 = vld [vmem:[#allocation11 + $0x38] sm:$0xff] }
 0x64e   :  { %v4780_v38 = vpack.c.bf16 %v1727_v24, %v1726_v52  ;;  %v1875_v24 = vld [vmem:[#allocation13 + $0x78] sm:$0xff] }
 0x64f   :  { %v5079_v42 = vpop.eup %5078  ;;  %v1479_v44 = vmul.f32 1.442695, %v1478_v39  ;;  %v1728_v39 = vld [vmem:[#allocation11 + $0x40] sm:$0xff] }
 0x650   :  { %v1636_v45 = vpop.xlane.xlu1 %1635  ;;  %v1002_v46 = vsel %vm520_vm8, %v5079_v42, 0.0 }
 0x651   :  { %5084 = vpow2.f32 %v1479_v44  ;;  %v1637_v48 = vsub.f32 %v1633_v17, %v1636_v45  ;;  %1003 = vadd.xlane.f32.xlu1 %v1002_v46  ;;  %v1730_v45 = vld [vmem:[#allocation11 + $0x50] sm:$0xff]  ;;  %v1731_v46 = vld [vmem:[#allocation11 + $0x58] sm:$0xff] }
 0x653   :  { %v5081_v49 = vpop.eup %5080  ;;  %v1638_v51 = vmul.f32 1.442695, %v1637_v48  ;;  %v4788_v48 = vpack.c.bf16 %v1731_v46, %v1730_v45  ;;  %v1877_v45 = vld [vmem:[#allocation13 + $0x88] sm:$0xff]  ;;  %v1879_v46 = vld [vmem:[#allocation13 + $0x98] sm:$0xff] }
 0x654   :  { %v1165_v53 = vsel %vm520_vm8, %v5081_v49, 0.0 }
 0x655   :  { %5086 = vpow2.f32 %v1638_v51  ;;  %1166 = vadd.xlane.f32.xlu1 %v1165_v53  ;;  %v1733_v51 = vld [vmem:[#allocation11 + $0x68] sm:$0xff] }
 0x657   :  { %v5083_v55 = vpop.eup %5082 }
 0x658   :  { %v1250_v57 = vsel %vm520_vm8, %v5083_v55, 0.0 }
 0x659   :  { %1251 = vadd.xlane.f32.xlu0 %v1250_v57  ;;  %v1735_v57 = vld [vmem:[#allocation11 + $0x78] sm:$0xff] }
 0x65b   :  { %v5085_v58 = vpop.eup %5084 }
 0x65c   :  { %v1481_v60 = vsel %vm520_vm8, %v5085_v58, 0.0 }
 0x65d   :  { %1482 = vadd.xlane.f32.xlu0 %v1481_v60 }
 0x65f   :  { %v5087_v62 = vpop.eup %5086 }
 0x660   :  { %v1640_v63 = vsel %vm520_vm8, %v5087_v62, 0.0 }
 0x661   :  { %1641 = vadd.xlane.f32.xlu1 %v1640_v63 }
 0x6da   :  { %v845_v5 = vpop.xlane.xlu0 %844 }
 0x6db   :  { %5088 = vrcp.f32 %v845_v5 }
 0x6de   :  { %v1004_v6 = vpop.xlane.xlu1 %1003 }
 0x6df   :  { %5090 = vrcp.f32 %v1004_v6 }
 0x6e2   :  { %v1167_v10 = vpop.xlane.xlu1 %1166 }
 0x6e5   :  { %v5089_v7 = vpop.eup %5088 }
 0x6e6   :  { %v847_v8 = vmul.f32 %v5089_v7, %v5077_v32  ;;  %v1252_v1 = vpop.xlane.xlu0 %1251  ;;  %v1725_v32 = vld [vmem:[#allocation11 + $0x28] sm:$0xff] }
 0x6e7   :  { %5092 = vrcp.f32 %v1252_v1  ;;  %v4776_v34 = vpack.c.bf16 %v1725_v32, %v1724_v31 }
 0x6e8   :  { %4467 = vmatmul.mubr.msk.f32.vlgmr.msra.gmra.mrb[2].mxu1 %vm520_vm8, %v847_v8  ;;  %5094 = vrcp.f32 %v1167_v10  ;;  %v1863_v10 = vld [vmem:[#allocation13 + $0x18] sm:$0xff] }
 0x6e9   :  { %4475 = vmatpush3.msra.mxu1 %v1007_v9  ;;  %4476 = vmatprep.mubr.msk.f32.mxu1 %vm5389_vm0, %v5388_v47  ;;  %v5091_v11 = vpop.eup %5090 }
 0x6ea   :  { %4489 = vmatprep.subr.mxu1 %v5388_v47  ;;  %v1006_v12 = vmul.f32 %v5091_v11, %v5079_v42  ;;  %v1483_v15 = vpop.xlane.xlu0 %1482  ;;  %v1729_v42 = vld [vmem:[#allocation11 + $0x48] sm:$0xff]  ;;  %4777 = vmatprep.subr.bf16.mxu0 %v4776_v34  ;;  %v1860_v11 = vld [vmem:[#allocation13] sm:$0xff] }
 0x6eb   :  { %5096 = vrcp.f32 %v1483_v15  ;;  %4779 = vmatpush3.bf16.msra.mxu0 %v4776_v34  ;;  %v4784_v44 = vpack.c.bf16 %v1729_v42, %v1728_v39  ;;  %v1873_v34 = vld [vmem:[#allocation13 + $0x68] sm:$0xff]  ;;  %v1872_v39 = vld [vmem:[#allocation13 + $0x60] sm:$0xff]  ;;  %v1874_v42 = vld [vmem:[#allocation13 + $0x70] sm:$0xff] }
 0x6ec   :  { %4781 = vmatprep.subr.bf16.mxu0 %v4780_v38 }
 0x6ee   :  { %v1642_v19 = vpop.xlane.xlu1 %1641 }
 0x6ef   :  { %5098 = vrcp.f32 %v1642_v19  ;;  %4783 = vmatpush3.bf16.msra.mxu0 %v4780_v38  ;;  %v1869_v19 = vld [vmem:[#allocation13 + $0x48] sm:$0xff]  ;;  %v4812_v38 = vpack.c.bf16 %v1875_v24, %v1873_v34  ;;  %v2036_v24 = vld [vmem:[#allocation14 + $0x98] sm:$0xff] }
 0x6f0   :  { %4477 = vmatmul.mubr.msk.f32.vlgmr.msra.gmra.mrb[2].mxu1 %vm520_vm8, %v1006_v12  ;;  %4785 = vmatprep.subr.bf16.mxu0 %v4784_v44 }
 0x6f1   :  { %v5093_v14 = vpop.eup %5092  ;;  %4490 = vmatpush3.msra.mxu1 %v1255_v13  ;;  %4491 = vmatprep.mubr.msk.f32.mxu1 %vm5389_vm0, %v5388_v47  ;;  %v1862_v13 = vld [vmem:[#allocation13 + $0x10] sm:$0xff] }
 0x6f2   :  { %v1254_v54 = vmul.f32 %v5093_v14, %v5083_v55  ;;  %4494 = vmatprep.subr.mxu1 %v5388_v47  ;;  %v5095_v17 = vpop.eup %5094  ;;  %v1734_v55 = vld [vmem:[#allocation11 + $0x70] sm:$0xff]  ;;  %v1865_v14 = vld [vmem:[#allocation13 + $0x28] sm:$0xff]  ;;  %v4802_v15 = vpack.c.bf16 %v1862_v13, %v1860_v11 }
 0x6f3   :  { %v1169_v18 = vmul.f32 %v5095_v17, %v5081_v49  ;;  %v1732_v49 = vld [vmem:[#allocation11 + $0x60] sm:$0xff]  ;;  %4787 = vmatpush3.bf16.msra.mxu0 %v4784_v44  ;;  %v4814_v44 = vpack.c.bf16 %v1874_v42, %v1872_v39  ;;  %v2034_v13 = vld [vmem:[#allocation14 + $0x88] sm:$0xff]  ;;  %v2019_v39 = vld [vmem:[#allocation14 + $0x10] sm:$0xff] }
 0x6f4   :  { %4492 = vmatmul.mubr.msk.f32.vlgmr.msra.gmra.mrb[4].mxu1 %vm520_vm8, %v1254_v54  ;;  %4789 = vmatprep.subr.bf16.mxu0 %v4788_v48  ;;  %v4792_v53 = vpack.c.bf16 %v1733_v51, %v1732_v49  ;;  %v1867_v54 = vld [vmem:[#allocation13 + $0x38] sm:$0xff]  ;;  %v1864_v17 = vld [vmem:[#allocation13 + $0x20] sm:$0xff]  ;;  %v1878_v51 = vld [vmem:[#allocation13 + $0x90] sm:$0xff] }
 0x6f5   :  { %4495 = vmatpush3.msra.mxu1 %v1170_v16  ;;  %4496 = vmatprep.mubr.msk.f32.mxu1 %vm5389_vm0, %v5388_v47  ;;  %v5097_v21 = vpop.eup %5096  ;;  %v4804_v16 = vpack.c.bf16 %v1867_v54, %v1865_v14  ;;  %v1876_v49 = vld [vmem:[#allocation13 + $0x80] sm:$0xff]  ;;  %v2020_v42 = vld [vmem:[#allocation14 + $0x18] sm:$0xff] }
 0x6f6   :  { %4504 = vmatprep.subr.mxu1 %v5388_v47  ;;  %v1485_v22 = vmul.f32 %v5097_v21, %v5085_v58  ;;  %v4796_v58 = vpack.c.bf16 %v1735_v57, %v1734_v55  ;;  %v1881_v55 = vld [vmem:[#allocation13 + $0xa8] sm:$0xff]  ;;  %v1883_v57 = vld [vmem:[#allocation13 + $0xb8] sm:$0xff]  ;;  %v2017_v14 = vld [vmem:[#allocation14] sm:$0xff] }
 0x6f7   :  { %4791 = vmatpush3.bf16.msra.mxu0 %v4788_v48  ;;  %v4816_v48 = vpack.c.bf16 %v1879_v46, %v1877_v45  ;;  %v2038_v45 = vld [vmem:[#allocation14 + $0xa8] sm:$0xff] }
 0x6f8   :  { %4793 = vmatprep.subr.bf16.mxu0 %v4792_v53 }
 0x6f9   :  { %v5099_v26 = vpop.eup %5098 }
 0x6fa   :  { %v1644_v27 = vmul.f32 %v5099_v26, %v5087_v62 }
 0x6fb   :  { %4795 = vmatpush3.bf16.msra.mxu0 %v4792_v53  ;;  %v4818_v53 = vpack.c.bf16 %v1878_v51, %v1876_v49  ;;  %v2022_v49 = vld [vmem:[#allocation14 + $0x28] sm:$0xff] }
 0x6fc   :  { %4497 = vmatmul.mubr.msk.f32.vlgmr.msra.gmra.mrb[4].mxu1 %vm520_vm8, %v1169_v18  ;;  %4797 = vmatprep.subr.bf16.mxu0 %v4796_v58  ;;  %v1866_v18 = vld [vmem:[#allocation13 + $0x30] sm:$0xff] }
 0x6fd   :  { %4505 = vmatpush3.msra.mxu1 %v1486_v20  ;;  %4506 = vmatprep.mubr.msk.f32.mxu1 %vm5389_vm0, %v5388_v47  ;;  %v1871_v20 = vld [vmem:[#allocation13 + $0x58] sm:$0xff] }
 0x6fe   :  { %4514 = vmatprep.subr.mxu1 %v5388_v47  ;;  %v4808_v21 = vpack.c.bf16 %v1871_v20, %v1869_v19 }
 0x6ff   :  { %4799 = vmatpush3.bf16.msra.mxu0 %v4796_v58  ;;  %v4820_v58 = vpack.c.bf16 %v1883_v57, %v1881_v55  ;;  %v2040_v55 = vld [vmem:[#allocation14 + $0xb8] sm:$0xff] }
 0x704   :  { %4507 = vmatmul.mubr.msk.f32.vlgmr.msra.gmra.mrb[4].mxu1 %vm520_vm8, %v1485_v22  ;;  %v1870_v22 = vld [vmem:[#allocation13 + $0x50] sm:$0xff] }
 0x705   :  { %4515 = vmatpush3.msra.mxu1 %v1645_v23  ;;  %4516 = vmatprep.mubr.msk.f32.mxu1 %vm5389_vm0, %v5388_v47 }
 0x70c   :  { %4517 = vmatmul.mubr.msk.f32.vlgmr.msra.gmra.mrb[4].mxu1 %vm520_vm8, %v1644_v27 }
 0x70d   :  { %1968 = vmatprep.mubr.f32.mxu1 %v5388_v47 }
 0x7c3   :  { %v1077_v60 = vpop.f32.mrb[2].mxu1 }
 0x7c4   :  { %v5024_v62 = vadd.f32 %v1077_v60, %v5746_v43  ;;  %v4478_v63 = vpop.f32.mrb[3].mxu1  ;;  %v1861_v43 = vld [vmem:[#allocation13 + $0x8] sm:$0xff]  ;;  %v1880_v60 = vld [vmem:[#allocation13 + $0xa0] sm:$0xff] }
 0x7c5   :  { %v4800_v12 = vpack.c.bf16 %v1863_v10, %v1861_v43  ;;  %v1885_v63 = vld [vmem:[#allocation13 + $0xc8] sm:$0xff]  ;;  %v1888_v43 = vld [vmem:[#allocation13 + $0xe0] sm:$0xff]  ;;  %v1890_v10 = vld [vmem:[#allocation13 + $0xf0] sm:$0xff] }
 0x7c6   :  { %4551 = vmatprep.mubr.f32.mxu0 %v5024_v62  ;;  %v1882_v62 = vld [vmem:[#allocation13 + $0xb0] sm:$0xff]  ;;  %v4830_v11 = vpack.c.bf16 %v1890_v10, %v1888_v43  ;;  %v2028_v43 = vld [vmem:[#allocation14 + $0x58] sm:$0xff]  ;;  %v2045_v10 = vld [vmem:[#allocation14 + $0xe0] sm:$0xff] }
 0x7c7   :  { %4801 = vmatprep.subr.bf16.mxu1 %v4800_v12  ;;  %v2033_v12 = vld [vmem:[#allocation14 + $0x80] sm:$0xff] }
 0x7c8   :  { %4803 = vmatpush1.bf16.msra.mxu1 %v4802_v15  ;;  %v4832_v54 = vpack.c.bf16 %v2034_v13, %v2033_v12  ;;  %v2018_v15 = vld [vmem:[#allocation14 + $0x8] sm:$0xff] }
 0x7c9   :  { %4805 = vmatprep.subr.bf16.mxu1 %v4804_v16  ;;  %v4834_v16 = vpack.c.bf16 %v2018_v15, %v2017_v14  ;;  %v2029_v14 = vld [vmem:[#allocation14 + $0x60] sm:$0xff]  ;;  %v2047_v15 = vld [vmem:[#allocation14 + $0xf0] sm:$0xff] }
 0x7ca   :  { %4833 = vmatprep.subr.bf16.mxu0 %v4832_v54  ;;  %v2030_v54 = vld [vmem:[#allocation14 + $0x68] sm:$0xff] }
 0x7df   :  { %v1715_v0 = vpop.f32.mrb[4].mxu1 }
 0x7e0   :  { %v4518_v3 = vpop.f32.mrb[5].mxu1  ;;  %4552 = vmatmul.mubr.f32.vlgmr.msra.gmra.mrb[22].mxu0 %v1715_v0  ;;  %v4822_v0 = vpack.c.bf16 %v1882_v62, %v1880_v60  ;;  %v2024_v60 = vld [vmem:[#allocation14 + $0x38] sm:$0xff] }
 0x7e1   :  { %v1887_v3 = vld [vmem:[#allocation13 + $0xd8] sm:$0xff]  ;;  %4835 = vmatpush3.bf16.msra.mxu0 %v4834_v16 }
 0x7e2   :  { %v2048_v16 = vld [vmem:[#allocation14 + $0xf8] sm:$0xff] }
 0x8b3   :  { %v4553_v5 = vpop.f32.mrb[22].mxu0 }
 0x8b4   :  { %v1809_v6 = vpop.f32.mrb[23].mxu0  ;;  %v1815_v8 = vadd.f32 %v4553_v5, %v4164_v4  ;;  %v1886_v5 = vld [vmem:[#allocation13 + $0xd0] sm:$0xff] }
 0x8b5   :  { %v1810_v7 = vadd.f32 %v4164_v4, %v1809_v6  ;;  %v1884_v4 = vld [vmem:[#allocation13 + $0xc0] sm:$0xff]  ;;  %v4824_v6 = vpack.c.bf16 %v1887_v3, %v1885_v63 }
 0x8b6   :  { %v1819_v9 = vadd.f32 %v1815_v8, %v5615_v36  ;;  %v1868_v36 = vld [vmem:[#allocation13 + $0x40] sm:$0xff]  ;;  %v1891_v8 = vld [vmem:[#allocation13 + $0xf8] sm:$0xff] }
 0x8b7   :  { %v1818_v1 = vadd.f32 %v1810_v7, %v5613_v35  ;;  %v4806_v35 = vpack.c.bf16 %v1866_v18, %v1864_v17  ;;  %v4810_v23 = vpack.c.bf16 %v1870_v22, %v1868_v36  ;;  %v1889_v7 = vld [vmem:[#allocation13 + $0xe8] sm:$0xff]  ;;  %v2041_v63 = vld [vmem:[#allocation14 + $0xc0] sm:$0xff] }
 0x8b8   :  { %v4165_v22 = vld [vmem:[%s6085_s8] ss:$0 sm:$0xff]  ;;  %v2025_v3 = vld [vmem:[#allocation14 + $0x40] sm:$0xff] }
 0x8b9   :  { %1822 = vadd.xlane.f32.xlu0 %v1818_v1  ;;  %4807 = vmatpush1.bf16.msra.mxu1 %v4806_v35 }
 0x8ba   :  { %4809 = vmatprep.subr.bf16.mxu1 %v4808_v21 }
 0x8bd   :  { %1824 = vadd.xlane.f32.xlu0 %v1819_v9  ;;  %4811 = vmatpush1.bf16.msra.mxu1 %v4810_v23 }
 0x8be   :  { %4813 = vmatprep.subr.bf16.mxu1 %v4812_v38 }
 0x8c1   :  { %4815 = vmatpush1.bf16.msra.mxu1 %v4814_v44  ;;  %v4838_v44 = vpack.c.bf16 %v2020_v42, %v2019_v39 }
 0x8c2   :  { %4817 = vmatprep.subr.bf16.mxu1 %v4816_v48  ;;  %v2021_v48 = vld [vmem:[#allocation14 + $0x20] sm:$0xff] }
 0x8c3   :  { %v4842_v51 = vpack.c.bf16 %v2022_v49, %v2021_v48 }
 0x8c5   :  { %4819 = vmatpush1.bf16.msra.mxu1 %v4818_v53  ;;  %v2039_v53 = vld [vmem:[#allocation14 + $0xb0] sm:$0xff] }
 0x8c6   :  { %4821 = vmatprep.subr.bf16.mxu1 %v4820_v58  ;;  %v4844_v57 = vpack.c.bf16 %v2040_v55, %v2039_v53  ;;  %v2023_v58 = vld [vmem:[#allocation14 + $0x30] sm:$0xff] }
 0x8c7   :  { %v4846_v62 = vpack.c.bf16 %v2024_v60, %v2023_v58 }
 0x8c9   :  { %4823 = vmatpush1.bf16.msra.mxu1 %v4822_v0  ;;  %v2042_v0 = vld [vmem:[#allocation14 + $0xc8] sm:$0xff] }
 0x8ca   :  { %4825 = vmatprep.subr.bf16.mxu1 %v4824_v6  ;;  %v2043_v6 = vld [vmem:[#allocation14 + $0xd0] sm:$0xff] }
 0x946   :  { %v1823_v26 = vpop.xlane.xlu0 %1822 }
 0x947   :  { %v1826_v27 = vmul.f32 0.0078125, %v1823_v26  ;;  %v4166_v26 = vld [vmem:[%s6086_s9] ss:$0 sm:$0xff] }
 0x949   :  { %v5807_v28 = vsub.f32 %v1818_v1, %v1826_v27  ;;  %v4826_v1 = vpack.c.bf16 %v1886_v5, %v1884_v4  ;;  %v4848_v4 = vpack.c.bf16 %v2042_v0, %v2041_v63  ;;  %v2026_v5 = vld [vmem:[#allocation14 + $0x48] sm:$0xff] }
 0x94a   :  { %v1825_v29 = vpop.xlane.xlu0 %1824 }
 0x94b   :  { %v1827_v30 = vmul.f32 0.0078125, %v1825_v29  ;;  %v1830_v31 = vmul.f32 %v5807_v28, %v5807_v28  ;;  %4827 = vmatpush1.bf16.msra.mxu1 %v4826_v1 }
 0x94d   :  { %v5811_v32 = vsub.f32 %v1819_v9, %v1827_v30  ;;  %1832 = vadd.xlane.f32.xlu1 %v1830_v31  ;;  %v4828_v9 = vpack.c.bf16 %v1891_v8, %v1889_v7  ;;  %v2044_v7 = vld [vmem:[#allocation14 + $0xd8] sm:$0xff]  ;;  %v4850_v8 = vpack.c.bf16 %v2026_v5, %v2025_v3 }
 0x94e   :  { %v4852_v1 = vpack.c.bf16 %v2044_v7, %v2043_v6 }
 0x94f   :  { %v1831_v52 = vmul.f32 %v5811_v32, %v5811_v32  ;;  %4829 = vmatprep.subr.bf16.mxu1 %v4828_v9  ;;  %v2027_v9 = vld [vmem:[#allocation14 + $0x50] sm:$0xff] }
 0x950   :  { %4831 = vmatpush1.bf16.msra.mxu1 %v4830_v11  ;;  %v2046_v11 = vld [vmem:[#allocation14 + $0xe8] sm:$0xff]  ;;  %v4854_v12 = vpack.c.bf16 %v2028_v43, %v2027_v9 }
 0x951   :  { %1834 = vadd.xlane.f32.xlu1 %v1831_v52  ;;  %v4856_v13 = vpack.c.bf16 %v2046_v11, %v2045_v10 }
 0x9da   :  { %v1833_v17 = vpop.xlane.xlu1 %1832 }
 0x9db   :  { %v1836_v18 = vmul.f32 0.0078125, %v1833_v17  ;;  %v4858_v17 = vpack.c.bf16 %v2030_v54, %v2029_v14 }
 0x9dd   :  { %v1838_v19 = vadd.f32 1e-12, %v1836_v18  ;;  %v4860_v18 = vpack.c.bf16 %v2048_v16, %v2047_v15 }
 0x9de   :  { %v1835_v20 = vpop.xlane.xlu1 %1834 }
 0x9df   :  { %5100 = vrsqrt.f32 %v1838_v19  ;;  %v1837_v35 = vmul.f32 0.0078125, %v1835_v20  ;;  %v2031_v19 = vld [vmem:[#allocation14 + $0x70] sm:$0xff]  ;;  %v2032_v20 = vld [vmem:[#allocation14 + $0x78] sm:$0xff] }
 0x9e1   :  { %v1839_v21 = vadd.f32 1e-12, %v1837_v35  ;;  %v4862_v35 = vpack.c.bf16 %v2032_v20, %v2031_v19  ;;  %v4167_v19 = vld [vmem:[%s6090_s13] ss:$0 sm:$0xff] }
 0x9e3   :  { %5102 = vrsqrt.f32 %v1839_v21  ;;  %v1892_v21 = vld [vmem:[%s6088_s11] sm:$0x3] }
 0x9e9   :  { %v5101_v36 = vpop.eup %5100 }
 0x9ea   :  { %v1842_v23 = vmul.f32 %v5101_v36, %v5807_v28  ;;  %v2035_v28 = vld [vmem:[#allocation14 + $0x90] sm:$0xff]  ;;  %v1897_v36 = vrot.slane %v1892_v21, %v5629_v37 }
 0x9eb   :  { %v4836_v38 = vpack.c.bf16 %v2036_v24, %v2035_v28 }
 0x9ec   :  { %v1850_v27 = vmul.f32 %v4165_v22, %v1842_v23 }
 0x9ed   :  { %v5103_v29 = vpop.eup %5102  ;;  %4837 = vmatprep.subr.bf16.mxu0 %v4836_v38 }
 0x9ee   :  { %v5822_v30 = vadd.f32 %v4166_v26, %v1850_v27  ;;  %v1843_v31 = vmul.f32 %v5103_v29, %v5811_v32  ;;  %4839 = vmatpush3.bf16.msra.mxu0 %v4838_v44  ;;  %v2037_v32 = vld [vmem:[#allocation14 + $0xa0] sm:$0xff] }
 0x9ef   :  { %v4840_v46 = vpack.c.bf16 %v2038_v45, %v2037_v32 }
 0x9f0   :  { %1969 = vmatmul.mubr.f32.vlgmr.msra.gmra.mrb[6].mxu1 %v5822_v30  ;;  %v1851_v52 = vmul.f32 %v4165_v22, %v1843_v31  ;;  %v1901_v22 = vrot.slane %v1892_v21, %v5637_v40 }
 0x9f1   :  { %1974 = vmatprep.mubr.f32.mxu1 %v5388_v47  ;;  %4841 = vmatprep.subr.bf16.mxu0 %v4840_v46 }
 0x9f2   :  { %v5827_v34 = vadd.f32 %v4166_v26, %v1851_v52  ;;  %4843 = vmatpush3.bf16.msra.mxu0 %v4842_v51 }
 0x9f3   :  { %4845 = vmatprep.subr.bf16.mxu0 %v4844_v57 }
 0x9f4   :  { %1975 = vmatmul.mubr.f32.gmra.mrb[8].mxu1 %v5827_v34 }
 0x9f5   :  { %2304 = vmatprep.mubr.f32.mxu1 %v5388_v47 }
 0x9f6   :  { %4847 = vmatpush3.bf16.msra.mxu0 %v4846_v62 }
 0x9f7   :  { %4849 = vmatprep.subr.bf16.mxu0 %v4848_v4 }
 0x9fa   :  { %4851 = vmatpush3.bf16.msra.mxu0 %v4850_v8 }
 0x9fb   :  { %4853 = vmatprep.subr.bf16.mxu0 %v4852_v1 }
 0x9fe   :  { %4855 = vmatpush3.bf16.msra.mxu0 %v4854_v12 }
 0x9ff   :  { %4857 = vmatprep.subr.bf16.mxu0 %v4856_v13 }
 0xa02   :  { %4859 = vmatpush3.bf16.msra.mxu0 %v4858_v17 }
 0xa03   :  { %4861 = vmatprep.subr.bf16.mxu0 %v4860_v18 }
 0xa06   :  { %4863 = vmatpush3.bf16.msra.mxu0 %v4862_v35 }
 0xac3   :  { %v1970_v23 = vpop.f32.mrb[6].mxu1 }
 0xac4   :  { %v1971_v26 = vadd.f32 %v1970_v23, %v1897_v36  ;;  %v1972_v27 = vpop.f32.mrb[7].mxu1 }
 0xac5   :  { %v1973_v29 = vadd.f32 %v1972_v27, %v1901_v22 }
 0xac6   :  { %v1985_v31 = vmul.f32 0.044715, %v1971_v26  ;;  %v1981_v9 = vmul.f32 0.5, %v1971_v26 }
 0xac7   :  { %v1986_v52 = vmul.f32 0.044715, %v1973_v29  ;;  %v1976_v28 = vpop.f32.mrb[8].mxu1  ;;  %v1982_v8 = vmul.f32 0.5, %v1973_v29 }
 0xac8   :  { %v1989_v24 = vmul.f32 %v1985_v31, %v1971_v26  ;;  %v1977_v38 = vadd.f32 %v1976_v28, %v1897_v36  ;;  %v1978_v39 = vpop.f32.mrb[9].mxu1  ;;  %v2175_v31 = vld [vmem:[#allocation10 + $0x188] sm:$0xff]  ;;  %v2174_v28 = vld [vmem:[#allocation10 + $0x180] sm:$0xff] }
 0xac9   :  { %v1990_v42 = vmul.f32 %v1986_v52, %v1973_v29  ;;  %v1979_v44 = vadd.f32 %v1978_v39, %v1901_v22  ;;  %v2178_v52 = vld [vmem:[#allocation10 + $0x1a0] sm:$0xff]  ;;  %v2181_v39 = vld [vmem:[#allocation10 + $0x1b8] sm:$0xff] }
 0xaca   :  { %v1993_v32 = vmul.f32 %v1989_v24, %v1971_v26  ;;  %v1987_v45 = vmul.f32 0.044715, %v1977_v38  ;;  %v1983_v15 = vmul.f32 0.5, %v1977_v38  ;;  %v4864_v24 = vpack.c.bf16 %v2178_v52, %v2175_v31  ;;  %v2203_v52 = vld [vmem:[#allocation10 + $0x268] sm:$0xff] }
 0xacb   :  { %v1988_v46 = vmul.f32 0.044715, %v1979_v44  ;;  %v1994_v48 = vmul.f32 %v1990_v42, %v1973_v29  ;;  %v1984_v14 = vmul.f32 0.5, %v1979_v44  ;;  %v2184_v42 = vld [vmem:[#allocation10 + $0x1d0] sm:$0xff] }
 0xacc   :  { %v1997_v49 = vadd.f32 %v1993_v32, %v1971_v26  ;;  %v1991_v51 = vmul.f32 %v1987_v45, %v1977_v38  ;;  %v4868_v32 = vpack.c.bf16 %v2184_v42, %v2181_v39  ;;  %v2176_v45 = vld [vmem:[#allocation10 + $0x190] sm:$0xff]  ;;  %4865 = vmatprep.subr.bf16.mxu1 %v4864_v24  ;;  %v2207_v24 = vld [vmem:[#allocation10 + $0x288] sm:$0xff] }
 0xacd   :  { %v1992_v53 = vmul.f32 %v1988_v46, %v1979_v44  ;;  %v1998_v55 = vadd.f32 %v1994_v48, %v1973_v29  ;;  %v2179_v46 = vld [vmem:[#allocation10 + $0x1a8] sm:$0xff]  ;;  %v2180_v48 = vld [vmem:[#allocation10 + $0x1b0] sm:$0xff] }
 0xace   :  { %v2001_v57 = vmul.f32 0.7978846, %v1997_v49  ;;  %v1995_v58 = vmul.f32 %v1991_v51, %v1977_v38  ;;  %v4896_v49 = vpack.c.bf16 %v2179_v46, %v2176_v45  ;;  %v2187_v51 = vld [vmem:[#allocation10 + $0x1e8] sm:$0xff]  ;;  %v2209_v46 = vld [vmem:[#allocation10 + $0x298] sm:$0xff] }
 0xacf   :  { %v2002_v60 = vmul.f32 0.7978846, %v1998_v55  ;;  %v1996_v62 = vmul.f32 %v1992_v53, %v1979_v44  ;;  %v2190_v53 = vld [vmem:[#allocation10 + $0x200] sm:$0xff]  ;;  %v2211_v42 = vld [vmem:[#allocation10 + $0x2a8] sm:$0xff] }
 0xad0   :  { %5104 = vtanh.f32 %v2001_v57  ;;  %v1999_v63 = vadd.f32 %v1995_v58, %v1977_v38  ;;  %v2177_v38 = vld [vmem:[#allocation10 + $0x198] sm:$0xff]  ;;  %v2182_v55 = vld [vmem:[#allocation10 + $0x1c0] sm:$0xff]  ;;  %4897 = vmatprep.subr.bf16.mxu0 %v4896_v49  ;;  %v4872_v58 = vpack.c.bf16 %v2190_v53, %v2187_v51 }
 0xad1   :  { %5106 = vtanh.f32 %v2002_v60  ;;  %v2000_v0 = vadd.f32 %v1996_v62, %v1979_v44  ;;  %v4866_v44 = vpack.c.bf16 %v2177_v38, %v2174_v28  ;;  %v2185_v57 = vld [vmem:[#allocation10 + $0x1d8] sm:$0xff]  ;;  %v2186_v62 = vld [vmem:[#allocation10 + $0x1e0] sm:$0xff]  ;;  %v2204_v28 = vld [vmem:[#allocation10 + $0x270] sm:$0xff] }
 0xad2   :  { %v2003_v3 = vmul.f32 0.7978846, %v1999_v63  ;;  %v4900_v60 = vpack.c.bf16 %v2185_v57, %v2182_v55  ;;  %v2189_v63 = vld [vmem:[#allocation10 + $0x1f8] sm:$0xff]  ;;  %v4886_v39 = vpack.c.bf16 %v2207_v24, %v2204_v28  ;;  %v2212_v55 = vld [vmem:[#allocation10 + $0x2b0] sm:$0xff] }
 0xad3   :  { %v2004_v4 = vmul.f32 0.7978846, %v2000_v0  ;;  %4867 = vmatpush1.bf16.msra.mxu1 %v4866_v44  ;;  %v4874_v0 = vpack.c.bf16 %v2189_v63, %v2186_v62  ;;  %v2214_v44 = vld [vmem:[#allocation10 + $0x2c0] sm:$0xff]  ;;  %v2217_v53 = vld [vmem:[#allocation10 + $0x2d8] sm:$0xff]  ;;  %v2219_v62 = vld [vmem:[#allocation10 + $0x2e8] sm:$0xff] }
 0xad4   :  { %5108 = vtanh.f32 %v2003_v3  ;;  %4869 = vmatprep.subr.bf16.mxu1 %v4868_v32  ;;  %v2206_v32 = vld [vmem:[#allocation10 + $0x280] sm:$0xff]  ;;  %v4888_v45 = vpack.c.bf16 %v2214_v44, %v2211_v42 }
 0xad5   :  { %5110 = vtanh.f32 %v2004_v4 }
 0xada   :  { %v5105_v5 = vpop.eup %5104 }
 0xadb   :  { %v5107_v6 = vpop.eup %5106  ;;  %v2009_v7 = vadd.f32 1.0, %v5105_v5 }
 0xadc   :  { %v2010_v1 = vadd.f32 1.0, %v5107_v6 }
 0xadd   :  { %v2013_v12 = vmul.f32 %v2009_v7, %v1981_v9 }
 0xade   :  { %v5109_v43 = vpop.eup %5108  ;;  %v2014_v10 = vmul.f32 %v2010_v1, %v1982_v8 }
 0xadf   :  { %v5111_v11 = vpop.eup %5110  ;;  %v2011_v13 = vadd.f32 1.0, %v5109_v43  ;;  %v2193_v43 = vld [vmem:[#allocation10 + $0x218] sm:$0xff] }
 0xae0   :  { %2120 = vmatprep.mubr.f32.mxu0 %v2014_v10  ;;  %v2012_v54 = vadd.f32 1.0, %v5111_v11  ;;  %v2196_v10 = vld [vmem:[#allocation10 + $0x230] sm:$0xff] }
 0xae1   :  { %2121 = vmatmul.mubr.f32.vlgmr.msra.gmra.mrb[24].mxu0 %v2013_v12  ;;  %v2015_v17 = vmul.f32 %v2011_v13, %v1983_v15  ;;  %v2188_v11 = vld [vmem:[#allocation10 + $0x1f0] sm:$0xff]  ;;  %v4876_v12 = vpack.c.bf16 %v2196_v10, %v2193_v43  ;;  %v2191_v13 = vld [vmem:[#allocation10 + $0x208] sm:$0xff] }
 0xae2   :  { %v2016_v16 = vmul.f32 %v2012_v54, %v1984_v14  ;;  %4899 = vmatpush3.bf16.msra.mxu0 %v4896_v49  ;;  %v2192_v14 = vld [vmem:[#allocation10 + $0x210] sm:$0xff]  ;;  %v2195_v54 = vld [vmem:[#allocation10 + $0x228] sm:$0xff]  ;;  %v4904_v15 = vpack.c.bf16 %v2191_v13, %v2188_v11  ;;  %v2213_v49 = vld [vmem:[#allocation10 + $0x2b8] sm:$0xff] }
 0xae3   :  { %4901 = vmatprep.subr.bf16.mxu0 %v4900_v60  ;;  %v4168_v13 = vld [vmem:[%s6091_s14] ss:$0 sm:$0xff] }
 0xae4   :  { %2125 = vmatprep.mubr.f32.mxu0 %v2016_v16  ;;  %v4878_v16 = vpack.c.bf16 %v2195_v54, %v2192_v14  ;;  %v4169_v54 = vld [vmem:[%s6092_s15] ss:$0 sm:$0xff] }
 0xae5   :  { %2126 = vmatmul.mubr.f32.gmra.mrb[26].mxu0 %v2015_v17  ;;  %v2199_v17 = vld [vmem:[#allocation10 + $0x248] sm:$0xff] }
 0xae6   :  { %4903 = vmatpush3.bf16.msra.mxu0 %v4900_v60  ;;  %v2216_v60 = vld [vmem:[#allocation10 + $0x2d0] sm:$0xff] }
 0xae7   :  { %4905 = vmatprep.subr.bf16.mxu0 %v4904_v15 }
 0xaea   :  { %4907 = vmatpush3.bf16.msra.mxu0 %v4904_v15 }
 0xbb4   :  { %v4292_v18 = vpop.f32.mrb[24].mxu0 }
 0xbb5   :  { %v4293_v20 = vpop.f32.mrb[25].mxu0 }
 0xbb6   :  { %v4294_v35 = vadd.f32 %v4293_v20, %v4292_v18  ;;  %v2202_v18 = vld [vmem:[#allocation10 + $0x260] sm:$0xff] }
 0xbb7   :  { %v4880_v20 = vpack.c.bf16 %v2202_v18, %v2199_v17 }
 0xbb8   :  { %v2123_v21 = vadd.f32 %v4294_v35, %v4167_v19  ;;  %v4295_v36 = vpop.f32.mrb[26].mxu0  ;;  %v2197_v35 = vld [vmem:[#allocation10 + $0x238] sm:$0xff] }
 0xbb9   :  { %v4296_v22 = vpop.f32.mrb[27].mxu0 }
 0xbba   :  { %v4297_v23 = vadd.f32 %v4296_v22, %v4295_v36  ;;  %v2131_v26 = vadd.f32 %v2123_v21, %v5822_v30  ;;  %v2183_v30 = vld [vmem:[#allocation10 + $0x1c8] sm:$0xff]  ;;  %v2198_v21 = vld [vmem:[#allocation10 + $0x240] sm:$0xff]  ;;  %v2201_v36 = vld [vmem:[#allocation10 + $0x258] sm:$0xff] }
 0xbbc   :  { %v2128_v27 = vadd.f32 %v4297_v23, %v4167_v19  ;;  %2135 = vadd.xlane.f32.xlu0 %v2131_v26  ;;  %v2194_v19 = vld [vmem:[#allocation10 + $0x220] sm:$0xff]  ;;  %v4882_v23 = vpack.c.bf16 %v2201_v36, %v2198_v21 }
 0xbbd   :  { %v4908_v22 = vpack.c.bf16 %v2197_v35, %v2194_v19 }
 0xbbe   :  { %v2132_v29 = vadd.f32 %v2128_v27, %v5827_v34  ;;  %v4870_v34 = vpack.c.bf16 %v2183_v30, %v2180_v48  ;;  %v2208_v27 = vld [vmem:[#allocation10 + $0x290] sm:$0xff]  ;;  %v2210_v48 = vld [vmem:[#allocation10 + $0x2a0] sm:$0xff]  ;;  %v4916_v30 = vpack.c.bf16 %v2209_v46, %v2206_v32 }
 0xbbf   :  { %4909 = vmatprep.subr.bf16.mxu0 %v4908_v22  ;;  %v4890_v51 = vpack.c.bf16 %v2213_v49, %v2210_v48 }
 0xbc0   :  { %2137 = vadd.xlane.f32.xlu0 %v2132_v29  ;;  %4871 = vmatpush1.bf16.msra.mxu1 %v4870_v34  ;;  %v2220_v34 = vld [vmem:[#allocation10 + $0x2f0] sm:$0xff] }
 0xbc1   :  { %4873 = vmatprep.subr.bf16.mxu1 %v4872_v58  ;;  %4911 = vmatpush3.bf16.msra.mxu0 %v4908_v22  ;;  %v4892_v57 = vpack.c.bf16 %v2220_v34, %v2217_v53  ;;  %v2215_v58 = vld [vmem:[#allocation10 + $0x2c8] sm:$0xff] }
 0xbc2   :  { %v4920_v63 = vpack.c.bf16 %v2215_v58, %v2212_v55 }
 0xbc4   :  { %4875 = vmatpush1.bf16.msra.mxu1 %v4874_v0  ;;  %v4894_v0 = vpack.c.bf16 %v2219_v62, %v2216_v60 }
 0xbc5   :  { %4877 = vmatprep.subr.bf16.mxu1 %v4876_v12 }
 0xbc8   :  { %4879 = vmatpush1.bf16.msra.mxu1 %v4878_v16 }
 0xbc9   :  { %4881 = vmatprep.subr.bf16.mxu1 %v4880_v20 }
 0xbcc   :  { %4883 = vmatpush1.bf16.msra.mxu1 %v4882_v23 }
 0xc49   :  { %v2136_v3 = vpop.xlane.xlu0 %2135 }
 0xc4a   :  { %v2139_v4 = vmul.f32 0.0078125, %v2136_v3  ;;  %v2218_v3 = vld [vmem:[#allocation10 + $0x2e0] sm:$0xff] }
 0xc4c   :  { %v5841_v5 = vsub.f32 %v2131_v26, %v2139_v4  ;;  %v2205_v26 = vld [vmem:[#allocation10 + $0x278] sm:$0xff] }
 0xc4d   :  { %v2138_v6 = vpop.xlane.xlu0 %2137  ;;  %v4884_v31 = vpack.c.bf16 %v2208_v27, %v2205_v26  ;;  %v2221_v4 = vld [vmem:[#allocation10 + $0x2f8] sm:$0xff] }
 0xc4e   :  { %v2140_v7 = vmul.f32 0.0078125, %v2138_v6  ;;  %v2143_v8 = vmul.f32 %v5841_v5, %v5841_v5  ;;  %v4924_v6 = vpack.c.bf16 %v2221_v4, %v2218_v3 }
 0xc4f   :  { %4885 = vmatprep.subr.bf16.mxu1 %v4884_v31 }
 0xc50   :  { %v5845_v1 = vsub.f32 %v2132_v29, %v2140_v7  ;;  %2145 = vadd.xlane.f32.xlu1 %v2143_v8  ;;  %v2200_v29 = vld [vmem:[#allocation10 + $0x250] sm:$0xff]  ;;  %4887 = vmatpush1.bf16.msra.mxu1 %v4886_v39 }
 0xc51   :  { %v4912_v38 = vpack.c.bf16 %v2203_v52, %v2200_v29  ;;  %4889 = vmatprep.subr.bf16.mxu1 %v4888_v45 }
 0xc52   :  { %v2144_v9 = vmul.f32 %v5845_v1, %v5845_v1 }
 0xc53   :  { %4913 = vmatprep.subr.bf16.mxu0 %v4912_v38 }
 0xc54   :  { %2147 = vadd.xlane.f32.xlu1 %v2144_v9  ;;  %4915 = vmatpush3.bf16.msra.mxu0 %v4912_v38 }
 0xc55   :  { %4917 = vmatprep.subr.bf16.mxu0 %v4916_v30  ;;  %4891 = vmatpush1.bf16.msra.mxu1 %v4890_v51 }
 0xc56   :  { %4893 = vmatprep.subr.bf16.mxu1 %v4892_v57 }
 0xc58   :  { %4919 = vmatpush3.bf16.msra.mxu0 %v4916_v30 }
 0xc59   :  { %4921 = vmatprep.subr.bf16.mxu0 %v4920_v63  ;;  %4895 = vmatpush1.bf16.msra.mxu1 %v4894_v0 }
 0xc5a   :  { %4589 = vmatprep.subr.mxu1 %v5388_v47 }
 0xc5c   :  { %4923 = vmatpush3.bf16.msra.mxu0 %v4920_v63 }
 0xc5d   :  { %4925 = vmatprep.subr.bf16.mxu0 %v4924_v6 }
 0xc60   :  { %4927 = vmatpush3.bf16.msra.mxu0 %v4924_v6 }
 0xc61   :  { %4619 = vmatprep.subr.mxu0 %v5388_v47 }
 0xcdd   :  { %v2146_v7 = vpop.xlane.xlu1 %2145 }
 0xcde   :  { %v2149_v8 = vmul.f32 0.0078125, %v2146_v7 }
 0xce0   :  { %v2151_v9 = vadd.f32 1e-12, %v2149_v8 }
 0xce1   :  { %v2148_v43 = vpop.xlane.xlu1 %2147 }
 0xce2   :  { %5112 = vrsqrt.f32 %v2151_v9  ;;  %v2150_v10 = vmul.f32 0.0078125, %v2148_v43 }
 0xce4   :  { %v2152_v11 = vadd.f32 1e-12, %v2150_v10 }
 0xce6   :  { %5114 = vrsqrt.f32 %v2152_v11 }
 0xcec   :  { %v5113_v12 = vpop.eup %5112 }
 0xced   :  { %v2155_v14 = vmul.f32 %v5113_v12, %v5841_v5  ;;  %v4170_v5 = vld [vmem:[%s6082_s5 + $0x3] sm:$0x7] }
 0xcee   :  { %v2232_v35 = vrot.slane %v4170_v5, %v5637_v40  ;;  %v2236_v26 = vrot.slane %v4170_v5, %v286_v41 }
 0xcef   :  { %v2163_v15 = vmul.f32 %v4168_v13, %v2155_v14 }
 0xcf0   :  { %v5115_v16 = vpop.eup %5114 }
 0xcf1   :  { %v5858_v17 = vadd.f32 %v4169_v54, %v2163_v15  ;;  %v2156_v18 = vmul.f32 %v5115_v16, %v5845_v1  ;;  %v2228_v1 = vrot.slane %v4170_v5, %v5629_v37 }
 0xcf3   :  { %2305 = vmatmul.mubr.f32.vlgmr.msra.gmra.mrb[10].mxu1 %v5858_v17  ;;  %4586 = vmatprep.mubr.f32.mxu0 %v5858_v17  ;;  %v2164_v19 = vmul.f32 %v4168_v13, %v2156_v18 }
 0xcf4   :  { %2310 = vmatprep.mubr.f32.mxu1 %v5388_v47 }
 0xcf5   :  { %v5864_v20 = vadd.f32 %v4169_v54, %v2164_v19 }
 0xcf7   :  { %2311 = vmatmul.mubr.f32.gmra.mrb[12].mxu1 %v5864_v20  ;;  %4587 = vmatmul.mubr.f32.vlgmr.msra.gmra.mrb[28].mxu0 %v5864_v20 }
 0xcf8   :  { %4591 = vmatprep.mubr.msk.f32.mxu1 %vm5389_vm0, %v5388_v47  ;;  %4621 = vmatprep.mubr.msk.f32.mxu0 %vm5389_vm0, %v5388_v47 }
 0xdc6   :  { %v2306_v21 = vpop.f32.mrb[10].mxu1 }
 0xdc7   :  { %v5877_v36 = vadd.f32 %v2306_v21, %v2228_v1  ;;  %v2308_v22 = vpop.f32.mrb[11].mxu1 }
 0xdc8   :  { %v5879_v23 = vadd.f32 %v2308_v22, %v2232_v35 }
 0xdc9   :  { %v2392_v31 = vmul.f32 %v5652_v50, %v5877_v36  ;;  %v2867_v38 = vmul.f32 %v5715_v33, %v5877_v36  ;;  %v2477_v42 = vmul.f32 %v5672_v61, %v5877_v36 }
 0xdca   :  { %v2312_v27 = vpop.f32.mrb[12].mxu1  ;;  %v4588_v29 = vpop.f32.mrb[28].mxu0  ;;  %4590 = vmatpush3.xpose.msra.mxu1 %v5879_v23  ;;  %4620 = vmatpush3.xpose.msra.mxu0 %v5879_v23 }
 0xdcb   :  { %v5887_v52 = vadd.f32 %v2312_v27, %v2228_v1  ;;  %v2314_v28 = vpop.f32.mrb[13].mxu1  ;;  %v2383_v24 = vpop.f32.mrb[29].mxu0  ;;  %4594 = vmatprep.subr.mxu1 %v5388_v47  ;;  %4629 = vmatprep.subr.mxu0 %v5388_v47  ;;  %v5893_v25 = vadd.f32 %v4588_v29, %v2236_v26 }
 0xdcc   :  { %v5895_v41 = vadd.f32 %v2314_v28, %v2232_v35  ;;  %v5897_v39 = vadd.f32 %v2383_v24, %v2236_v26 }
 0xdcd   :  { %4592 = vmatmul.mubr.f32.vlgmr.msra.gmra.mrb[14].mxu1 %v2392_v31  ;;  %4622 = vmatmul.mubr.f32.vlgmr.msra.gmra.mrb[30].mxu0 %v2867_v38  ;;  %v3026_v44 = vmul.f32 %v5652_v50, %v5887_v52  ;;  %v3195_v45 = vmul.f32 %v5672_v61, %v5893_v25  ;;  %v2708_v38 = vmul.f32 %v5662_v56, %v5877_v36 }
 0xdce   :  { %4595 = vmatpush3.xpose.msra.mxu1 %v5879_v23  ;;  %4630 = vmatpush3.xpose.msra.mxu0 %v5895_v41  ;;  %v2561_v32 = vmul.f32 %v5672_v61, %v5897_v39  ;;  %v2476_v22 = vmul.f32 %v5652_v50, %v5897_v39 }
 0xdcf   :  { %4596 = vmatprep.mubr.msk.f32.mxu1 %vm5389_vm0, %v5388_v47  ;;  %4631 = vmatprep.mubr.msk.f32.mxu0 %vm5389_vm0, %v5388_v47 }
 0xdd0   :  { %4599 = vmatprep.subr.mxu1 %v5388_v47  ;;  %4639 = vmatprep.subr.mxu0 %v5388_v47 }
 0xdd1   :  { %4597 = vmatmul.mubr.f32.vlgmr.msra.gmra.mrb[16].mxu1 %v2477_v42  ;;  %4632 = vmatmul.mubr.f32.vlgmr.msra.gmra.mrb[32].mxu0 %v3026_v44  ;;  %v2792_v42 = vmul.f32 %v5662_v56, %v5897_v39 }
 0xdd2   :  { %4600 = vmatpush3.msra.mxu1 %v2561_v32  ;;  %4640 = vmatpush3.msra.mxu0 %v3195_v45 }
 0xdd3   :  { %4601 = vmatprep.mubr.msk.f32.mxu1 %vm5389_vm0, %v5388_v47  ;;  %4604 = vmatprep.subr.mxu1 %v5388_v47 }
 0xdd4   :  { %4641 = vmatprep.mubr.msk.f32.mxu0 %vm5389_vm0, %v5388_v47  ;;  %4644 = vmatprep.subr.mxu0 %v5388_v47 }
 0xea0   :  { %v2459_v46 = vpop.f32.mrb[14].mxu1  ;;  %v2934_v48 = vpop.f32.mrb[30].mxu0 }
 0xea1   :  { %v2463_v49 = vmul.f32 0.17677669, %v2459_v46  ;;  %v4593_v30 = vpop.f32.mrb[15].mxu1  ;;  %v4623_v51 = vpop.f32.mrb[31].mxu0  ;;  %v2938_v43 = vmul.f32 0.17677669, %v2934_v48 }
 0xea3   :  { %v2464_v53 = vadd.f32 %v2463_v49, %v5692_v2  ;;  %v2939_v12 = vadd.f32 %v2938_v43, %v5692_v2 }
 0xea4   :  { %v2544_v34 = vpop.f32.mrb[16].mxu1  ;;  %v3093_v55 = vpop.f32.mrb[32].mxu0 }
 0xea5   :  { %v2548_v57 = vmul.f32 0.17677669, %v2544_v34  ;;  %v4598_v58 = vpop.f32.mrb[17].mxu1  ;;  %v4633_v60 = vpop.f32.mrb[33].mxu0  ;;  %v2465_v62 = vsel %vm520_vm8, %v2464_v53, -inf  ;;  %v2940_v54 = vsel %vm520_vm8, %v2939_v12, -inf }
 0xea6   :  { %2466 = vmax.xlane.f32.xlu1 %v2465_v62  ;;  %v3097_v21 = vmul.f32 0.17677669, %v3093_v55  ;;  %v3342_v62 = vmul.f32 %v5662_v56, %v5887_v52 }
 0xea7   :  { %v2549_v63 = vadd.f32 %v2548_v57, %v5692_v2 }
 0xea8   :  { %v3098_v31 = vadd.f32 %v3097_v21, %v5752_v59 }
 0xea9   :  { %v2550_v0 = vsel %vm520_vm8, %v2549_v63, -inf }
 0xeaa   :  { %2551 = vmax.xlane.f32.xlu0 %v2550_v0  ;;  %v3099_v24 = vsel %vm520_vm8, %v3098_v31, -inf }
 0xf33   :  { %v2467_v3 = vpop.xlane.xlu1 %2466 }
 0xf34   :  { %v2468_v4 = vsub.f32 %v2464_v53, %v2467_v3 }
 0xf36   :  { %v2469_v6 = vmul.f32 1.442695, %v2468_v4 }
 0xf37   :  { %v2552_v7 = vpop.xlane.xlu0 %2551 }
 0xf38   :  { %v2553_v8 = vsub.f32 %v2549_v63, %v2552_v7  ;;  %5116 = vpow2.f32 %v2469_v6 }
 0xf3a   :  { %v2554_v9 = vmul.f32 1.442695, %v2553_v8 }
 0xf3c   :  { %5118 = vpow2.f32 %v2554_v9 }
 0xf42   :  { %v5117_v10 = vpop.eup %5116 }
 0xf43   :  { %v2471_v11 = vsel %vm520_vm8, %v5117_v10, 0.0 }
 0xf44   :  { %2472 = vadd.xlane.f32.xlu1 %v2471_v11 }
 0xf46   :  { %v5119_v13 = vpop.eup %5118 }
 0xf47   :  { %v2556_v14 = vsel %vm520_vm8, %v5119_v13, 0.0 }
 0xf48   :  { %2557 = vadd.xlane.f32.xlu0 %v2556_v14  ;;  %2941 = vmax.xlane.f32.xlu1 %v2940_v54 }
 0xfd1   :  { %v2473_v15 = vpop.xlane.xlu1 %2472 }
 0xfd5   :  { %v2558_v16 = vpop.xlane.xlu0 %2557  ;;  %v2942_v18 = vpop.xlane.xlu1 %2941 }
 0xfd6   :  { %5120 = vrcp.f32 %v2558_v16  ;;  %v2943_v19 = vsub.f32 %v2939_v12, %v2942_v18 }
 0xfd8   :  { %v2944_v5 = vmul.f32 1.442695, %v2943_v19 }
 0xfda   :  { %5122 = vpow2.f32 %v2944_v5 }
 0xfdb   :  { %5124 = vrcp.f32 %v2473_v15 }
 0xfe0   :  { %v5121_v1 = vpop.eup %5120 }
 0xfe1   :  { %v2560_v35 = vmul.f32 %v5121_v1, %v5119_v13 }
 0xfe3   :  { %4602 = vmatmul.mubr.msk.f32.vlgmr.msra.gmra.mrb[18].mxu1 %vm520_vm8, %v2560_v35 }
 0xfe4   :  { %4605 = vmatpush3.msra.mxu1 %v2476_v22  ;;  %4606 = vmatprep.mubr.msk.f32.mxu1 %vm5389_vm0, %v5388_v47  ;;  %v5123_v26 = vpop.eup %5122 }
 0xfe5   :  { %4609 = vmatprep.subr.mxu1 %v5388_v47  ;;  %v5125_v27 = vpop.eup %5124  ;;  %v2946_v29 = vsel %vm520_vm8, %v5123_v26, 0.0 }
 0xfe6   :  { %2947 = vadd.xlane.f32.xlu1 %v2946_v29  ;;  %v2475_v28 = vmul.f32 %v5125_v27, %v5117_v10 }
 0xfea   :  { %3100 = vmax.xlane.f32.xlu1 %v3099_v24 }
 0xfeb   :  { %4607 = vmatmul.mubr.msk.f32.vlgmr.msra.gmra.mrb[18].mxu1 %vm520_vm8, %v2475_v28 }
 0xfec   :  { %4610 = vmatpush3.xpose.msra.mxu1 %v5879_v23  ;;  %4611 = vmatprep.mubr.msk.f32.mxu1 %vm5389_vm0, %v5388_v47 }
 0xfed   :  { %4614 = vmatprep.subr.mxu1 %v5388_v47 }
 0xfef   :  { %4612 = vmatmul.mubr.f32.vlgmr.msra.gmra.mrb[20].mxu1 %v2708_v38 }
 0xff0   :  { %4615 = vmatpush3.msra.mxu1 %v2792_v42  ;;  %4616 = vmatprep.mubr.msk.f32.mxu1 %vm5389_vm0, %v5388_v47 }
 0xff1   :  { %4624 = vmatprep.subr.mxu1 %v5388_v47 }
0x1073   :  { %v2948_v34 = vpop.xlane.xlu1 %2947 }
0x1077   :  { %v3101_v63 = vpop.xlane.xlu1 %3100 }
0x1078   :  { %v3102_v0 = vsub.f32 %v3098_v31, %v3101_v63  ;;  %v3673_v63 = vld [vmem:[#allocation11 + $0xe0] sm:$0xff] }
0x107a   :  { %v3103_v6 = vmul.f32 1.442695, %v3102_v0  ;;  %v3674_v0 = vld [vmem:[#allocation11 + $0xe8] sm:$0xff] }
0x10c2   :  { %v2775_v44 = vpop.f32.mrb[20].mxu1 }
0x10c3   :  { %v2779_v23 = vmul.f32 0.17677669, %v2775_v44  ;;  %v4613_v32 = vpop.f32.mrb[21].mxu1 }
0x10c4   :  { %v3661_v32 = vld [vmem:[#allocation11 + $0x80] sm:$0xff] }
0x10c5   :  { %v2780_v45 = vadd.f32 %v2779_v23, %v5692_v2  ;;  %v2951_v2 = vmul.f32 %v5715_v33, %v5897_v39  ;;  %v3111_v39 = vmul.f32 %v5672_v61, %v5887_v52  ;;  %v3501_v61 = vmul.f32 %v5715_v33, %v5887_v52 }
0x10c7   :  { %v2781_v46 = vsel %vm520_vm8, %v2780_v45, -inf }
0x10c8   :  { %2782 = vmax.xlane.f32.xlu0 %v2781_v46  ;;  %v3663_v46 = vld [vmem:[#allocation11 + $0x90] sm:$0xff] }
0x1155   :  { %v2783_v48 = vpop.xlane.xlu0 %2782 }
0x1156   :  { %v2784_v36 = vsub.f32 %v2780_v45, %v2783_v48  ;;  %v3662_v45 = vld [vmem:[#allocation11 + $0x88] sm:$0xff] }
0x1157   :  { %v4928_v48 = vpack.c.bf16 %v3662_v45, %v3661_v32  ;;  %v3814_v32 = vld [vmem:[#allocation13 + $0x148] sm:$0xff]  ;;  %v3816_v45 = vld [vmem:[#allocation13 + $0x158] sm:$0xff] }
0x1158   :  { %v2785_v49 = vmul.f32 1.442695, %v2784_v36  ;;  %v3664_v36 = vld [vmem:[#allocation11 + $0x98] sm:$0xff] }
0x115a   :  { %5126 = vpow2.f32 %v2785_v49  ;;  %v4932_v49 = vpack.c.bf16 %v3664_v36, %v3663_v46  ;;  %v3813_v46 = vld [vmem:[#allocation13 + $0x140] sm:$0xff] }
0x1164   :  { %v5127_v30 = vpop.eup %5126 }
0x1165   :  { %v2787_v51 = vsel %vm520_vm8, %v5127_v30, 0.0 }
0x1166   :  { %2788 = vadd.xlane.f32.xlu0 %v2787_v51  ;;  %v3666_v51 = vld [vmem:[#allocation11 + $0xa8] sm:$0xff] }
0x11f3   :  { %v2789_v53 = vpop.xlane.xlu0 %2788 }
0x11f4   :  { %5128 = vrcp.f32 %v2789_v53 }
0x11f5   :  { %5130 = vrcp.f32 %v2948_v34  ;;  %v3667_v34 = vld [vmem:[#allocation11 + $0xb0] sm:$0xff] }
0x11f6   :  { %5132 = vpow2.f32 %v3103_v6  ;;  %v3676_v6 = vld [vmem:[#allocation11 + $0xf8] sm:$0xff] }
0x11fe   :  { %v5129_v55 = vpop.eup %5128 }
0x11ff   :  { %v2791_v57 = vmul.f32 %v5129_v55, %v5127_v30  ;;  %v5131_v58 = vpop.eup %5130  ;;  %v3665_v30 = vld [vmem:[#allocation11 + $0xa0] sm:$0xff]  ;;  %v3668_v55 = vld [vmem:[#allocation11 + $0xb8] sm:$0xff] }
0x1200   :  { %v2950_v60 = vmul.f32 %v5131_v58, %v5123_v26  ;;  %v5983_v19 = vpop.eup %5132  ;;  %v4936_v53 = vpack.c.bf16 %v3666_v51, %v3665_v30  ;;  %v3670_v58 = vld [vmem:[#allocation11 + $0xc8] sm:$0xff] }
0x1201   :  { %4617 = vmatmul.mubr.msk.f32.vlgmr.msra.gmra.mrb[18].mxu1 %vm520_vm8, %v2791_v57  ;;  %v3105_v5 = vsel %vm520_vm8, %v5983_v19, 0.0  ;;  %v4940_v57 = vpack.c.bf16 %v3668_v55, %v3667_v34 }
0x1202   :  { %4625 = vmatpush3.msra.mxu1 %v2951_v2  ;;  %4626 = vmatprep.mubr.msk.f32.mxu1 %vm5389_vm0, %v5388_v47  ;;  %v3669_v2 = vld [vmem:[#allocation11 + $0xc0] sm:$0xff] }
0x1203   :  { %4634 = vmatprep.subr.mxu1 %v5388_v47 }
0x1209   :  { %4627 = vmatmul.mubr.msk.f32.vlgmr.msra.gmra.mrb[18].mxu1 %vm520_vm8, %v2950_v60  ;;  %v4944_v60 = vpack.c.bf16 %v3670_v58, %v3669_v2  ;;  %v3818_v58 = vld [vmem:[#allocation13 + $0x168] sm:$0xff] }
0x120a   :  { %4635 = vmatpush3.xpose.msra.mxu1 %v5895_v41  ;;  %4636 = vmatprep.mubr.msk.f32.mxu1 %vm5389_vm0, %v5388_v47 }
0x120b   :  { %4649 = vmatprep.subr.mxu1 %v5388_v47 }
0x120d   :  { %4637 = vmatmul.mubr.f32.vlgmr.msra.gmra.mrb[22].mxu1 %v3111_v39  ;;  %v3671_v39 = vld [vmem:[#allocation11 + $0xd0] sm:$0xff] }
0x120e   :  { %4650 = vmatpush3.xpose.msra.mxu1 %v5895_v41  ;;  %4651 = vmatprep.mubr.msk.f32.mxu1 %vm5389_vm0, %v5388_v47 }
0x120f   :  { %4659 = vmatprep.subr.mxu1 %v5388_v47 }
0x1211   :  { %4652 = vmatmul.mubr.f32.vlgmr.msra.gmra.mrb[24].mxu1 %v3342_v62  ;;  %v3672_v62 = vld [vmem:[#allocation11 + $0xd8] sm:$0xff] }
0x1212   :  { %4660 = vmatpush3.xpose.msra.mxu1 %v5895_v41  ;;  %4661 = vmatprep.mubr.msk.f32.mxu1 %vm5389_vm0, %v5388_v47 }
0x1213   :  { %4929 = vmatprep.subr.bf16.mxu1 %v4928_v48 }
0x1215   :  { %4662 = vmatmul.mubr.f32.vlgmr.msra.gmra.mrb[26].mxu1 %v3501_v61  ;;  %v4948_v61 = vpack.c.bf16 %v3672_v62, %v3671_v39  ;;  %v3817_v62 = vld [vmem:[#allocation13 + $0x160] sm:$0xff] }
0x1216   :  { %4931 = vmatpush3.bf16.msra.mxu1 %v4928_v48  ;;  %v3815_v48 = vld [vmem:[#allocation13 + $0x150] sm:$0xff] }
0x1217   :  { %4933 = vmatprep.subr.bf16.mxu1 %v4932_v49  ;;  %v4970_v36 = vpack.c.bf16 %v3815_v48, %v3813_v46 }
0x121a   :  { %4935 = vmatpush3.bf16.msra.mxu1 %v4932_v49 }
0x121b   :  { %4937 = vmatprep.subr.bf16.mxu1 %v4936_v53 }
0x121e   :  { %4939 = vmatpush3.bf16.msra.mxu1 %v4936_v53 }
0x121f   :  { %4941 = vmatprep.subr.bf16.mxu1 %v4940_v57 }
0x1222   :  { %4943 = vmatpush3.bf16.msra.mxu1 %v4940_v57 }
0x1223   :  { %4945 = vmatprep.subr.bf16.mxu1 %v4944_v60 }
0x1226   :  { %4947 = vmatpush3.bf16.msra.mxu1 %v4944_v60  ;;  %v3820_v60 = vld [vmem:[#allocation13 + $0x178] sm:$0xff] }
0x1227   :  { %4949 = vmatprep.subr.bf16.mxu1 %v4948_v61  ;;  %v4972_v39 = vpack.c.bf16 %v3820_v60, %v3818_v58  ;;  %v3968_v58 = vld [vmem:[#allocation14 + $0x120] sm:$0xff]  ;;  %v3969_v60 = vld [vmem:[#allocation14 + $0x128] sm:$0xff] }
0x122a   :  { %4951 = vmatpush3.bf16.msra.mxu1 %v4948_v61  ;;  %v3819_v61 = vld [vmem:[#allocation13 + $0x170] sm:$0xff] }
0x12dc   :  { %v3021_v3 = vpop.f32.mrb[18].mxu1 }
0x12dd   :  { %v4628_v4 = vpop.f32.mrb[19].mxu1  ;;  %4701 = vmatprep.mubr.f32.mxu1 %v3021_v3  ;;  %v4952_v3 = vpack.c.bf16 %v3674_v0, %v3673_v63  ;;  %v4974_v63 = vpack.c.bf16 %v3819_v61, %v3817_v62  ;;  %v3822_v0 = vld [vmem:[#allocation13 + $0x188] sm:$0xff]  ;;  %v3987_v62 = vld [vmem:[#allocation14 + $0x1b8] sm:$0xff]  ;;  %v3970_v61 = vld [vmem:[#allocation14 + $0x130] sm:$0xff] }
0x12de   :  { %v3675_v4 = vld [vmem:[#allocation11 + $0xf0] sm:$0xff] }
0x12df   :  { %4953 = vmatprep.subr.bf16.mxu1 %v4952_v3 }
0x12e0   :  { %v3178_v7 = vpop.f32.mrb[22].mxu1  ;;  %4955 = vmatpush3.bf16.msra.mxu1 %v4952_v3  ;;  %v3824_v3 = vld [vmem:[#allocation13 + $0x198] sm:$0xff] }
0x12e1   :  { %v3182_v8 = vmul.f32 0.17677669, %v3178_v7  ;;  %v4638_v9 = vpop.f32.mrb[23].mxu1  ;;  %v4956_v7 = vpack.c.bf16 %v3676_v6, %v3675_v4  ;;  %v3821_v4 = vld [vmem:[#allocation13 + $0x180] sm:$0xff]  ;;  %v4976_v6 = vpack.c.bf16 %v3824_v3, %v3822_v0  ;;  %v3971_v0 = vld [vmem:[#allocation14 + $0x138] sm:$0xff] }
0x12e2   :  { %v3988_v3 = vld [vmem:[#allocation14 + $0x1c0] sm:$0xff] }
0x12e3   :  { %v3183_v43 = vadd.f32 %v3182_v8, %v5752_v59  ;;  %4957 = vmatprep.subr.bf16.mxu1 %v4956_v7 }
0x12e4   :  { %v3409_v41 = vpop.f32.mrb[24].mxu1  ;;  %4959 = vmatpush3.bf16.msra.mxu1 %v4956_v7  ;;  %v3823_v7 = vld [vmem:[#allocation13 + $0x190] sm:$0xff] }
0x12e5   :  { %v3413_v10 = vmul.f32 0.17677669, %v3409_v41  ;;  %v4653_v11 = vpop.f32.mrb[25].mxu1  ;;  %v3184_v12 = vsel %vm520_vm8, %v3183_v43, -inf }
0x12e6   :  { %3185 = vmax.xlane.f32.xlu0 %v3184_v12  ;;  %v3110_v11 = vmul.f32 %v5652_v50, %v5893_v25 }
0x12e7   :  { %v3414_v52 = vadd.f32 %v3413_v10, %v5752_v59 }
0x12e8   :  { %v3568_v13 = vpop.f32.mrb[26].mxu1 }
0x12e9   :  { %v3572_v14 = vmul.f32 0.17677669, %v3568_v13  ;;  %v4663_v54 = vpop.f32.mrb[27].mxu1  ;;  %v3415_v15 = vsel %vm520_vm8, %v3414_v52, -inf }
0x12ea   :  { %3416 = vmax.xlane.f32.xlu0 %v3415_v15  ;;  %v3585_v15 = vmul.f32 %v5715_v33, %v5893_v25  ;;  %v4180_v33 = vld [vmem:[%s6084_s7 + $0x1] ss:$0 sm:$0xff] }
0x12eb   :  { %v3573_v16 = vadd.f32 %v3572_v14, %v5752_v59  ;;  %v3426_v14 = vmul.f32 %v5662_v56, %v5893_v25 }
0x12ed   :  { %v3574_v18 = vsel %vm520_vm8, %v3573_v16, -inf }
0x12ee   :  { %3575 = vmax.xlane.f32.xlu1 %v3574_v18 }
0x12f2   :  { %3106 = vadd.xlane.f32.xlu1 %v3105_v5 }
0x1373   :  { %v3186_v1 = vpop.xlane.xlu0 %3185 }
0x1374   :  { %v3187_v35 = vsub.f32 %v3183_v43, %v3186_v1 }
0x1376   :  { %v3188_v21 = vmul.f32 1.442695, %v3187_v35 }
0x1377   :  { %v3417_v22 = vpop.xlane.xlu0 %3416 }
0x1378   :  { %5134 = vpow2.f32 %v3188_v21  ;;  %v3418_v26 = vsub.f32 %v3414_v52, %v3417_v22 }
0x137a   :  { %v3419_v27 = vmul.f32 1.442695, %v3418_v26  ;;  %v3806_v26 = vld [vmem:[#allocation13 + $0x108] sm:$0xff] }
0x137b   :  { %v3576_v29 = vpop.xlane.xlu1 %3575 }
0x137c   :  { %5136 = vpow2.f32 %v3419_v27  ;;  %v3577_v31 = vsub.f32 %v3573_v16, %v3576_v29  ;;  %v3808_v27 = vld [vmem:[#allocation13 + $0x118] sm:$0xff]  ;;  %v3805_v29 = vld [vmem:[#allocation13 + $0x100] sm:$0xff] }
0x137e   :  { %v3578_v59 = vmul.f32 1.442695, %v3577_v31  ;;  %v4960_v31 = vpack.c.bf16 %v3808_v27, %v3806_v26 }
0x137f   :  { %v3107_v9 = vpop.xlane.xlu1 %3106 }
0x1380   :  { %5138 = vpow2.f32 %v3578_v59  ;;  %v3807_v59 = vld [vmem:[#allocation13 + $0x110] sm:$0xff] }
0x1382   :  { %v5135_v28 = vpop.eup %5134 }
0x1383   :  { %v3190_v24 = vsel %vm520_vm8, %v5135_v28, 0.0 }
0x1384   :  { %3191 = vadd.xlane.f32.xlu0 %v3190_v24  ;;  %v3812_v24 = vld [vmem:[#allocation13 + $0x138] sm:$0xff] }
0x1386   :  { %v5988_v38 = vpop.eup %5136 }
0x1387   :  { %v3421_v42 = vsel %vm520_vm8, %v5988_v38, 0.0 }
0x1388   :  { %3422 = vadd.xlane.f32.xlu0 %v3421_v42 }
0x138a   :  { %v5992_v44 = vpop.eup %5138 }
0x138b   :  { %v3580_v23 = vsel %vm520_vm8, %v5992_v44, 0.0 }
0x138c   :  { %3581 = vadd.xlane.f32.xlu1 %v3580_v23  ;;  %v3811_v23 = vld [vmem:[#allocation13 + $0x130] sm:$0xff] }
0x1411   :  { %v3192_v8 = vpop.xlane.xlu0 %3191 }
0x1412   :  { %5140 = vrcp.f32 %v3192_v8  ;;  %v3826_v8 = vld [vmem:[#allocation13 + $0x1a8] sm:$0xff] }
0x1413   :  { %5142 = vrcp.f32 %v3107_v9  ;;  %v3828_v9 = vld [vmem:[#allocation13 + $0x1b8] sm:$0xff] }
0x1415   :  { %v3423_v10 = vpop.xlane.xlu0 %3422 }
0x1416   :  { %5144 = vrcp.f32 %v3423_v10  ;;  %v3825_v10 = vld [vmem:[#allocation13 + $0x1a0] sm:$0xff] }
0x1419   :  { %v3582_v13 = vpop.xlane.xlu1 %3581 }
0x141a   :  { %5146 = vrcp.f32 %v3582_v13 }
0x141c   :  { %v5141_v43 = vpop.eup %5140 }
0x141d   :  { %v3194_v41 = vmul.f32 %v5141_v43, %v5135_v28  ;;  %v5143_v12 = vpop.eup %5142  ;;  %v3810_v28 = vld [vmem:[#allocation13 + $0x128] sm:$0xff]  ;;  %v4978_v43 = vpack.c.bf16 %v3823_v7, %v3821_v4 }
0x141e   :  { %v3109_v52 = vmul.f32 %v5143_v12, %v5983_v19  ;;  %v4964_v42 = vpack.c.bf16 %v3812_v24, %v3810_v28  ;;  %v3830_v12 = vld [vmem:[#allocation13 + $0x1c8] sm:$0xff] }
0x141f   :  { %4642 = vmatmul.mubr.msk.f32.vlgmr.msra.gmra.mrb[34].mxu0 %vm520_vm8, %v3194_v41  ;;  %v4980_v41 = vpack.c.bf16 %v3828_v9, %v3826_v8  ;;  %v3989_v4 = vld [vmem:[#allocation14 + $0x1c8] sm:$0xff]  ;;  %v3972_v8 = vld [vmem:[#allocation14 + $0x140] sm:$0xff] }
0x1420   :  { %4645 = vmatpush3.msra.mxu0 %v3110_v11  ;;  %4646 = vmatprep.mubr.msk.f32.mxu0 %vm5389_vm0, %v5388_v47  ;;  %v5145_v50 = vpop.eup %5144  ;;  %v3827_v11 = vld [vmem:[#allocation13 + $0x1b0] sm:$0xff]  ;;  %v5008_v7 = vpack.c.bf16 %v3989_v4, %v3988_v3  ;;  %v3973_v9 = vld [vmem:[#allocation14 + $0x148] sm:$0xff] }
0x1421   :  { %4654 = vmatprep.subr.mxu0 %v5388_v47  ;;  %v3425_v54 = vmul.f32 %v5145_v50, %v5988_v38  ;;  %v4962_v38 = vpack.c.bf16 %v3807_v59, %v3805_v29  ;;  %v4982_v13 = vpack.c.bf16 %v3827_v11, %v3825_v10  ;;  %v3829_v50 = vld [vmem:[#allocation13 + $0x1c0] sm:$0xff]  ;;  %v5010_v10 = vpack.c.bf16 %v3973_v9, %v3972_v8 }
0x1424   :  { %v5147_v56 = vpop.eup %5146 }
0x1425   :  { %v3584_v16 = vmul.f32 %v5147_v56, %v5992_v44  ;;  %v3809_v44 = vld [vmem:[#allocation13 + $0x120] sm:$0xff]  ;;  %v3836_v56 = vld [vmem:[#allocation13 + $0x1f8] sm:$0xff] }
0x1427   :  { %4647 = vmatmul.mubr.msk.f32.vlgmr.msra.gmra.mrb[34].mxu0 %vm520_vm8, %v3109_v52  ;;  %v3832_v52 = vld [vmem:[#allocation13 + $0x1d8] sm:$0xff] }
0x1428   :  { %4655 = vmatpush3.msra.mxu0 %v3426_v14  ;;  %4656 = vmatprep.mubr.msk.f32.mxu0 %vm5389_vm0, %v5388_v47  ;;  %v4984_v14 = vpack.c.bf16 %v3832_v52, %v3830_v12  ;;  %v3974_v12 = vld [vmem:[#allocation14 + $0x150] sm:$0xff]  ;;  %v3975_v52 = vld [vmem:[#allocation14 + $0x158] sm:$0xff] }
0x1429   :  { %4664 = vmatprep.subr.mxu0 %v5388_v47 }
0x142f   :  { %4657 = vmatmul.mubr.msk.f32.vlgmr.msra.gmra.mrb[34].mxu0 %vm520_vm8, %v3425_v54  ;;  %v3831_v54 = vld [vmem:[#allocation13 + $0x1d0] sm:$0xff] }
0x1430   :  { %4665 = vmatpush3.msra.mxu0 %v3585_v15  ;;  %4666 = vmatprep.mubr.msk.f32.mxu0 %vm5389_vm0, %v5388_v47  ;;  %v3834_v15 = vld [vmem:[#allocation13 + $0x1e8] sm:$0xff] }
0x1431   :  { %4961 = vmatprep.subr.bf16.mxu0 %v4960_v31 }
0x1437   :  { %4667 = vmatmul.mubr.msk.f32.vlgmr.msra.gmra.mrb[34].mxu0 %vm520_vm8, %v3584_v16  ;;  %v4986_v16 = vpack.c.bf16 %v3831_v54, %v3829_v50  ;;  %v5014_v50 = vpack.c.bf16 %v3975_v52, %v3974_v12  ;;  %v4187_v52 = vld [vmem:[%s6090_s13 + $0x1] ss:$0 sm:$0xff] }
0x1438   :  { %3914 = vmatprep.mubr.f32.mxu0 %v5388_v47  ;;  %4963 = vmatpush1.bf16.msra.mxu0 %v4962_v38 }
0x1439   :  { %4965 = vmatprep.subr.bf16.mxu0 %v4964_v42 }
0x150a   :  { %v3655_v18 = vpop.f32.mrb[34].mxu0 }
0x150b   :  { %v4668_v19 = vpop.f32.mrb[35].mxu0  ;;  %4702 = vmatmul.mubr.f32.vlgmr.msra.gmra.mrb[28].mxu1 %v3655_v18  ;;  %v4988_v18 = vpack.c.bf16 %v3836_v56, %v3834_v15  ;;  %v3976_v15 = vld [vmem:[#allocation14 + $0x160] sm:$0xff]  ;;  %v3977_v56 = vld [vmem:[#allocation14 + $0x168] sm:$0xff] }
0x150c   :  { %v3833_v19 = vld [vmem:[#allocation13 + $0x1e0] sm:$0xff] }
0x15de   :  { %v4703_v25 = vpop.f32.mrb[28].mxu1 }
0x15df   :  { %v3757_v5 = vadd.f32 %v4703_v25, %v4180_v33  ;;  %v3751_v1 = vpop.f32.mrb[29].mxu1 }
0x15e0   :  { %v3752_v35 = vadd.f32 %v4180_v33, %v3751_v1  ;;  %v3835_v33 = vld [vmem:[#allocation13 + $0x1f0] sm:$0xff]  ;;  %v3981_v1 = vld [vmem:[#allocation14 + $0x188] sm:$0xff] }
0x15e1   :  { %v3761_v21 = vadd.f32 %v3757_v5, %v5864_v20  ;;  %v4966_v20 = vpack.c.bf16 %v3811_v23, %v3809_v44  ;;  %v4990_v25 = vpack.c.bf16 %v3835_v33, %v3833_v19  ;;  %v3980_v5 = vld [vmem:[#allocation14 + $0x180] sm:$0xff]  ;;  %v4183_v44 = vld [vmem:[%s6085_s8 + $0x1] ss:$0 sm:$0xff]  ;;  %v5018_v19 = vpack.c.bf16 %v3977_v56, %v3976_v15 }
0x15e2   :  { %v3760_v22 = vadd.f32 %v3752_v35, %v5858_v17  ;;  %v4968_v17 = vpack.c.bf16 %v3816_v45, %v3814_v32  ;;  %v3964_v35 = vld [vmem:[#allocation14 + $0x100] sm:$0xff]  ;;  %v4184_v45 = vld [vmem:[%s6086_s9 + $0x1] ss:$0 sm:$0xff] }
0x15e3   :  { %3768 = vadd.xlane.f32.xlu1 %v3761_v21  ;;  %4967 = vmatpush1.bf16.msra.mxu0 %v4966_v20 }
0x15e4   :  { %3766 = vadd.xlane.f32.xlu0 %v3760_v22  ;;  %4969 = vmatprep.subr.bf16.mxu0 %v4968_v17 }
0x15e7   :  { %4971 = vmatpush1.bf16.msra.mxu0 %v4970_v36  ;;  %v3982_v36 = vld [vmem:[#allocation14 + $0x190] sm:$0xff] }
0x15e8   :  { %4973 = vmatprep.subr.bf16.mxu0 %v4972_v39  ;;  %v5002_v39 = vpack.c.bf16 %v3969_v60, %v3968_v58 }
0x15eb   :  { %4975 = vmatpush1.bf16.msra.mxu0 %v4974_v63 }
0x15ec   :  { %4977 = vmatprep.subr.bf16.mxu0 %v4976_v6  ;;  %v5006_v6 = vpack.c.bf16 %v3971_v0, %v3970_v61 }
0x15ef   :  { %4979 = vmatpush1.bf16.msra.mxu0 %v4978_v43  ;;  %v3990_v43 = vld [vmem:[#allocation14 + $0x1d0] sm:$0xff] }
0x15f0   :  { %4981 = vmatprep.subr.bf16.mxu0 %v4980_v41  ;;  %v3991_v41 = vld [vmem:[#allocation14 + $0x1d8] sm:$0xff] }
0x15f1   :  { %v5012_v11 = vpack.c.bf16 %v3991_v41, %v3990_v43 }
0x15f3   :  { %4983 = vmatpush1.bf16.msra.mxu0 %v4982_v13  ;;  %v3992_v13 = vld [vmem:[#allocation14 + $0x1e0] sm:$0xff] }
0x15f4   :  { %4985 = vmatprep.subr.bf16.mxu0 %v4984_v14  ;;  %v3993_v14 = vld [vmem:[#allocation14 + $0x1e8] sm:$0xff] }
0x15f5   :  { %v5016_v54 = vpack.c.bf16 %v3993_v14, %v3992_v13 }
0x15f7   :  { %4987 = vmatpush1.bf16.msra.mxu0 %v4986_v16  ;;  %v3994_v16 = vld [vmem:[#allocation14 + $0x1f0] sm:$0xff] }
0x15f8   :  { %4989 = vmatprep.subr.bf16.mxu0 %v4988_v18  ;;  %v3995_v18 = vld [vmem:[#allocation14 + $0x1f8] sm:$0xff] }
0x15f9   :  { %v5020_v33 = vpack.c.bf16 %v3995_v18, %v3994_v16 }
0x15fb   :  { %4991 = vmatpush1.bf16.msra.mxu0 %v4990_v25  ;;  %v3978_v25 = vld [vmem:[#allocation14 + $0x170] sm:$0xff] }
0x1670   :  { %v3769_v49 = vpop.xlane.xlu1 %3768 }
0x1671   :  { %v3771_v30 = vmul.f32 0.0078125, %v3769_v49  ;;  %v3767_v51 = vpop.xlane.xlu0 %3766  ;;  %v3983_v49 = vld [vmem:[#allocation14 + $0x198] sm:$0xff] }
0x1672   :  { %v3770_v53 = vmul.f32 0.0078125, %v3767_v51  ;;  %v3966_v51 = vld [vmem:[#allocation14 + $0x110] sm:$0xff] }
0x1673   :  { %v6023_v34 = vsub.f32 %v3761_v21, %v3771_v30  ;;  %v4992_v21 = vpack.c.bf16 %v3981_v1, %v3980_v5  ;;  %v4996_v30 = vpack.c.bf16 %v3983_v49, %v3982_v36  ;;  %v3979_v5 = vld [vmem:[#allocation14 + $0x178] sm:$0xff] }
0x1674   :  { %v6025_v55 = vsub.f32 %v3760_v22, %v3770_v53  ;;  %v3965_v22 = vld [vmem:[#allocation14 + $0x108] sm:$0xff]  ;;  %v3967_v53 = vld [vmem:[#allocation14 + $0x118] sm:$0xff]  ;;  %v5022_v1 = vpack.c.bf16 %v3979_v5, %v3978_v25 }
0x1675   :  { %v3775_v57 = vmul.f32 %v6023_v34, %v6023_v34  ;;  %v4994_v26 = vpack.c.bf16 %v3965_v22, %v3964_v35  ;;  %4993 = vmatprep.subr.bf16.mxu1 %v4992_v21  ;;  %v4185_v35 = vld [vmem:[%s6088_s11 + $0x2] sm:$0x3] }
0x1676   :  { %v3774_v2 = vmul.f32 %v6025_v55, %v6025_v55  ;;  %v3843_v21 = vrot.slane %v4185_v35, %v5629_v37  ;;  %v3847_v22 = vrot.slane %v4185_v35, %v5637_v40 }
0x1677   :  { %3778 = vadd.xlane.f32.xlu1 %v3775_v57  ;;  %4995 = vmatpush3.bf16.msra.mxu1 %v4994_v26  ;;  %v3985_v57 = vld [vmem:[#allocation14 + $0x1a8] sm:$0xff] }
0x1678   :  { %3776 = vadd.xlane.f32.xlu0 %v3774_v2  ;;  %4997 = vmatprep.subr.bf16.mxu1 %v4996_v30 }
0x1704   :  { %v3779_v27 = vpop.xlane.xlu1 %3778 }
0x1705   :  { %v3781_v29 = vmul.f32 0.0078125, %v3779_v27  ;;  %v3777_v31 = vpop.xlane.xlu0 %3776 }
0x1706   :  { %v3780_v59 = vmul.f32 0.0078125, %v3777_v31 }
0x1707   :  { %v3783_v28 = vadd.f32 1e-12, %v3781_v29 }
0x1708   :  { %v3782_v24 = vadd.f32 1e-12, %v3780_v59 }
0x1709   :  { %5148 = vrsqrt.f32 %v3783_v28 }
0x170a   :  { %5150 = vrsqrt.f32 %v3782_v24 }
0x1713   :  { %v5149_v38 = vpop.eup %5148 }
0x1714   :  { %v5151_v42 = vpop.eup %5150  ;;  %v3787_v32 = vmul.f32 %v5149_v38, %v6023_v34  ;;  %v4998_v34 = vpack.c.bf16 %v3967_v53, %v3966_v51 }
0x1715   :  { %v3786_v23 = vmul.f32 %v5151_v42, %v6025_v55  ;;  %v3984_v55 = vld [vmem:[#allocation14 + $0x1a0] sm:$0xff] }
0x1716   :  { %v3795_v46 = vmul.f32 %v4183_v44, %v3787_v32  ;;  %4999 = vmatpush3.bf16.msra.mxu1 %v4998_v34  ;;  %v5000_v2 = vpack.c.bf16 %v3985_v57, %v3984_v55 }
0x1717   :  { %v3794_v20 = vmul.f32 %v4183_v44, %v3786_v23 }
0x1718   :  { %v6043_v48 = vadd.f32 %v4184_v45, %v3795_v46  ;;  %5001 = vmatprep.subr.bf16.mxu1 %v5000_v2 }
0x1719   :  { %v6039_v17 = vadd.f32 %v4184_v45, %v3794_v20 }
0x171a   :  { %5003 = vmatpush3.bf16.msra.mxu1 %v5002_v39 }
0x171b   :  { %3915 = vmatmul.mubr.f32.vlgmr.msra.gmra.mrb[36].mxu0 %v6039_v17 }
0x171c   :  { %3920 = vmatprep.mubr.f32.mxu0 %v5388_v47  ;;  %v3986_v47 = vld [vmem:[#allocation14 + $0x1b0] sm:$0xff] }
0x171d   :  { %v5004_v63 = vpack.c.bf16 %v3987_v62, %v3986_v47 }
0x171f   :  { %3921 = vmatmul.mubr.f32.gmra.mrb[38].mxu0 %v6043_v48  ;;  %5005 = vmatprep.subr.bf16.mxu1 %v5004_v63 }
0x1720   :  { %5007 = vmatpush3.bf16.msra.mxu1 %v5006_v6 }
0x1721   :  { %5009 = vmatprep.subr.bf16.mxu1 %v5008_v7 }
0x1724   :  { %5011 = vmatpush3.bf16.msra.mxu1 %v5010_v10 }
0x1725   :  { %5013 = vmatprep.subr.bf16.mxu1 %v5012_v11 }
0x1728   :  { %5015 = vmatpush3.bf16.msra.mxu1 %v5014_v50 }
0x1729   :  { %5017 = vmatprep.subr.bf16.mxu1 %v5016_v54 }
0x172c   :  { %5019 = vmatpush3.bf16.msra.mxu1 %v5018_v19 }
0x172d   :  { %5021 = vmatprep.subr.bf16.mxu1 %v5020_v33 }
0x1730   :  { %5023 = vmatpush3.bf16.msra.mxu1 %v5022_v1 }
0x17ee   :  { %v3916_v26 = vpop.f32.mrb[36].mxu0 }
0x17ef   :  { %v3917_v27 = vadd.f32 %v3916_v26, %v3843_v21  ;;  %v3918_v29 = vpop.f32.mrb[37].mxu0 }
0x17f0   :  { %v3919_v31 = vadd.f32 %v3918_v29, %v3847_v22 }
0x17f1   :  { %v3931_v59 = vmul.f32 0.044715, %v3917_v27  ;;  %v3927_v0 = vmul.f32 0.5, %v3917_v27 }
0x17f2   :  { %v3932_v28 = vmul.f32 0.044715, %v3919_v31  ;;  %v3922_v24 = vpop.f32.mrb[38].mxu0  ;;  %v3928_v61 = vmul.f32 0.5, %v3919_v31 }
0x17f3   :  { %v3935_v38 = vmul.f32 %v3931_v59, %v3917_v27  ;;  %v3923_v42 = vadd.f32 %v3922_v24, %v3843_v21  ;;  %v3924_v44 = vpop.f32.mrb[39].mxu0 }
0x17f4   :  { %v3936_v23 = vmul.f32 %v3932_v28, %v3919_v31  ;;  %v3925_v32 = vadd.f32 %v3924_v44, %v3847_v22 }
0x17f5   :  { %v3939_v45 = vmul.f32 %v3935_v38, %v3917_v27  ;;  %v3933_v20 = vmul.f32 0.044715, %v3923_v42  ;;  %v3929_v41 = vmul.f32 0.5, %v3923_v42 }
0x17f6   :  { %v3934_v46 = vmul.f32 0.044715, %v3925_v32  ;;  %v3940_v36 = vmul.f32 %v3936_v23, %v3919_v31  ;;  %v3930_v9 = vmul.f32 0.5, %v3925_v32 }
0x17f7   :  { %v3943_v49 = vadd.f32 %v3939_v45, %v3917_v27  ;;  %v3937_v37 = vmul.f32 %v3933_v20, %v3923_v42  ;;  %v4191_v45 = vld [vmem:[%s6092_s15 + $0x1] ss:$0 sm:$0xff] }
0x17f8   :  { %v3938_v30 = vmul.f32 %v3934_v46, %v3925_v32  ;;  %v3944_v40 = vadd.f32 %v3940_v36, %v3919_v31 }
0x17f9   :  { %v3947_v51 = vmul.f32 0.7978846, %v3943_v49  ;;  %v3941_v53 = vmul.f32 %v3937_v37, %v3923_v42  ;;  %v4128_v49 = vld [vmem:[%s6093_s16] sm:$0x3] }
0x17fa   :  { %v3948_v34 = vmul.f32 0.7978846, %v3944_v40  ;;  %v3942_v55 = vmul.f32 %v3938_v30, %v3925_v32 }
0x17fb   :  { %5152 = vtanh.f32 %v3947_v51  ;;  %v3945_v57 = vadd.f32 %v3941_v53, %v3923_v42  ;;  %v4190_v42 = vld [vmem:[%s6091_s14 + $0x1] ss:$0 sm:$0xff]  ;;  %s5340_s14 = scalar_lea.vmem %s4138_s2, 32 }
0x17fc   :  { %5154 = vtanh.f32 %v3948_v34  ;;  %v3946_v2 = vadd.f32 %v3942_v55, %v3925_v32  ;;  %p5341_p8 = scmp.ne.s32.totalorder %s4138_s2, %s5340_s14  ;;  %p5346_p10 = scmp.lt.s32.totalorder %s5340_s14, %s5340_s14 }
0x17fd   :  { %v3949_v58 = vmul.f32 0.7978846, %v3945_v57 }
0x17fe   :  { %v3950_v60 = vmul.f32 0.7978846, %v3946_v2  ;;  %p5347_p11 = por %p5346_p10, %p5345_p9 }
0x17ff   :  { %5156 = vtanh.f32 %v3949_v58 }
0x1800   :  { %5158 = vtanh.f32 %v3950_v60  ;;  %p5348_p12 = pnand %p5347_p11, %p5341_p8 }
0x1805   :  { %v5153_v39 = vpop.eup %5152 }
0x1806   :  { %v5155_v47 = vpop.eup %5154  ;;  %v3955_v62 = vadd.f32 1.0, %v5153_v39 }
0x1807   :  { %v3956_v63 = vadd.f32 1.0, %v5155_v47 }
0x1808   :  { %v3959_v7 = vmul.f32 %v3955_v62, %v3927_v0 }
0x1809   :  { %v5157_v3 = vpop.eup %5156  ;;  %v3960_v4 = vmul.f32 %v3956_v63, %v3928_v61 }
0x180a   :  { %v5159_v6 = vpop.eup %5158  ;;  %v3957_v8 = vadd.f32 1.0, %v5157_v3 }
0x180b   :  { %4068 = vmatprep.mubr.f32.mxu1 %v3960_v4  ;;  %v3958_v43 = vadd.f32 1.0, %v5159_v6 }
0x180c   :  { %4069 = vmatmul.mubr.f32.vlgmr.msra.gmra.mrb[30].mxu1 %v3959_v7  ;;  %v3961_v11 = vmul.f32 %v3957_v8, %v3929_v41 }
0x180d   :  { %v3962_v10 = vmul.f32 %v3958_v43, %v3930_v9 }
0x180f   :  { %4073 = vmatprep.mubr.f32.mxu1 %v3962_v10 }
0x1810   :  { %4074 = vmatmul.mubr.f32.gmra.mrb[32].mxu1 %v3961_v11 }
0x18df   :  { %v4398_v12 = vpop.f32.mrb[30].mxu1 }
0x18e0   :  { %v4399_v13 = vpop.f32.mrb[31].mxu1 }
0x18e1   :  { %v4400_v14 = vadd.f32 %v4399_v13, %v4398_v12 }
0x18e3   :  { %v4071_v50 = vadd.f32 %v4400_v14, %v4187_v52  ;;  %v4401_v54 = vpop.f32.mrb[32].mxu1 }
0x18e4   :  { %v4402_v15 = vpop.f32.mrb[33].mxu1 }
0x18e5   :  { %v4403_v56 = vadd.f32 %v4402_v15, %v4401_v54  ;;  %v4079_v16 = vadd.f32 %v4071_v50, %v6039_v17 }
0x18e7   :  { %v4076_v18 = vadd.f32 %v4403_v56, %v4187_v52  ;;  %4085 = vadd.xlane.f32.xlu1 %v4079_v16 }
0x18e9   :  { %v4080_v19 = vadd.f32 %v4076_v18, %v6043_v48 }
0x18eb   :  { %4087 = vadd.xlane.f32.xlu0 %v4080_v19 }
0x1974   :  { %v4086_v33 = vpop.xlane.xlu1 %4085 }
0x1975   :  { %v4089_v25 = vmul.f32 0.0078125, %v4086_v33 }
0x1977   :  { %v4091_v5 = vsub.f32 %v4079_v16, %v4089_v25 }
0x1978   :  { %v4088_v1 = vpop.xlane.xlu0 %4087 }
0x1979   :  { %v4090_v35 = vmul.f32 0.0078125, %v4088_v1  ;;  %v4093_v21 = vmul.f32 %v4091_v5, %v4091_v5 }
0x197b   :  { %v4092_v22 = vsub.f32 %v4080_v19, %v4090_v35  ;;  %4095 = vadd.xlane.f32.xlu1 %v4093_v21 }
0x197d   :  { %v4094_v26 = vmul.f32 %v4092_v22, %v4092_v22 }
0x197f   :  { %4097 = vadd.xlane.f32.xlu0 %v4094_v26 }
0x1a08   :  { %v4096_v27 = vpop.xlane.xlu1 %4095 }
0x1a09   :  { %v4099_v29 = vmul.f32 0.0078125, %v4096_v27 }
0x1a0b   :  { %v4101_v31 = vadd.f32 1e-12, %v4099_v29 }
0x1a0c   :  { %v4098_v59 = vpop.xlane.xlu0 %4097 }
0x1a0d   :  { %5160 = vrsqrt.f32 %v4101_v31  ;;  %v4100_v17 = vmul.f32 0.0078125, %v4098_v59 }
0x1a0f   :  { %v4102_v28 = vadd.f32 1e-12, %v4100_v17 }
0x1a11   :  { %5162 = vrsqrt.f32 %v4102_v28 }
0x1a17   :  { %v5161_v48 = vpop.eup %5160 }
0x1a18   :  { %v4105_v24 = vmul.f32 %v5161_v48, %v4091_v5 }
0x1a1a   :  { %v4113_v23 = vmul.f32 %v4190_v42, %v4105_v24 }
0x1a1b   :  { %v5163_v38 = vpop.eup %5162 }
0x1a1c   :  { %v4106_v44 = vmul.f32 %v5163_v38, %v4092_v22  ;;  %v4121_v46 = vadd.f32 %v4191_v45, %v4113_v23 }
0x1a1e   :  { %v4114_v32 = vmul.f32 %v4190_v42, %v4106_v44 }
0x1a20   :  { %v4122_v20 = vadd.f32 %v4191_v45, %v4114_v32 }
0x1a22   :  { %v4124_v36 = vrot.slane %v4122_v20, 7 }
0x1a24   :  { %v4127_v37 = vsel %vm4126_vm10, %v4121_v46, %v4124_v36 }
0x1a25   :  { %v4129_v30 = vmul.f32 %v4128_v49, %v4127_v37 }
0x1a27   :  { %4130 = vst [vmem:[#allocation16] sm:$0x3] %v4129_v30 }
0x1a28   :  { %5351 = shalt.err (!%p5348_p12)
}
0x1a29   :  { %s5352_s1 = scalar_lea.hbm %s6094_s17, 32 }
0x1a2a   :  { %p5353_p13 = scmp.ne.s32.totalorder %s6094_s17, %s5352_s1  ;;  %p5356_p0 = scmp.lt.u32.totalorder %s5352_s1, %s6094_s17 }
0x1a2c   :  { %p5358_p1 = pnand %p5356_p0, %p5353_p13 }
0x1a2e   :  { %5361 = shalt.err (!%p5358_p1)
}
0x1a2f   :  { %4140 = dma.vmem_to_hbm [thread:$0]  %s4138_s2, 32, %s6094_s17, [#allocation4]  }
0x1a30   :  { %5372 = dma.done.wait [#allocation4], 32  }
0x1a31   :  { %5373 = vsyncadd [#allocation4], 4294967264 }
0x1a32   :  { %4144 = vsyncpa [#allocation3], 1 }
0x1a33   :  { %4145 = vsyncpa [#allocation6], 1 }
0x1a34   :  { %4146 = vsyncpa [#allocation9], 1 }
0x1a35   :  { %4147 = vsyncpa [#allocation12], 1 }
0x1a36   :  { %4148 = vsyncpa [#allocation15], 1 }
0x1a37   :  { %4149 = vsyncpa [#allocation4], 1 }

</bundles_post_ra>
